<compile_context>
chip_gen: v7x
topology: tpu7x:2x2x1
jax: 0.10.0
libtpu: 0.0.40
codegen_flags: <defaults>
</compile_context>

<pallas_src>
import functools

import jax
import jax.numpy as jnp
from jax.experimental import pallas as pl
from jax.experimental.pallas import tpu as pltpu


def _rcu_kernel(x_ref, xt_ref, xb_ref, w1_ref, b1_ref, w2_ref, b2_ref, o_ref,
                xa_ref, ya_ref, *, W, C, T):
    """One (batch, row-tile) step of relu -> conv1 -> relu -> conv2 -> +x.

    x_ref:   (T, W, C)  f32   main tile of the un-activated input (also the residual)
    xt_ref:  (2, W, C)  f32   2 rows above the tile (clamped duplicate at the border)
    xb_ref:  (2, W, C)  f32   2 rows below the tile (clamped duplicate at the border)
    w*_ref:  (3, 3, C, C) bf16 weights (ky, kx, Cin, Cout)
    b*_ref:  (1, C)     f32   biases
    o_ref:   (T, W, C)  f32   output tile
    xa_ref:  (T+4, W+16, C) bf16  relu(x) staging; data at cols [8, 8+W), zero at 7 / W+8
    ya_ref:  (T+2, W+16, C) bf16  relu(y1) staging; same column layout
    """
    r = pl.program_id(1)
    num_r = pl.num_programs(1)
    col0 = 8  # image column 0 lives at scratch column 8 -> sublane-aligned stores

    # --- zero only the borders of the padded scratch (interior is overwritten) ------
    xa_ref[:, col0 - 1:col0, :] = jnp.zeros((T + 4, 1, C), xa_ref.dtype)
    xa_ref[:, col0 + W:col0 + W + 1, :] = jnp.zeros((T + 4, 1, C), xa_ref.dtype)
    ya_ref[:, col0 - 1:col0, :] = jnp.zeros((T + 2, 1, C), ya_ref.dtype)
    ya_ref[:, col0 + W:col0 + W + 1, :] = jnp.zeros((T + 2, 1, C), ya_ref.dtype)

    # --- stage relu(x) for this tile plus its 2-row halo (aligned bf16 stores) ------
    xa_ref[2:2 + T, col0:col0 + W, :] = (
        jnp.maximum(x_ref[...], 0.0).astype(xa_ref.dtype))
    top = jnp.where(r == 0, 0.0, jnp.maximum(xt_ref[...], 0.0))
    xa_ref[0:2, col0:col0 + W, :] = top.astype(xa_ref.dtype)
    bot = jnp.where(r == num_r - 1, 0.0, jnp.maximum(xb_ref[...], 0.0))
    xa_ref[2 + T:4 + T, col0:col0 + W, :] = bot.astype(xa_ref.dtype)

    def conv3x3(src_ref, rows, w_ref, b_ref):
        """3x3 'same' conv: 9 ref-sliced taps, bf16 operands, f32 accumulation."""
        acc = None
        for ky in range(3):
            for kx in range(3):
                # Direct window load from the padded scratch (no full-buffer load,
                # no value window slicing); reshape is layout-preserving for W % 8 == 0.
                lhs = src_ref[ky:ky + rows, col0 - 1 + kx:col0 - 1 + kx + W, :]
                lhs = lhs.reshape(rows * W, C)
                tap = jnp.dot(lhs, w_ref[ky, kx],
                              preferred_element_type=jnp.float32)
                acc = tap if acc is None else acc + tap
        return acc + b_ref[...]                                   # (rows*W, C) f32

    # --- conv1 over T+2 rows (the tile plus conv2's 1-row halo on each side) --------
    y1 = conv3x3(xa_ref, T + 2, w1_ref, b1_ref)
    ya_ref[0:T + 2, col0:col0 + W, :] = (
        jnp.maximum(y1, 0.0).reshape(T + 2, W, C).astype(ya_ref.dtype))

    # y1 rows outside the image contribute zero to conv2 (SAME padding).
    @pl.when(r == 0)
    def _():
        ya_ref[0:1, col0:col0 + W, :] = jnp.zeros((1, W, C), ya_ref.dtype)

    @pl.when(r == num_r - 1)
    def _():
        ya_ref[T + 1:T + 2, col0:col0 + W, :] = jnp.zeros((1, W, C), ya_ref.dtype)

    # --- conv2 over the T output rows; residual re-reads the resident input block ---
    y2 = conv3x3(ya_ref, T, w2_ref, b2_ref)
    o_ref[...] = (y2.reshape(T, W, C) + x_ref[...]).astype(o_ref.dtype)


def _pick_tile_h(H):
    """Largest even divisor of H that is <= 32 (keeps halo overhead small)."""
    best = None
    for t in range(2, min(H, 32) + 1, 2):
        if H % t == 0:
            best = t
    return best


def residual_conv_unit_nhwc(x_nhwc, w1, b1, w2, b2, *, tile_h=None):
    """x_nhwc: (N, H, W, C); w*: (3, 3, C, C) HWIO; b*: (C,). Returns (N, H, W, C) f32."""
    N, H, W, C = x_nhwc.shape
    if tile_h is None:
        tile_h = _pick_tile_h(H)
    assert (tile_h is not None and H % 2 == 0 and tile_h % 2 == 0
            and tile_h >= 2 and H % tile_h == 0), (
        "H and tile_h must be even and tile_h must divide H")
    T = tile_h
    R = H // T
    hb = T // 2  # halo block stride along H, in units of 2-row blocks

    # Weights go to the MXU in bf16 (cast once, here); biases stay f32.
    w1b = w1.astype(jnp.bfloat16)
    w2b = w2.astype(jnp.bfloat16)
    b1r = b1.reshape(1, C).astype(jnp.float32)
    b2r = b2.reshape(1, C).astype(jnp.float32)

    kern = functools.partial(_rcu_kernel, W=W, C=C, T=T)

    top_map = lambda n, r: (n, jnp.maximum(r * hb - 1, 0), 0, 0)
    bot_map = lambda n, r: (n, jnp.minimum(r * hb + hb, H // 2 - 1), 0, 0)

    # VMEM budget: double-buffered blocks + the two padded bf16 scratch buffers.
    blk = 2 * (2 * T * W * C * 4          # x main + out blocks (f32)
               + 2 * (2 * W * C * 4)      # two 2-row halo blocks (f32)
               + 2 * 9 * C * C * 2        # two weights (bf16)
               + 2 * C * 4)               # two biases (f32)
    scr = ((T + 4) + (T + 2)) * (W + 16) * C * 2
    vmem_limit = min(100 * 1024 * 1024,
                     max(32 * 1024 * 1024, int(1.5 * (blk + scr))))

    conv_rows = (H + 2 * R) + H           # conv1 recomputes 2 halo rows per tile
    flops = int(N * 2 * 9 * W * C * C * conv_rows + N * 6 * H * W * C)
    bytes_accessed = int(4 * 2 * N * H * W * C          # x read + out write
                         + 4 * N * R * 4 * W * C        # halo re-reads
                         + 2 * 2 * 9 * C * C + 2 * 4 * C)

    return pl.pallas_call(
        kern,
        out_shape=jax.ShapeDtypeStruct((N, H, W, C), jnp.float32),
        grid=(N, R),
        in_specs=[
            pl.BlockSpec((None, T, W, C), lambda n, r: (n, r, 0, 0)),   # x main tile
            pl.BlockSpec((None, 2, W, C), top_map),                     # 2-row top halo
            pl.BlockSpec((None, 2, W, C), bot_map),                     # 2-row bottom halo
            pl.BlockSpec((3, 3, C, C), lambda n, r: (0, 0, 0, 0)),      # w1 (bf16)
            pl.BlockSpec((1, C), lambda n, r: (0, 0)),                  # b1
            pl.BlockSpec((3, 3, C, C), lambda n, r: (0, 0, 0, 0)),      # w2 (bf16)
            pl.BlockSpec((1, C), lambda n, r: (0, 0)),                  # b2
        ],
        out_specs=pl.BlockSpec((None, T, W, C), lambda n, r: (n, r, 0, 0)),
        scratch_shapes=[
            pltpu.VMEM((T + 4, W + 16, C), jnp.bfloat16),   # relu(x) + 2-row halo
            pltpu.VMEM((T + 2, W + 16, C), jnp.bfloat16),   # relu(y1) + 1-row halo
        ],
        compiler_params=pltpu.CompilerParams(
            dimension_semantics=("parallel", "parallel"),
            vmem_limit_bytes=vmem_limit,
        ),
        cost_estimate=pl.CostEstimate(
            flops=flops, transcendentals=0, bytes_accessed=bytes_accessed),
    )(x_nhwc, x_nhwc, x_nhwc, w1b, b1r, w2b, b2r)


def residual_conv_unit(x_nchw, w1, b1, w2, b2, *, tile_h=None):
    """PyTorch-layout wrapper.

    x_nchw: (N, C, H, W) f32; w1, w2: (3, 3, C, C) HWIO; b1, b2: (C,).
    """
    x = jnp.transpose(x_nchw, (0, 2, 3, 1))                   # NCHW -> NHWC
    y = residual_conv_unit_nhwc(x, w1, b1, w2, b2, tile_h=tile_h)
    return jnp.transpose(y, (0, 3, 1, 2))                     # NHWC -> NCHW


def _reference(x_nchw, w1, b1, w2, b2):
    """Pure-JAX reference mirroring the kernel's bf16-operand / f32-accumulate math."""
    def conv(x_nhwc, w, b):
        y = jax.lax.conv_general_dilated(
            x_nhwc.astype(jnp.bfloat16), w.astype(jnp.bfloat16),
            window_strides=(1, 1), padding="SAME",
            dimension_numbers=("NHWC", "HWIO", "NHWC"),
            preferred_element_type=jnp.float32)
        return y + b[None, None, None, :]
    x = jnp.transpose(x_nchw, (0, 2, 3, 1))
    out = jnp.maximum(x, 0.0)
    out = conv(out, w1, b1)
    out = jnp.maximum(out, 0.0)
    out = conv(out, w2, b2)
    out = out + x
    return jnp.transpose(out, (0, 3, 1, 2))


if __name__ == "__main__":
    key = jax.random.PRNGKey(0)

    # --- test 1: the module's small shape (features=4), two row tiles (halo path) ---
    N, C, H, W = 2, 4, 16, 16
    k_x, k_w1, k_b1, k_w2, k_b2 = jax.random.split(key, 5)
    x = jax.random.normal(k_x, (N, C, H, W), dtype=jnp.float32)
    # nn.Conv2d(features, features, 3, padding=1) weights stored HWIO.
    w1 = jax.random.normal(k_w1, (3, 3, C, C), dtype=jnp.float32) * 0.1
    b1 = jax.random.normal(k_b1, (C,), dtype=jnp.float32) * 0.1
    w2 = jax.random.normal(k_w2, (3, 3, C, C), dtype=jnp.float32) * 0.1
    b2 = jax.random.normal(k_b2, (C,), dtype=jnp.float32) * 0.1

    out = jax.block_until_ready(residual_conv_unit(x, w1, b1, w2, b2, tile_h=8))
    ref = _reference(x, w1, b1, w2, b2)
    assert out.shape == (N, C, H, W)
    assert jnp.allclose(out, ref, atol=1e-2, rtol=1e-2), "mismatch vs reference (C=4)"

    # --- test 2: lane-dense channels (C=128) with row tiling ------------------------
    N2, C2, H2, W2 = 1, 128, 32, 16
    k2 = jax.random.split(jax.random.PRNGKey(1), 5)
    x2 = jax.random.normal(k2[0], (N2, C2, H2, W2), dtype=jnp.float32)
    w1_2 = jax.random.normal(k2[1], (3, 3, C2, C2), dtype=jnp.float32) * 0.05
    b1_2 = jax.random.normal(k2[2], (C2,), dtype=jnp.float32) * 0.05
    w2_2 = jax.random.normal(k2[3], (3, 3, C2, C2), dtype=jnp.float32) * 0.05
    b2_2 = jax.random.normal(k2[4], (C2,), dtype=jnp.float32) * 0.05

    out2 = jax.block_until_ready(
        residual_conv_unit(x2, w1_2, b1_2, w2_2, b2_2, tile_h=16))
    ref2 = _reference(x2, w1_2, b1_2, w2_2, b2_2)
    assert jnp.allclose(out2, ref2, atol=2e-2, rtol=2e-2), "mismatch vs reference (C=128)"

    print("KERNEL_OK")
</pallas_src>

<mosaic_0001>
module attributes {stable_mosaic.version = 11 : i64} {
  func.func @_rcu_kernel(%arg0: i32, %arg1: i32, %arg2: memref<1x8x16x4xf32, #tpu.memory_space<vmem>>, %arg3: memref<1x2x16x4xf32, #tpu.memory_space<vmem>>, %arg4: memref<1x2x16x4xf32, #tpu.memory_space<vmem>>, %arg5: memref<3x3x4x4xbf16, #tpu.memory_space<vmem>>, %arg6: memref<1x4xf32, #tpu.memory_space<vmem>>, %arg7: memref<3x3x4x4xbf16, #tpu.memory_space<vmem>>, %arg8: memref<1x4xf32, #tpu.memory_space<vmem>>, %arg9: memref<1x8x16x4xf32, #tpu.memory_space<vmem>>, %arg10: memref<12x32x4xbf16, #tpu.memory_space<vmem>>, %arg11: memref<10x32x4xbf16, #tpu.memory_space<vmem>>) attributes {dimension_semantics = [#tpu.dimension_semantics<parallel>, #tpu.dimension_semantics<parallel>], iteration_bounds = array<i64: 2, 2>, scalar_prefetch = 0 : i64, scratch_operands = 2 : i64, tpu.core_type = #tpu.core_type<tc>, window_params = [{transform_indices = @transform_0, window_bounds = array<i64: 1, 8, 16, 4>}, {transform_indices = @transform_1, window_bounds = array<i64: 1, 2, 16, 4>}, {transform_indices = @transform_2, window_bounds = array<i64: 1, 2, 16, 4>}, {pipeline_mode = #tpu.pipeline_mode<synchronous>, transform_indices = @transform_3, window_bounds = array<i64: 3, 3, 4, 4>}, {pipeline_mode = #tpu.pipeline_mode<synchronous>, transform_indices = @transform_4, window_bounds = array<i64: 1, 4>}, {pipeline_mode = #tpu.pipeline_mode<synchronous>, transform_indices = @transform_5, window_bounds = array<i64: 3, 3, 4, 4>}, {pipeline_mode = #tpu.pipeline_mode<synchronous>, transform_indices = @transform_6, window_bounds = array<i64: 1, 4>}, {transform_indices = @transform_7, window_bounds = array<i64: 1, 8, 16, 4>}]} {
    %cst = arith.constant 0.000000e+00 : bf16
    %0 = vector.broadcast %cst : bf16 to vector<12x1x4xbf16>
    %c0 = arith.constant 0 : index
    %c7 = arith.constant 7 : index
    %c0_0 = arith.constant 0 : index
    %1 = vector.load %arg10[%c0, %c7, %c0_0] : memref<12x32x4xbf16, #tpu.memory_space<vmem>>, vector<12x1x4xbf16>
    tpu.vector_store %arg10[%c0, %c7, %c0_0], %0 {strides = array<i32>} : memref<12x32x4xbf16, #tpu.memory_space<vmem>>, vector<12x1x4xbf16>,
    %cst_1 = arith.constant 0.000000e+00 : bf16
    %2 = vector.broadcast %cst_1 : bf16 to vector<12x1x4xbf16>
    %c0_2 = arith.constant 0 : index
    %c24 = arith.constant 24 : index
    %c0_3 = arith.constant 0 : index
    %3 = vector.load %arg10[%c0_2, %c24, %c0_3] : memref<12x32x4xbf16, #tpu.memory_space<vmem>>, vector<12x1x4xbf16>
    tpu.vector_store %arg10[%c0_2, %c24, %c0_3], %2 {strides = array<i32>} : memref<12x32x4xbf16, #tpu.memory_space<vmem>>, vector<12x1x4xbf16>,
    %cst_4 = arith.constant 0.000000e+00 : bf16
    %4 = vector.broadcast %cst_4 : bf16 to vector<10x1x4xbf16>
    %c0_5 = arith.constant 0 : index
    %c7_6 = arith.constant 7 : index
    %c0_7 = arith.constant 0 : index
    %5 = vector.load %arg11[%c0_5, %c7_6, %c0_7] : memref<10x32x4xbf16, #tpu.memory_space<vmem>>, vector<10x1x4xbf16>
    tpu.vector_store %arg11[%c0_5, %c7_6, %c0_7], %4 {strides = array<i32>} : memref<10x32x4xbf16, #tpu.memory_space<vmem>>, vector<10x1x4xbf16>,
    %cst_8 = arith.constant 0.000000e+00 : bf16
    %6 = vector.broadcast %cst_8 : bf16 to vector<10x1x4xbf16>
    %c0_9 = arith.constant 0 : index
    %c24_10 = arith.constant 24 : index
    %c0_11 = arith.constant 0 : index
    %7 = vector.load %arg11[%c0_9, %c24_10, %c0_11] : memref<10x32x4xbf16, #tpu.memory_space<vmem>>, vector<10x1x4xbf16>
    tpu.vector_store %arg11[%c0_9, %c24_10, %c0_11], %6 {strides = array<i32>} : memref<10x32x4xbf16, #tpu.memory_space<vmem>>, vector<10x1x4xbf16>,
    %c0_12 = arith.constant 0 : index
    %c0_13 = arith.constant 0 : index
    %c0_14 = arith.constant 0 : index
    %c0_15 = arith.constant 0 : index
    %8 = vector.load %arg2[%c0_12, %c0_13, %c0_14, %c0_15] : memref<1x8x16x4xf32, #tpu.memory_space<vmem>>, vector<1x8x16x4xf32>
    %9 = vector.shape_cast %8 : vector<1x8x16x4xf32> to vector<8x16x4xf32>
    %cst_16 = arith.constant 0.000000e+00 : f32
    %10 = vector.broadcast %cst_16 : f32 to vector<8x16x4xf32>
    %11 = arith.maximumf %9, %10 : vector<8x16x4xf32>
    %12 = arith.truncf %11 : vector<8x16x4xf32> to vector<8x16x4xbf16>
    %c2 = arith.constant 2 : index
    %c8 = arith.constant 8 : index
    %c0_17 = arith.constant 0 : index
    %13 = vector.load %arg10[%c2, %c8, %c0_17] : memref<12x32x4xbf16, #tpu.memory_space<vmem>>, vector<8x16x4xbf16>
    tpu.vector_store %arg10[%c2, %c8, %c0_17], %12 {strides = array<i32>} : memref<12x32x4xbf16, #tpu.memory_space<vmem>>, vector<8x16x4xbf16>,
    %c0_i32 = arith.constant 0 : i32
    %14 = arith.cmpi eq, %arg1, %c0_i32 : i32
    %c0_18 = arith.constant 0 : index
    %c0_19 = arith.constant 0 : index
    %c0_20 = arith.constant 0 : index
    %c0_21 = arith.constant 0 : index
    %15 = vector.load %arg3[%c0_18, %c0_19, %c0_20, %c0_21] : memref<1x2x16x4xf32, #tpu.memory_space<vmem>>, vector<1x2x16x4xf32>
    %16 = vector.shape_cast %15 : vector<1x2x16x4xf32> to vector<2x16x4xf32>
    %cst_22 = arith.constant 0.000000e+00 : f32
    %17 = vector.broadcast %cst_22 : f32 to vector<2x16x4xf32>
    %18 = arith.maximumf %16, %17 : vector<2x16x4xf32>
    %cst_23 = arith.constant 0.000000e+00 : f32
    %19 = vector.broadcast %cst_23 : f32 to vector<2x16x4xf32>
    %20 = arith.select %14, %19, %18 : vector<2x16x4xf32>
    %21 = arith.truncf %20 : vector<2x16x4xf32> to vector<2x16x4xbf16>
    %c0_24 = arith.constant 0 : index
    %c8_25 = arith.constant 8 : index
    %c0_26 = arith.constant 0 : index
    %22 = vector.load %arg10[%c0_24, %c8_25, %c0_26] : memref<12x32x4xbf16, #tpu.memory_space<vmem>>, vector<2x16x4xbf16>
    tpu.vector_store %arg10[%c0_24, %c8_25, %c0_26], %21 {strides = array<i32>} : memref<12x32x4xbf16, #tpu.memory_space<vmem>>, vector<2x16x4xbf16>,
    %c1_i32 = arith.constant 1 : i32
    %23 = arith.cmpi eq, %arg1, %c1_i32 : i32
    %c0_27 = arith.constant 0 : index
    %c0_28 = arith.constant 0 : index
    %c0_29 = arith.constant 0 : index
    %c0_30 = arith.constant 0 : index
    %24 = vector.load %arg4[%c0_27, %c0_28, %c0_29, %c0_30] : memref<1x2x16x4xf32, #tpu.memory_space<vmem>>, vector<1x2x16x4xf32>
    %25 = vector.shape_cast %24 : vector<1x2x16x4xf32> to vector<2x16x4xf32>
    %cst_31 = arith.constant 0.000000e+00 : f32
    %26 = vector.broadcast %cst_31 : f32 to vector<2x16x4xf32>
    %27 = arith.maximumf %25, %26 : vector<2x16x4xf32>
    %cst_32 = arith.constant 0.000000e+00 : f32
    %28 = vector.broadcast %cst_32 : f32 to vector<2x16x4xf32>
    %29 = arith.select %23, %28, %27 : vector<2x16x4xf32>
    %30 = arith.truncf %29 : vector<2x16x4xf32> to vector<2x16x4xbf16>
    %c10 = arith.constant 10 : index
    %c8_33 = arith.constant 8 : index
    %c0_34 = arith.constant 0 : index
    %31 = vector.load %arg10[%c10, %c8_33, %c0_34] : memref<12x32x4xbf16, #tpu.memory_space<vmem>>, vector<2x16x4xbf16>
    tpu.vector_store %arg10[%c10, %c8_33, %c0_34], %30 {strides = array<i32>} : memref<12x32x4xbf16, #tpu.memory_space<vmem>>, vector<2x16x4xbf16>,
    %c0_35 = arith.constant 0 : index
    %c7_36 = arith.constant 7 : index
    %c0_37 = arith.constant 0 : index
    %32 = vector.load %arg10[%c0_35, %c7_36, %c0_37] : memref<12x32x4xbf16, #tpu.memory_space<vmem>>, vector<10x16x4xbf16>
    %33 = vector.shape_cast %32 : vector<10x16x4xbf16> to vector<160x4xbf16>
    %c0_38 = arith.constant 0 : index
    %c0_39 = arith.constant 0 : index
    %c0_40 = arith.constant 0 : index
    %c0_41 = arith.constant 0 : index
    %34 = vector.load %arg5[%c0_38, %c0_39, %c0_40, %c0_41] : memref<3x3x4x4xbf16, #tpu.memory_space<vmem>>, vector<1x1x4x4xbf16>
    %35 = vector.shape_cast %34 : vector<1x1x4x4xbf16> to vector<4x4xbf16>
    %cst_42 = arith.constant dense<0.000000e+00> : vector<160x4xf32>
    %36 = tpu.matmul %33, %35, %cst_42 {dimension_numbers = #tpu.dot_dimension_numbers<[1], [0], [0], [1], [0, 0, 1, 1], [], []>} : vector<160x4xbf16>, vector<4x4xbf16>, vector<160x4xf32> -> vector<160x4xf32>
    %c0_43 = arith.constant 0 : index
    %c8_44 = arith.constant 8 : index
    %c0_45 = arith.constant 0 : index
    %37 = vector.load %arg10[%c0_43, %c8_44, %c0_45] : memref<12x32x4xbf16, #tpu.memory_space<vmem>>, vector<10x16x4xbf16>
    %38 = vector.shape_cast %37 : vector<10x16x4xbf16> to vector<160x4xbf16>
    %c0_46 = arith.constant 0 : index
    %c1 = arith.constant 1 : index
    %c0_47 = arith.constant 0 : index
    %c0_48 = arith.constant 0 : index
    %39 = vector.load %arg5[%c0_46, %c1, %c0_47, %c0_48] : memref<3x3x4x4xbf16, #tpu.memory_space<vmem>>, vector<1x1x4x4xbf16>
    %40 = vector.shape_cast %39 : vector<1x1x4x4xbf16> to vector<4x4xbf16>
    %cst_49 = arith.constant dense<0.000000e+00> : vector<160x4xf32>
    %41 = tpu.matmul %38, %40, %cst_49 {dimension_numbers = #tpu.dot_dimension_numbers<[1], [0], [0], [1], [0, 0, 1, 1], [], []>} : vector<160x4xbf16>, vector<4x4xbf16>, vector<160x4xf32> -> vector<160x4xf32>
    %42 = arith.addf %36, %41 : vector<160x4xf32>
    %c0_50 = arith.constant 0 : index
    %c9 = arith.constant 9 : index
    %c0_51 = arith.constant 0 : index
    %43 = vector.load %arg10[%c0_50, %c9, %c0_51] : memref<12x32x4xbf16, #tpu.memory_space<vmem>>, vector<10x16x4xbf16>
    %44 = vector.shape_cast %43 : vector<10x16x4xbf16> to vector<160x4xbf16>
    %c0_52 = arith.constant 0 : index
    %c2_53 = arith.constant 2 : index
    %c0_54 = arith.constant 0 : index
    %c0_55 = arith.constant 0 : index
    %45 = vector.load %arg5[%c0_52, %c2_53, %c0_54, %c0_55] : memref<3x3x4x4xbf16, #tpu.memory_space<vmem>>, vector<1x1x4x4xbf16>
    %46 = vector.shape_cast %45 : vector<1x1x4x4xbf16> to vector<4x4xbf16>
    %cst_56 = arith.constant dense<0.000000e+00> : vector<160x4xf32>
    %47 = tpu.matmul %44, %46, %cst_56 {dimension_numbers = #tpu.dot_dimension_numbers<[1], [0], [0], [1], [0, 0, 1, 1], [], []>} : vector<160x4xbf16>, vector<4x4xbf16>, vector<160x4xf32> -> vector<160x4xf32>
    %48 = arith.addf %42, %47 : vector<160x4xf32>
    %c1_57 = arith.constant 1 : index
    %c7_58 = arith.constant 7 : index
    %c0_59 = arith.constant 0 : index
    %49 = vector.load %arg10[%c1_57, %c7_58, %c0_59] : memref<12x32x4xbf16, #tpu.memory_space<vmem>>, vector<10x16x4xbf16>
    %50 = vector.shape_cast %49 : vector<10x16x4xbf16> to vector<160x4xbf16>
    %c1_60 = arith.constant 1 : index
    %c0_61 = arith.constant 0 : index
    %c0_62 = arith.constant 0 : index
    %c0_63 = arith.constant 0 : index
    %51 = vector.load %arg5[%c1_60, %c0_61, %c0_62, %c0_63] : memref<3x3x4x4xbf16, #tpu.memory_space<vmem>>, vector<1x1x4x4xbf16>
    %52 = vector.shape_cast %51 : vector<1x1x4x4xbf16> to vector<4x4xbf16>
    %cst_64 = arith.constant dense<0.000000e+00> : vector<160x4xf32>
    %53 = tpu.matmul %50, %52, %cst_64 {dimension_numbers = #tpu.dot_dimension_numbers<[1], [0], [0], [1], [0, 0, 1, 1], [], []>} : vector<160x4xbf16>, vector<4x4xbf16>, vector<160x4xf32> -> vector<160x4xf32>
    %54 = arith.addf %48, %53 : vector<160x4xf32>
    %c1_65 = arith.constant 1 : index
    %c8_66 = arith.constant 8 : index
    %c0_67 = arith.constant 0 : index
    %55 = vector.load %arg10[%c1_65, %c8_66, %c0_67] : memref<12x32x4xbf16, #tpu.memory_space<vmem>>, vector<10x16x4xbf16>
    %56 = vector.shape_cast %55 : vector<10x16x4xbf16> to vector<160x4xbf16>
    %c1_68 = arith.constant 1 : index
    %c1_69 = arith.constant 1 : index
    %c0_70 = arith.constant 0 : index
    %c0_71 = arith.constant 0 : index
    %57 = vector.load %arg5[%c1_68, %c1_69, %c0_70, %c0_71] : memref<3x3x4x4xbf16, #tpu.memory_space<vmem>>, vector<1x1x4x4xbf16>
    %58 = vector.shape_cast %57 : vector<1x1x4x4xbf16> to vector<4x4xbf16>
    %cst_72 = arith.constant dense<0.000000e+00> : vector<160x4xf32>
    %59 = tpu.matmul %56, %58, %cst_72 {dimension_numbers = #tpu.dot_dimension_numbers<[1], [0], [0], [1], [0, 0, 1, 1], [], []>} : vector<160x4xbf16>, vector<4x4xbf16>, vector<160x4xf32> -> vector<160x4xf32>
    %60 = arith.addf %54, %59 : vector<160x4xf32>
    %c1_73 = arith.constant 1 : index
    %c9_74 = arith.constant 9 : index
    %c0_75 = arith.constant 0 : index
    %61 = vector.load %arg10[%c1_73, %c9_74, %c0_75] : memref<12x32x4xbf16, #tpu.memory_space<vmem>>, vector<10x16x4xbf16>
    %62 = vector.shape_cast %61 : vector<10x16x4xbf16> to vector<160x4xbf16>
    %c1_76 = arith.constant 1 : index
    %c2_77 = arith.constant 2 : index
    %c0_78 = arith.constant 0 : index
    %c0_79 = arith.constant 0 : index
    %63 = vector.load %arg5[%c1_76, %c2_77, %c0_78, %c0_79] : memref<3x3x4x4xbf16, #tpu.memory_space<vmem>>, vector<1x1x4x4xbf16>
    %64 = vector.shape_cast %63 : vector<1x1x4x4xbf16> to vector<4x4xbf16>
    %cst_80 = arith.constant dense<0.000000e+00> : vector<160x4xf32>
    %65 = tpu.matmul %62, %64, %cst_80 {dimension_numbers = #tpu.dot_dimension_numbers<[1], [0], [0], [1], [0, 0, 1, 1], [], []>} : vector<160x4xbf16>, vector<4x4xbf16>, vector<160x4xf32> -> vector<160x4xf32>
    %66 = arith.addf %60, %65 : vector<160x4xf32>
    %c2_81 = arith.constant 2 : index
    %c7_82 = arith.constant 7 : index
    %c0_83 = arith.constant 0 : index
    %67 = vector.load %arg10[%c2_81, %c7_82, %c0_83] : memref<12x32x4xbf16, #tpu.memory_space<vmem>>, vector<10x16x4xbf16>
    %68 = vector.shape_cast %67 : vector<10x16x4xbf16> to vector<160x4xbf16>
    %c2_84 = arith.constant 2 : index
    %c0_85 = arith.constant 0 : index
    %c0_86 = arith.constant 0 : index
    %c0_87 = arith.constant 0 : index
    %69 = vector.load %arg5[%c2_84, %c0_85, %c0_86, %c0_87] : memref<3x3x4x4xbf16, #tpu.memory_space<vmem>>, vector<1x1x4x4xbf16>
    %70 = vector.shape_cast %69 : vector<1x1x4x4xbf16> to vector<4x4xbf16>
    %cst_88 = arith.constant dense<0.000000e+00> : vector<160x4xf32>
    %71 = tpu.matmul %68, %70, %cst_88 {dimension_numbers = #tpu.dot_dimension_numbers<[1], [0], [0], [1], [0, 0, 1, 1], [], []>} : vector<160x4xbf16>, vector<4x4xbf16>, vector<160x4xf32> -> vector<160x4xf32>
    %72 = arith.addf %66, %71 : vector<160x4xf32>
    %c2_89 = arith.constant 2 : index
    %c8_90 = arith.constant 8 : index
    %c0_91 = arith.constant 0 : index
    %73 = vector.load %arg10[%c2_89, %c8_90, %c0_91] : memref<12x32x4xbf16, #tpu.memory_space<vmem>>, vector<10x16x4xbf16>
    %74 = vector.shape_cast %73 : vector<10x16x4xbf16> to vector<160x4xbf16>
    %c2_92 = arith.constant 2 : index
    %c1_93 = arith.constant 1 : index
    %c0_94 = arith.constant 0 : index
    %c0_95 = arith.constant 0 : index
    %75 = vector.load %arg5[%c2_92, %c1_93, %c0_94, %c0_95] : memref<3x3x4x4xbf16, #tpu.memory_space<vmem>>, vector<1x1x4x4xbf16>
    %76 = vector.shape_cast %75 : vector<1x1x4x4xbf16> to vector<4x4xbf16>
    %cst_96 = arith.constant dense<0.000000e+00> : vector<160x4xf32>
    %77 = tpu.matmul %74, %76, %cst_96 {dimension_numbers = #tpu.dot_dimension_numbers<[1], [0], [0], [1], [0, 0, 1, 1], [], []>} : vector<160x4xbf16>, vector<4x4xbf16>, vector<160x4xf32> -> vector<160x4xf32>
    %78 = arith.addf %72, %77 : vector<160x4xf32>
    %c2_97 = arith.constant 2 : index
    %c9_98 = arith.constant 9 : index
    %c0_99 = arith.constant 0 : index
    %79 = vector.load %arg10[%c2_97, %c9_98, %c0_99] : memref<12x32x4xbf16, #tpu.memory_space<vmem>>, vector<10x16x4xbf16>
    %80 = vector.shape_cast %79 : vector<10x16x4xbf16> to vector<160x4xbf16>
    %c2_100 = arith.constant 2 : index
    %c2_101 = arith.constant 2 : index
    %c0_102 = arith.constant 0 : index
    %c0_103 = arith.constant 0 : index
    %81 = vector.load %arg5[%c2_100, %c2_101, %c0_102, %c0_103] : memref<3x3x4x4xbf16, #tpu.memory_space<vmem>>, vector<1x1x4x4xbf16>
    %82 = vector.shape_cast %81 : vector<1x1x4x4xbf16> to vector<4x4xbf16>
    %cst_104 = arith.constant dense<0.000000e+00> : vector<160x4xf32>
    %83 = tpu.matmul %80, %82, %cst_104 {dimension_numbers = #tpu.dot_dimension_numbers<[1], [0], [0], [1], [0, 0, 1, 1], [], []>} : vector<160x4xbf16>, vector<4x4xbf16>, vector<160x4xf32> -> vector<160x4xf32>
    %84 = arith.addf %78, %83 : vector<160x4xf32>
    %c0_105 = arith.constant 0 : index
    %c0_106 = arith.constant 0 : index
    %85 = vector.load %arg6[%c0_105, %c0_106] : memref<1x4xf32, #tpu.memory_space<vmem>>, vector<1x4xf32>
    %86 = vector.broadcast %85 : vector<1x4xf32> to vector<160x4xf32>
    %87 = arith.addf %84, %86 : vector<160x4xf32>
    %cst_107 = arith.constant 0.000000e+00 : f32
    %88 = vector.broadcast %cst_107 : f32 to vector<160x4xf32>
    %89 = arith.maximumf %87, %88 : vector<160x4xf32>
    %90 = vector.shape_cast %89 : vector<160x4xf32> to vector<10x16x4xf32>
    %91 = arith.truncf %90 : vector<10x16x4xf32> to vector<10x16x4xbf16>
    %c0_108 = arith.constant 0 : index
    %c8_109 = arith.constant 8 : index
    %c0_110 = arith.constant 0 : index
    %92 = vector.load %arg11[%c0_108, %c8_109, %c0_110] : memref<10x32x4xbf16, #tpu.memory_space<vmem>>, vector<10x16x4xbf16>
    tpu.vector_store %arg11[%c0_108, %c8_109, %c0_110], %91 {strides = array<i32>} : memref<10x32x4xbf16, #tpu.memory_space<vmem>>, vector<10x16x4xbf16>,
    %c0_i32_111 = arith.constant 0 : i32
    %93 = arith.cmpi eq, %arg1, %c0_i32_111 : i32
    %94 = arith.extui %93 : i1 to i32
    %c0_i32_112 = arith.constant 0 : i32
    %95 = arith.cmpi ne, %94, %c0_i32_112 : i32
    scf.if %95 {
      %cst_197 = arith.constant 0.000000e+00 : bf16
      %162 = vector.broadcast %cst_197 : bf16 to vector<1x16x4xbf16>
      %c0_198 = arith.constant 0 : index
      %c8_199 = arith.constant 8 : index
      %c0_200 = arith.constant 0 : index
      %163 = vector.load %arg11[%c0_198, %c8_199, %c0_200] : memref<10x32x4xbf16, #tpu.memory_space<vmem>>, vector<1x16x4xbf16>
      tpu.vector_store %arg11[%c0_198, %c8_199, %c0_200], %162 {strides = array<i32>} : memref<10x32x4xbf16, #tpu.memory_space<vmem>>, vector<1x16x4xbf16>,
    } else {
    }
    %c1_i32_113 = arith.constant 1 : i32
    %96 = arith.cmpi eq, %arg1, %c1_i32_113 : i32
    %97 = arith.extui %96 : i1 to i32
    %c0_i32_114 = arith.constant 0 : i32
    %98 = arith.cmpi ne, %97, %c0_i32_114 : i32
    scf.if %98 {
      %cst_197 = arith.constant 0.000000e+00 : bf16
      %162 = vector.broadcast %cst_197 : bf16 to vector<1x16x4xbf16>
      %c9_198 = arith.constant 9 : index
      %c8_199 = arith.constant 8 : index
      %c0_200 = arith.constant 0 : index
      %163 = vector.load %arg11[%c9_198, %c8_199, %c0_200] : memref<10x32x4xbf16, #tpu.memory_space<vmem>>, vector<1x16x4xbf16>
      tpu.vector_store %arg11[%c9_198, %c8_199, %c0_200], %162 {strides = array<i32>} : memref<10x32x4xbf16, #tpu.memory_space<vmem>>, vector<1x16x4xbf16>,
    } else {
    }
    %c0_115 = arith.constant 0 : index
    %c7_116 = arith.constant 7 : index
    %c0_117 = arith.constant 0 : index
    %99 = vector.load %arg11[%c0_115, %c7_116, %c0_117] : memref<10x32x4xbf16, #tpu.memory_space<vmem>>, vector<8x16x4xbf16>
    %100 = vector.shape_cast %99 : vector<8x16x4xbf16> to vector<128x4xbf16>
    %c0_118 = arith.constant 0 : index
    %c0_119 = arith.constant 0 : index
    %c0_120 = arith.constant 0 : index
    %c0_121 = arith.constant 0 : index
    %101 = vector.load %arg7[%c0_118, %c0_119, %c0_120, %c0_121] : memref<3x3x4x4xbf16, #tpu.memory_space<vmem>>, vector<1x1x4x4xbf16>
    %102 = vector.shape_cast %101 : vector<1x1x4x4xbf16> to vector<4x4xbf16>
    %cst_122 = arith.constant dense<0.000000e+00> : vector<128x4xf32>
    %103 = tpu.matmul %100, %102, %cst_122 {dimension_numbers = #tpu.dot_dimension_numbers<[1], [0], [0], [1], [0, 0, 1, 1], [], []>} : vector<128x4xbf16>, vector<4x4xbf16>, vector<128x4xf32> -> vector<128x4xf32>
    %c0_123 = arith.constant 0 : index
    %c8_124 = arith.constant 8 : index
    %c0_125 = arith.constant 0 : index
    %104 = vector.load %arg11[%c0_123, %c8_124, %c0_125] : memref<10x32x4xbf16, #tpu.memory_space<vmem>>, vector<8x16x4xbf16>
    %105 = vector.shape_cast %104 : vector<8x16x4xbf16> to vector<128x4xbf16>
    %c0_126 = arith.constant 0 : index
    %c1_127 = arith.constant 1 : index
    %c0_128 = arith.constant 0 : index
    %c0_129 = arith.constant 0 : index
    %106 = vector.load %arg7[%c0_126, %c1_127, %c0_128, %c0_129] : memref<3x3x4x4xbf16, #tpu.memory_space<vmem>>, vector<1x1x4x4xbf16>
    %107 = vector.shape_cast %106 : vector<1x1x4x4xbf16> to vector<4x4xbf16>
    %cst_130 = arith.constant dense<0.000000e+00> : vector<128x4xf32>
    %108 = tpu.matmul %105, %107, %cst_130 {dimension_numbers = #tpu.dot_dimension_numbers<[1], [0], [0], [1], [0, 0, 1, 1], [], []>} : vector<128x4xbf16>, vector<4x4xbf16>, vector<128x4xf32> -> vector<128x4xf32>
    %109 = arith.addf %103, %108 : vector<128x4xf32>
    %c0_131 = arith.constant 0 : index
    %c9_132 = arith.constant 9 : index
    %c0_133 = arith.constant 0 : index
    %110 = vector.load %arg11[%c0_131, %c9_132, %c0_133] : memref<10x32x4xbf16, #tpu.memory_space<vmem>>, vector<8x16x4xbf16>
    %111 = vector.shape_cast %110 : vector<8x16x4xbf16> to vector<128x4xbf16>
    %c0_134 = arith.constant 0 : index
    %c2_135 = arith.constant 2 : index
    %c0_136 = arith.constant 0 : index
    %c0_137 = arith.constant 0 : index
    %112 = vector.load %arg7[%c0_134, %c2_135, %c0_136, %c0_137] : memref<3x3x4x4xbf16, #tpu.memory_space<vmem>>, vector<1x1x4x4xbf16>
    %113 = vector.shape_cast %112 : vector<1x1x4x4xbf16> to vector<4x4xbf16>
    %cst_138 = arith.constant dense<0.000000e+00> : vector<128x4xf32>
    %114 = tpu.matmul %111, %113, %cst_138 {dimension_numbers = #tpu.dot_dimension_numbers<[1], [0], [0], [1], [0, 0, 1, 1], [], []>} : vector<128x4xbf16>, vector<4x4xbf16>, vector<128x4xf32> -> vector<128x4xf32>
    %115 = arith.addf %109, %114 : vector<128x4xf32>
    %c1_139 = arith.constant 1 : index
    %c7_140 = arith.constant 7 : index
    %c0_141 = arith.constant 0 : index
    %116 = vector.load %arg11[%c1_139, %c7_140, %c0_141] : memref<10x32x4xbf16, #tpu.memory_space<vmem>>, vector<8x16x4xbf16>
    %117 = vector.shape_cast %116 : vector<8x16x4xbf16> to vector<128x4xbf16>
    %c1_142 = arith.constant 1 : index
    %c0_143 = arith.constant 0 : index
    %c0_144 = arith.constant 0 : index
    %c0_145 = arith.constant 0 : index
    %118 = vector.load %arg7[%c1_142, %c0_143, %c0_144, %c0_145] : memref<3x3x4x4xbf16, #tpu.memory_space<vmem>>, vector<1x1x4x4xbf16>
    %119 = vector.shape_cast %118 : vector<1x1x4x4xbf16> to vector<4x4xbf16>
    %cst_146 = arith.constant dense<0.000000e+00> : vector<128x4xf32>
    %120 = tpu.matmul %117, %119, %cst_146 {dimension_numbers = #tpu.dot_dimension_numbers<[1], [0], [0], [1], [0, 0, 1, 1], [], []>} : vector<128x4xbf16>, vector<4x4xbf16>, vector<128x4xf32> -> vector<128x4xf32>
    %121 = arith.addf %115, %120 : vector<128x4xf32>
    %c1_147 = arith.constant 1 : index
    %c8_148 = arith.constant 8 : index
    %c0_149 = arith.constant 0 : index
    %122 = vector.load %arg11[%c1_147, %c8_148, %c0_149] : memref<10x32x4xbf16, #tpu.memory_space<vmem>>, vector<8x16x4xbf16>
    %123 = vector.shape_cast %122 : vector<8x16x4xbf16> to vector<128x4xbf16>
    %c1_150 = arith.constant 1 : index
    %c1_151 = arith.constant 1 : index
    %c0_152 = arith.constant 0 : index
    %c0_153 = arith.constant 0 : index
    %124 = vector.load %arg7[%c1_150, %c1_151, %c0_152, %c0_153] : memref<3x3x4x4xbf16, #tpu.memory_space<vmem>>, vector<1x1x4x4xbf16>
    %125 = vector.shape_cast %124 : vector<1x1x4x4xbf16> to vector<4x4xbf16>
    %cst_154 = arith.constant dense<0.000000e+00> : vector<128x4xf32>
    %126 = tpu.matmul %123, %125, %cst_154 {dimension_numbers = #tpu.dot_dimension_numbers<[1], [0], [0], [1], [0, 0, 1, 1], [], []>} : vector<128x4xbf16>, vector<4x4xbf16>, vector<128x4xf32> -> vector<128x4xf32>
    %127 = arith.addf %121, %126 : vector<128x4xf32>
    %c1_155 = arith.constant 1 : index
    %c9_156 = arith.constant 9 : index
    %c0_157 = arith.constant 0 : index
    %128 = vector.load %arg11[%c1_155, %c9_156, %c0_157] : memref<10x32x4xbf16, #tpu.memory_space<vmem>>, vector<8x16x4xbf16>
    %129 = vector.shape_cast %128 : vector<8x16x4xbf16> to vector<128x4xbf16>
    %c1_158 = arith.constant 1 : index
    %c2_159 = arith.constant 2 : index
    %c0_160 = arith.constant 0 : index
    %c0_161 = arith.constant 0 : index
    %130 = vector.load %arg7[%c1_158, %c2_159, %c0_160, %c0_161] : memref<3x3x4x4xbf16, #tpu.memory_space<vmem>>, vector<1x1x4x4xbf16>
    %131 = vector.shape_cast %130 : vector<1x1x4x4xbf16> to vector<4x4xbf16>
    %cst_162 = arith.constant dense<0.000000e+00> : vector<128x4xf32>
    %132 = tpu.matmul %129, %131, %cst_162 {dimension_numbers = #tpu.dot_dimension_numbers<[1], [0], [0], [1], [0, 0, 1, 1], [], []>} : vector<128x4xbf16>, vector<4x4xbf16>, vector<128x4xf32> -> vector<128x4xf32>
    %133 = arith.addf %127, %132 : vector<128x4xf32>
    %c2_163 = arith.constant 2 : index
    %c7_164 = arith.constant 7 : index
    %c0_165 = arith.constant 0 : index
    %134 = vector.load %arg11[%c2_163, %c7_164, %c0_165] : memref<10x32x4xbf16, #tpu.memory_space<vmem>>, vector<8x16x4xbf16>
    %135 = vector.shape_cast %134 : vector<8x16x4xbf16> to vector<128x4xbf16>
    %c2_166 = arith.constant 2 : index
    %c0_167 = arith.constant 0 : index
    %c0_168 = arith.constant 0 : index
    %c0_169 = arith.constant 0 : index
    %136 = vector.load %arg7[%c2_166, %c0_167, %c0_168, %c0_169] : memref<3x3x4x4xbf16, #tpu.memory_space<vmem>>, vector<1x1x4x4xbf16>
    %137 = vector.shape_cast %136 : vector<1x1x4x4xbf16> to vector<4x4xbf16>
    %cst_170 = arith.constant dense<0.000000e+00> : vector<128x4xf32>
    %138 = tpu.matmul %135, %137, %cst_170 {dimension_numbers = #tpu.dot_dimension_numbers<[1], [0], [0], [1], [0, 0, 1, 1], [], []>} : vector<128x4xbf16>, vector<4x4xbf16>, vector<128x4xf32> -> vector<128x4xf32>
    %139 = arith.addf %133, %138 : vector<128x4xf32>
    %c2_171 = arith.constant 2 : index
    %c8_172 = arith.constant 8 : index
    %c0_173 = arith.constant 0 : index
    %140 = vector.load %arg11[%c2_171, %c8_172, %c0_173] : memref<10x32x4xbf16, #tpu.memory_space<vmem>>, vector<8x16x4xbf16>
    %141 = vector.shape_cast %140 : vector<8x16x4xbf16> to vector<128x4xbf16>
    %c2_174 = arith.constant 2 : index
    %c1_175 = arith.constant 1 : index
    %c0_176 = arith.constant 0 : index
    %c0_177 = arith.constant 0 : index
    %142 = vector.load %arg7[%c2_174, %c1_175, %c0_176, %c0_177] : memref<3x3x4x4xbf16, #tpu.memory_space<vmem>>, vector<1x1x4x4xbf16>
    %143 = vector.shape_cast %142 : vector<1x1x4x4xbf16> to vector<4x4xbf16>
    %cst_178 = arith.constant dense<0.000000e+00> : vector<128x4xf32>
    %144 = tpu.matmul %141, %143, %cst_178 {dimension_numbers = #tpu.dot_dimension_numbers<[1], [0], [0], [1], [0, 0, 1, 1], [], []>} : vector<128x4xbf16>, vector<4x4xbf16>, vector<128x4xf32> -> vector<128x4xf32>
    %145 = arith.addf %139, %144 : vector<128x4xf32>
    %c2_179 = arith.constant 2 : index
    %c9_180 = arith.constant 9 : index
    %c0_181 = arith.constant 0 : index
    %146 = vector.load %arg11[%c2_179, %c9_180, %c0_181] : memref<10x32x4xbf16, #tpu.memory_space<vmem>>, vector<8x16x4xbf16>
    %147 = vector.shape_cast %146 : vector<8x16x4xbf16> to vector<128x4xbf16>
    %c2_182 = arith.constant 2 : index
    %c2_183 = arith.constant 2 : index
    %c0_184 = arith.constant 0 : index
    %c0_185 = arith.constant 0 : index
    %148 = vector.load %arg7[%c2_182, %c2_183, %c0_184, %c0_185] : memref<3x3x4x4xbf16, #tpu.memory_space<vmem>>, vector<1x1x4x4xbf16>
    %149 = vector.shape_cast %148 : vector<1x1x4x4xbf16> to vector<4x4xbf16>
    %cst_186 = arith.constant dense<0.000000e+00> : vector<128x4xf32>
    %150 = tpu.matmul %147, %149, %cst_186 {dimension_numbers = #tpu.dot_dimension_numbers<[1], [0], [0], [1], [0, 0, 1, 1], [], []>} : vector<128x4xbf16>, vector<4x4xbf16>, vector<128x4xf32> -> vector<128x4xf32>
    %151 = arith.addf %145, %150 : vector<128x4xf32>
    %c0_187 = arith.constant 0 : index
    %c0_188 = arith.constant 0 : index
    %152 = vector.load %arg8[%c0_187, %c0_188] : memref<1x4xf32, #tpu.memory_space<vmem>>, vector<1x4xf32>
    %153 = vector.broadcast %152 : vector<1x4xf32> to vector<128x4xf32>
    %154 = arith.addf %151, %153 : vector<128x4xf32>
    %155 = vector.shape_cast %154 : vector<128x4xf32> to vector<8x16x4xf32>
    %c0_189 = arith.constant 0 : index
    %c0_190 = arith.constant 0 : index
    %c0_191 = arith.constant 0 : index
    %c0_192 = arith.constant 0 : index
    %156 = vector.load %arg2[%c0_189, %c0_190, %c0_191, %c0_192] : memref<1x8x16x4xf32, #tpu.memory_space<vmem>>, vector<1x8x16x4xf32>
    %157 = vector.shape_cast %156 : vector<1x8x16x4xf32> to vector<8x16x4xf32>
    %158 = arith.addf %155, %157 : vector<8x16x4xf32>
    %c0_193 = arith.constant 0 : index
    %c0_194 = arith.constant 0 : index
    %c0_195 = arith.constant 0 : index
    %c0_196 = arith.constant 0 : index
    %159 = vector.load %arg9[%c0_193, %c0_194, %c0_195, %c0_196] : memref<1x8x16x4xf32, #tpu.memory_space<vmem>>, vector<1x8x16x4xf32>
    %160 = vector.shape_cast %159 : vector<1x8x16x4xf32> to vector<8x16x4xf32>
    %161 = vector.shape_cast %158 : vector<8x16x4xf32> to vector<1x8x16x4xf32>
    tpu.vector_store %arg9[%c0_193, %c0_194, %c0_195, %c0_196], %161 {strides = array<i32>} : memref<1x8x16x4xf32, #tpu.memory_space<vmem>>, vector<1x8x16x4xf32>,
    return
  }
  func.func @transform_0(%arg0: i32, %arg1: i32) -> (i32, i32, i32, i32) {
    %c0_i32 = arith.constant 0 : i32
    %c0_i32_0 = arith.constant 0 : i32
    %c0_i32_1 = arith.constant 0 : i32
    return %arg0, %arg1, %c0_i32, %c0_i32_0 : i32, i32, i32, i32
  }
  func.func @transform_1(%arg0: i32, %arg1: i32) -> (i32, i32, i32, i32) {
    %c4_i32 = arith.constant 4 : i32
    %0 = arith.muli %arg1, %c4_i32 : i32
    %c1_i32 = arith.constant 1 : i32
    %1 = arith.subi %0, %c1_i32 : i32
    %c0_i32 = arith.constant 0 : i32
    %2 = arith.maxsi %1, %c0_i32 : i32
    %c0_i32_0 = arith.constant 0 : i32
    %c0_i32_1 = arith.constant 0 : i32
    %c0_i32_2 = arith.constant 0 : i32
    return %arg0, %2, %c0_i32_0, %c0_i32_1 : i32, i32, i32, i32
  }
  func.func @transform_2(%arg0: i32, %arg1: i32) -> (i32, i32, i32, i32) {
    %c4_i32 = arith.constant 4 : i32
    %0 = arith.muli %arg1, %c4_i32 : i32
    %c4_i32_0 = arith.constant 4 : i32
    %1 = arith.addi %0, %c4_i32_0 : i32
    %c7_i32 = arith.constant 7 : i32
    %2 = arith.minsi %1, %c7_i32 : i32
    %c0_i32 = arith.constant 0 : i32
    %c0_i32_1 = arith.constant 0 : i32
    %c0_i32_2 = arith.constant 0 : i32
    return %arg0, %2, %c0_i32, %c0_i32_1 : i32, i32, i32, i32
  }
  func.func @transform_3(%arg0: i32, %arg1: i32) -> (i32, i32, i32, i32) {
    %c0_i32 = arith.constant 0 : i32
    %c0_i32_0 = arith.constant 0 : i32
    %c0_i32_1 = arith.constant 0 : i32
    %c0_i32_2 = arith.constant 0 : i32
    %c0_i32_3 = arith.constant 0 : i32
    return %c0_i32, %c0_i32_0, %c0_i32_1, %c0_i32_2 : i32, i32, i32, i32
  }
  func.func @transform_4(%arg0: i32, %arg1: i32) -> (i32, i32) {
    %c0_i32 = arith.constant 0 : i32
    %c0_i32_0 = arith.constant 0 : i32
    %c0_i32_1 = arith.constant 0 : i32
    return %c0_i32, %c0_i32_0 : i32, i32
  }
  func.func @transform_5(%arg0: i32, %arg1: i32) -> (i32, i32, i32, i32) {
    %c0_i32 = arith.constant 0 : i32
    %c0_i32_0 = arith.constant 0 : i32
    %c0_i32_1 = arith.constant 0 : i32
    %c0_i32_2 = arith.constant 0 : i32
    %c0_i32_3 = arith.constant 0 : i32
    return %c0_i32, %c0_i32_0, %c0_i32_1, %c0_i32_2 : i32, i32, i32, i32
  }
  func.func @transform_6(%arg0: i32, %arg1: i32) -> (i32, i32) {
    %c0_i32 = arith.constant 0 : i32
    %c0_i32_0 = arith.constant 0 : i32
    %c0_i32_1 = arith.constant 0 : i32
    return %c0_i32, %c0_i32_0 : i32, i32
  }
  func.func @transform_7(%arg0: i32, %arg1: i32) -> (i32, i32, i32, i32) {
    %c0_i32 = arith.constant 0 : i32
    %c0_i32_0 = arith.constant 0 : i32
    %c0_i32_1 = arith.constant 0 : i32
    return %arg0, %arg1, %c0_i32, %c0_i32_0 : i32, i32, i32, i32
  }
}

</mosaic_0001>

<bundles_post_ra>
// kernel: tpu_custom_call.1
= control target key start
LH: loop header
LB: loop body
LE: loop exit
PB: predicated region body
PF: predicated region fallthrough
CT: control target
= control target key end

     0   :  { %s7305_s24 = smov 0   ;;  %s7307_s25 = smov 0   ;;  %s8714_s0 = inlined_call_operand.vmem [shape: f32[2,16,16,4], index: 0, kind: input, shape index: {}]   ;;  %s8715_s1 = inlined_call_operand.vmem [shape: f32[2,16,16,4], index: 1, kind: input, shape index: {}]   ;;  %s8716_s2 = inlined_call_operand.vmem [shape: f32[2,16,16,4], index: 2, kind: input, shape index: {}]   ;;  %s8717_s3 = inlined_call_operand.vmem [shape: bf16[3,3,4,4], index: 3, kind: input, shape index: {}]   ;;  %s8718_s4 = inlined_call_operand.vmem [shape: f32[1,4], index: 4, kind: input, shape index: {}]   ;;  %s8719_s5 = inlined_call_operand.vmem [shape: bf16[3,3,4,4], index: 5, kind: input, shape index: {}]   ;;  %s8720_s6 = inlined_call_operand.vmem [shape: f32[1,4], index: 6, kind: input, shape index: {}]   ;;  %s8721_s7 = inlined_call_operand.vmem [shape: f32[2,16,16,4], index: 7, kind: output, shape index: {}]  }
   0x1   :  { %s7309_s26 = smov 0   ;;  %s7311_s27 = smov 0  }
   0x2   :  { %s7313_s28 = smov 0  }
   0x3 LB: > { %s26_s29 = sadd.s32 1, %s7253_s26  ;;  %s29_s30 = sadd.s32 1, %s7257_s27  ;;  %s7261_s28 = sphi %s7313_s28, %s17_s28   ;;  %s7257_s27 = sphi %s7311_s27, %s8733_s27   ;;  %s7253_s26 = sphi %s7309_s26, %s8732_s26   ;;  %s7249_s25 = sphi %s7307_s25, %s8731_s25   ;;  %s7245_s24 = sphi %s7305_s24, %s8730_s24  }
   0x4   : > { %p27_p0 = scmp.ge.s32.totalorder %s26_s29, 2  ;;  %p6121_p1 = scmp.ge.s32.totalorder %s7261_s28, 1 }
   0x5   : > { %p327_p2 = scmp.lt.s32.totalorder %s7261_s28, 5 }
   0x6   : > { %s8735_s29 = smov (%p27_p0, %s26_s29), 0  ;;  %s8737_s30 = smov (!%p27_p0, %s29_s30), %s7257_s27 }
   0x7   : > { %p328_p3 = pnand %p6121_p1, %p327_p2  ;;  %p31_p4 = scmp.ge.s32.totalorder %s8737_s30, 2 }
   0x8   : > { %v926_v0 = vld [vmem:[%s8717_s3] sm:$0x3] (!%p328_p3)  ;;  %vm1021_vm0 = vcmask (!%p328_p3), 1041408   ;;  %s6122_s10 = sshll.u32 (!%p328_p3), %s7245_s24, 3  ;;  %p398_p5 = scmp.lt.s32.totalorder (!%p328_p3), %s7249_s25, 1  ;;  %vm458_vm1 = vcmask (!%p328_p3), 27651  }
   0x9   : > { %s8739_s30 = smov (%p31_p4, %s8737_s30), 0  ;;  %331 = sbr.rel (%p328_p3) target bundleno = 1118 (0x45e), region = 48 }
   0xa   : > { %7154 = vmatprep.subr.msk.bf16.mxu0 (!%p328_p3), %vm1021_vm0, %v926_v0  ;;  %v1169_v1 = vsel (!%p328_p3), %vm1021_vm0, %v926_v0, 0  ;;  %p400_p6 = scmp.lt.s32.totalorder (!%p328_p3), %s6122_s10, 15  ;;  %s6126_s11 = sshll.u32 (!%p328_p3), %s7245_s24, 2  ;;  %vm459_vm2 = vsmask.f32 (!%p328_p3), 7950  ;;  %vm661_vm4 = vcmask (!%p328_p3), 31748  }
   0xb   : > { %6528 = vmatpush3.bf16.msra.mxu0 (!%p328_p3), %v1169_v1  ;;  %vm7344_vm3 = vmand (!%p328_p3), %vm458_vm1, %vm459_vm2  ;;  %v461_v3 = vld [vmem:[#allocation2] sm:$0x8] (!%p328_p3)  ;;  %v539_v6 = vld [vmem:[#allocation3 + $0x10] sm:$0x8] (!%p328_p3)  ;;  %s6127_s13 = sadd.s32 (!%p328_p3), 4294967295, %s6126_s11  ;;  %vm663_vm5 = vcmask (!%p328_p3), 27648  }
   0xc   : > { %v462_v4 = vsel (!%p328_p3), %vm7344_vm3, 0, %v461_v3  ;;  %v536_v5 = vld [vmem:[#allocation3] sm:$0x8] (!%p328_p3)  ;;  %v540_v8 = vsel (!%p328_p3), %vm7344_vm3, 0, %v539_v6  ;;  %p410_p7 = scmp.gt.s32.totalorder (!%p328_p3), %s6127_s13, 0  ;;  %p679_p8 = scmp.eq.s32.totalorder (!%p328_p3), %s7245_s24, 0 }
   0xd   : > { %463 = vst [vmem:[#allocation2] sm:$0x8] (!%p328_p3), %v462_v4  ;;  %v537_v7 = vsel (!%p328_p3), %vm7344_vm3, 0, %v536_v5  ;;  %v542_v9 = vld [vmem:[#allocation3 + $0x20] sm:$0x8] (!%p328_p3)  ;;  %s7398_s9 = sadd.s32 (!%p328_p3), 4, %s6126_s11 }
   0xe   : > { %538 = vst [vmem:[#allocation3] sm:$0x8] (!%p328_p3), %v537_v7  ;;  %541 = vst [vmem:[#allocation3 + $0x10] sm:$0x8] (!%p328_p3), %v540_v8  ;;  %v543_v10 = vsel (!%p328_p3), %vm7344_vm3, 0, %v542_v9  ;;  %p429_p10 = scmp.lt.s32.totalorder (!%p328_p3), %s7398_s9, 7 }
   0xf   : > { %v545_v11 = vld [vmem:[#allocation3 + $0x30] sm:$0x8] (!%p328_p3)  ;;  %544 = vst [vmem:[#allocation3 + $0x20] sm:$0x8] (!%p328_p3), %v543_v10  ;;  %v548_v13 = vld [vmem:[#allocation3 + $0x40] sm:$0x8] (!%p328_p3) }
  0x10   : > { %s8741_s25 = smov (!%p398_p5, %s7249_s25), 1  ;;  %s8743_s10 = smov (!%p400_p6, %s6122_s10), 15  ;;  %v546_v12 = vsel %vm7344_vm3, 0, %v545_v11  ;;  %v551_v14 = vld [vmem:[#allocation3 + $0x50] sm:$0x8]  ;;  %v549_v15 = vsel %vm7344_vm3, 0, %v548_v13 }
  0x11   : > { %s7350_s12 = sshll.u32 %s8741_s25, 5  ;;  %s6123_s14 = sshll.u32 %s8743_s10, 1  ;;  %547 = vst [vmem:[#allocation3 + $0x30] sm:$0x8] %v546_v12  ;;  %v552_v16 = vsel %vm7344_vm3, 0, %v551_v14  ;;  %vm990_vm8 = vcmask 31744  }
  0x12   : > { %s404_s15 = sadd.s32 %s7350_s12, %s6123_s14  ;;  %v554_v17 = vld [vmem:[#allocation3 + $0x60] sm:$0x8]  ;;  %550 = vst [vmem:[#allocation3 + $0x40] sm:$0x8] %v549_v15  ;;  %553 = vst [vmem:[#allocation3 + $0x50] sm:$0x8] %v552_v16 }
  0x13   : > { %s6125_s16 = sshll.u32 %s404_s15, 3  ;;  %v555_v18 = vsel %vm7344_vm3, 0, %v554_v17  ;;  %v557_v19 = vld [vmem:[#allocation3 + $0x70] sm:$0x8]  ;;  %v560_v20 = vld [vmem:[#allocation3 + $0x80] sm:$0x8] }
  0x14   : > { %s7370_s19 = scalar_lea.vmem %s8714_s0, %s6125_s16  ;;  %s7375_s22 = scalar_lea.vmem %s8721_s7, %s6125_s16  ;;  %556 = vst [vmem:[#allocation3 + $0x60] sm:$0x8] %v555_v18  ;;  %v558_v21 = vsel %vm7344_vm3, 0, %v557_v19  ;;  %v561_v22 = vsel %vm7344_vm3, 0, %v560_v20  ;;  %v563_v23 = vld [vmem:[#allocation3 + $0x90] sm:$0x8] }
  0x15   : > { %s8745_s13 = smov (!%p410_p7, %s6127_s13), 0  ;;  %v596_v24 = vld [vmem:[%s7370_s19] sm:$0xff]  ;;  %559 = vst [vmem:[#allocation3 + $0x70] sm:$0x8] %v558_v21  ;;  %562 = vst [vmem:[#allocation3 + $0x80] sm:$0x8] %v561_v22 }
  0x16   : > { %v564_v25 = vsel %vm7344_vm3, 0, %v563_v23  ;;  %v7393_v26 = vld [vmem:[%s8717_s3 + $0x4] sm:$0x3]  ;;  %v464_v27 = vld [vmem:[#allocation2 + $0x10] sm:$0x8]  ;;  %s6128_s8 = sshll.u32 %s8745_s13, 1 }
  0x17   : > { %565 = vst [vmem:[#allocation3 + $0x90] sm:$0x8] %v564_v25  ;;  %7155 = vmatprep.subr.msk.bf16.mxu0 %vm1021_vm0, %v7393_v26  ;;  %v465_v28 = vsel %vm7344_vm3, 0, %v464_v27  ;;  %v467_v29 = vld [vmem:[#allocation2 + $0x20] sm:$0x8]  ;;  %v597_v30 = vld [vmem:[%s7370_s19 + $0x8] sm:$0xff] }
  0x18   : > { %p415_p9 = scmp.lt.s32.totalorder %s6128_s8, 15  ;;  %466 = vst [vmem:[#allocation2 + $0x10] sm:$0x8] %v465_v28  ;;  %v468_v31 = vsel %vm7344_vm3, 0, %v467_v29  ;;  %v612_v32 = vmax.f32 %v596_v24, 0.0  ;;  %v613_v33 = vmax.f32 %v597_v30, 0.0 }
  0x19   : > { %v470_v34 = vld [vmem:[#allocation2 + $0x30] sm:$0x8]  ;;  %s688_s10 = scalar_select %p679_p8, 1, 0  ;;  %469 = vst [vmem:[#allocation2 + $0x20] sm:$0x8] %v468_v31 }
  0x1a   : > { %v471_v35 = vsel %vm7344_vm3, 0, %v470_v34  ;;  %v598_v36 = vld [vmem:[%s7370_s19 + $0x10] sm:$0xff]  ;;  %v599_v37 = vld [vmem:[%s7370_s19 + $0x18] sm:$0xff]  ;;  %v600_v38 = vld [vmem:[%s7370_s19 + $0x20] sm:$0xff]  ;;  %s8747_s8 = smov (!%p415_p9, %s6128_s8), 15  ;;  %v628_v39 = vpack.c.bf16 %v613_v33, %v612_v32  ;;  %s8749_s9 = smov (!%p429_p10, %s7398_s9), 7 }
  0x1b   : > { %472 = vst [vmem:[#allocation2 + $0x30] sm:$0x8] %v471_v35  ;;  %v614_v40 = vmax.f32 %v598_v36, 0.0  ;;  %v615_v41 = vmax.f32 %v599_v37, 0.0  ;;  %v473_v42 = vld [vmem:[#allocation2 + $0x40] sm:$0x8]  ;;  %v689_v44 = vstv %s688_s10 }
  0x1c   : > { %v601_v43 = vld [vmem:[%s7370_s19 + $0x28] sm:$0xff]  ;;  %v474_v45 = vsel %vm7344_vm3, 0, %v473_v42  ;;  %v616_v46 = vmax.f32 %v600_v38, 0.0  ;;  %v476_v48 = vld [vmem:[#allocation2 + $0x50] sm:$0x8]  ;;  %s6129_s11 = sshll.u32 %s8747_s8, 1 }
  0x1d   : > { %v617_v47 = vmax.f32 %v601_v43, 0.0  ;;  %v602_v49 = vld [vmem:[%s7370_s19 + $0x30] sm:$0xff]  ;;  %vm7418_vm6 = vcmp.eq.s32.totalorder %v689_v44, 1  ;;  %v644_v51 = vrot.slane %v628_v39, 4  ;;  %v629_v52 = vpack.c.bf16 %v615_v41, %v614_v40  ;;  %475 = vst [vmem:[#allocation2 + $0x40] sm:$0x8] %v474_v45  ;;  %s419_s13 = sadd.s32 %s6129_s11, %s7350_s12 }
  0x1e   : > { %v477_v53 = vsel %vm7344_vm3, 0, %v476_v48  ;;  %v603_v54 = vld [vmem:[%s7370_s19 + $0x38] sm:$0xff]  ;;  %v604_v55 = vld [vmem:[%s7370_s19 + $0x40] sm:$0xff]  ;;  %v618_v57 = vmax.f32 %v602_v49, 0.0  ;;  %v605_v60 = vld [vmem:[%s7370_s19 + $0x48] sm:$0xff]  ;;  %s6131_s14 = sshll.u32 %s419_s13, 3 }
  0x1f   : > { %v630_v56 = vpack.c.bf16 %v617_v47, %v616_v46  ;;  %478 = vst [vmem:[#allocation2 + $0x50] sm:$0x8] %v477_v53  ;;  %v619_v58 = vmax.f32 %v603_v54, 0.0  ;;  %v479_v59 = vld [vmem:[#allocation2 + $0x60] sm:$0x8]  ;;  %v620_v61 = vmax.f32 %v604_v55, 0.0  ;;  %s421_s17 = scalar_lea.vmem %s8715_s1, %s6131_s14 }
  0x20   : > { %662 = vst.msk [vmem:[#allocation2 + $0x20] sm:$0xf0] %vm661_vm4, %v644_v51  ;;  %v645_v62 = vrot.slane %v629_v52, 4  ;;  %v480_v63 = vsel %vm7344_vm3, 0, %v479_v59  ;;  %v621_v0 = vmax.f32 %v605_v60, 0.0  ;;  %v606_v6 = vld [vmem:[%s7370_s19 + $0x50] sm:$0xff] }
  0x21   : > { %664 = vst.msk [vmem:[#allocation2 + $0x28] sm:$0xf] %vm663_vm5, %v644_v51  ;;  %v482_v1 = vld [vmem:[#allocation2 + $0x70] sm:$0x8]  ;;  %v646_v3 = vrot.slane %v630_v56, 4  ;;  %v631_v4 = vpack.c.bf16 %v619_v58, %v618_v57  ;;  %v607_v7 = vld [vmem:[%s7370_s19 + $0x58] sm:$0xff] }
  0x22   : > { %481 = vst [vmem:[#allocation2 + $0x60] sm:$0x8] %v480_v63  ;;  %v483_v5 = vsel %vm7344_vm3, 0, %v482_v1  ;;  %v485_v8 = vld [vmem:[#allocation2 + $0x80] sm:$0x8]  ;;  %v681_v10 = vld [vmem:[%s421_s17 + $0x8] sm:$0xff]  ;;  %v632_v12 = vpack.c.bf16 %v621_v0, %v620_v61 }
  0x23   : > { %v680_v9 = vld [vmem:[%s421_s17] sm:$0xff]  ;;  %v682_v11 = vld [vmem:[%s421_s17 + $0x10] sm:$0xff]  ;;  %665 = vst.msk [vmem:[#allocation2 + $0x30] sm:$0xf0] %vm661_vm4, %v645_v62  ;;  %484 = vst [vmem:[#allocation2 + $0x70] sm:$0x8] %v483_v5 }
  0x24   : > { %666 = vst.msk [vmem:[#allocation2 + $0x38] sm:$0xf] %vm663_vm5, %v645_v62  ;;  %v622_v13 = vmax.f32 %v606_v6, 0.0  ;;  %v623_v14 = vmax.f32 %v607_v7, 0.0  ;;  %v486_v15 = vsel %vm7344_vm3, 0, %v485_v8  ;;  %v684_v16 = vmax.f32 %v680_v9, 0.0 }
  0x25   : > { %v685_v17 = vmax.f32 %v681_v10, 0.0  ;;  %v683_v18 = vld [vmem:[%s421_s17 + $0x18] sm:$0xff]  ;;  %v686_v19 = vmax.f32 %v682_v11, 0.0  ;;  %667 = vst.msk [vmem:[#allocation2 + $0x40] sm:$0xf0] %vm661_vm4, %v646_v3  ;;  %v647_v20 = vrot.slane %v631_v4, 4 }
  0x26   : > { %668 = vst.msk [vmem:[#allocation2 + $0x48] sm:$0xf] %vm663_vm5, %v646_v3  ;;  %487 = vst [vmem:[#allocation2 + $0x80] sm:$0x8] %v486_v15  ;;  %v687_v21 = vmax.f32 %v683_v18, 0.0  ;;  %v648_v22 = vrot.slane %v632_v12, 4  ;;  %v633_v23 = vpack.c.bf16 %v623_v14, %v622_v13 }
  0x27   : > { %v488_v24 = vld [vmem:[#allocation2 + $0x90] sm:$0x8]  ;;  %v691_v25 = vsel %vm7418_vm6, 0.0, %v684_v16  ;;  %v692_v27 = vsel %vm7418_vm6, 0.0, %v685_v17  ;;  %v693_v28 = vsel %vm7418_vm6, 0.0, %v686_v19  ;;  %v608_v38 = vld [vmem:[%s7370_s19 + $0x60] sm:$0xff] }
  0x28   : > { %669 = vst.msk [vmem:[#allocation2 + $0x50] sm:$0xf0] %vm661_vm4, %v647_v20  ;;  %v695_v29 = vpack.c.bf16 %v692_v27, %v691_v25  ;;  %v694_v30 = vsel %vm7418_vm6, 0.0, %v687_v21  ;;  %671 = vst.msk [vmem:[#allocation2 + $0x60] sm:$0xf0] %vm661_vm4, %v648_v22  ;;  %v649_v31 = vrot.slane %v633_v23, 4 }
  0x29   : > { %670 = vst.msk [vmem:[#allocation2 + $0x58] sm:$0xf] %vm663_vm5, %v647_v20  ;;  %672 = vst.msk [vmem:[#allocation2 + $0x68] sm:$0xf] %vm663_vm5, %v648_v22  ;;  %v489_v32 = vsel %vm7344_vm3, 0, %v488_v24  ;;  %v696_v33 = vpack.c.bf16 %v694_v30, %v693_v28  ;;  %v609_v44 = vld [vmem:[%s7370_s19 + $0x68] sm:$0xff] }
  0x2a   : > { %v740_v34 = vld [vmem:[#allocation2 + $0x20] sm:$0xf8]  ;;  %490 = vst [vmem:[#allocation2 + $0x90] sm:$0x8] %v489_v32  ;;  %v699_v35 = vrot.slane %v695_v29, 4  ;;  %v7476_v48 = vld [vmem:[%s7370_s19 + $0x70] sm:$0xff] }
  0x2b   : > { %v741_v36 = vld [vmem:[#allocation2 + $0x28] sm:$0xf]  ;;  %v791_v37 = vshrl.u32 %v740_v34, 16  ;;  %673 = vst.msk [vmem:[#allocation2 + $0x70] sm:$0xf0] %vm661_vm4, %v649_v31  ;;  %v700_v39 = vrot.slane %v696_v33, 4 }
  0x2c   : > { %674 = vst.msk [vmem:[#allocation2 + $0x78] sm:$0xf] %vm663_vm5, %v649_v31  ;;  %v794_v40 = vshll.u32 %v740_v34, 16  ;;  %v742_v41 = vld [vmem:[#allocation2 + $0x30] sm:$0xf8]  ;;  %v799_v45 = vshrl.u32 %v741_v36, 16 }
  0x2d   : > { %v743_v42 = vld [vmem:[#allocation2 + $0x38] sm:$0xf]  ;;  %703 = vst.msk [vmem:[#allocation2] sm:$0xf0] %vm661_vm4, %v699_v35  ;;  %v7470_v43 = vld [vmem:[#allocation2 + $0x40] sm:$0xf8] }
  0x2e   : > { %704 = vst.msk [vmem:[#allocation2 + $0x8] sm:$0xf] %vm663_vm5, %v699_v35  ;;  %706 = vst.msk [vmem:[#allocation2 + $0x18] sm:$0xf] %vm663_vm5, %v700_v39  ;;  %v802_v46 = vshll.u32 %v741_v36, 16  ;;  %v808_v47 = vshrl.u32 %v742_v41, 16 }
  0x2f   : > { %705 = vst.msk [vmem:[#allocation2 + $0x10] sm:$0xf0] %vm661_vm4, %v700_v39  ;;  %v811_v49 = vshll.u32 %v742_v41, 16  ;;  %v816_v50 = vshrl.u32 %v743_v42, 16  ;;  %v819_v51 = vshll.u32 %v743_v42, 16  ;;  %v624_v52 = vmax.f32 %v608_v38, 0.0 }
  0x30   : > { %v7479_v53 = vld [vmem:[%s7370_s19 + $0x78] sm:$0xff]  ;;  %s6133_s18 = sshll.u32 %s8749_s9, 1  ;;  %vm498_vm7 = vsmask.f32 4352  ;;  %v7482_v54 = vrot.slane %v791_v37, 3  ;;  %v7484_v55 = vrot.slane %v794_v40, 4 }
  0x31   : > { %v825_v56 = vshrl.u32 %v7470_v43, 16  ;;  %v625_v57 = vmax.f32 %v609_v44, 0.0  ;;  %p434_p11 = scmp.lt.s32.totalorder %s6133_s18, 15  ;;  %v7489_v58 = vsel %vm1021_vm0, %v7393_v26, 0  ;;  %v745_v59 = vld [vmem:[#allocation2 + $0x48] sm:$0xf] }
  0x32   : > { %v626_v60 = vmax.f32 %v7476_v48, 0.0  ;;  %v801_v61 = vrot.slane %v799_v45, 3  ;;  %v804_v62 = vrot.slane %v802_v46, 4  ;;  %v7492_v63 = vrot.slane %v808_v47, 3  ;;  %v7508_v10 = vld [vmem:[#allocation2 + $0x50] sm:$0xf8] }
  0x33   : > { %v627_v0 = vmax.f32 %v7479_v53, 0.0  ;;  %s8751_s18 = smov (!%p434_p11, %s6133_s18), 15  ;;  %v7497_v1 = vrot.slane %v811_v49, 4  ;;  %v7499_v3 = vrot.slane %v816_v50, 3  ;;  %v7501_v4 = vrot.slane %v819_v51, 4  ;;  %p707_p12 = scmp.eq.s32.totalorder %s7245_s24, 1 }
  0x34   : > { %v828_v26 = vshll.u32 %v7470_v43, 16  ;;  %vm497_vm9 = vcmask 28676   ;;  %v736_v5 = vld [vmem:[#allocation2] sm:$0xf8]  ;;  %v797_v7 = vor.u32 %v7484_v55, %v7482_v54  ;;  %v7506_v8 = vrot.slane %v825_v56, 3  ;;  %s6134_s20 = sshll.u32 %s8751_s18, 1 }
  0x35   : > { %v737_v6 = vld [vmem:[#allocation2 + $0x8] sm:$0xf]  ;;  %v833_v9 = vshrl.u32 %v745_v59, 16  ;;  %v7510_v11 = vpack.c.bf16 %v625_v57, %v624_v52  ;;  %v757_v12 = vshrl.u32 %v736_v5, 16  ;;  %v760_v13 = vshll.u32 %v736_v5, 16  ;;  %s7514_s21 = sadd.s32 %s6134_s20, %s7350_s12  ;;  %vm7536_vm10 = vmand %vm497_vm9, %vm498_vm7  ;;  %p6240_p13 = scmp.ne.s32.totalorder %s7245_s24, 0 }
  0x36   : > { %v765_v14 = vshrl.u32 %v737_v6, 16  ;;  %v768_v15 = vshll.u32 %v737_v6, 16  ;;  %v738_v16 = vld [vmem:[#allocation2 + $0x10] sm:$0xf8]  ;;  %v739_v17 = vld [vmem:[#allocation2 + $0x18] sm:$0xf]  ;;  %v805_v20 = vor.u32 %v804_v62, %v801_v61  ;;  %v814_v38 = vor.u32 %v7497_v1, %v7492_v63 }
  0x37   : > { %v774_v18 = vshrl.u32 %v738_v16, 16  ;;  %v777_v19 = vshll.u32 %v738_v16, 16  ;;  %v836_v21 = vshll.u32 %v745_v59, 16  ;;  %v759_v22 = vrot.slane %v757_v12, 3  ;;  %v747_v39 = vld [vmem:[#allocation2 + $0x58] sm:$0xf] }
  0x38   : > { %v762_v23 = vrot.slane %v760_v13, 4  ;;  %v767_v24 = vrot.slane %v765_v14, 3  ;;  %v770_v25 = vrot.slane %v768_v15, 4  ;;  %v782_v29 = vshrl.u32 %v739_v17, 16  ;;  %v748_v40 = vld [vmem:[#allocation2 + $0x60] sm:$0xf8] }
  0x39   : > { %v776_v27 = vrot.slane %v774_v18, 3  ;;  %v779_v28 = vrot.slane %v777_v19, 4  ;;  %v785_v30 = vshll.u32 %v739_v17, 16  ;;  %v7516_v33 = vrot.slane %v828_v26, 4  ;;  %v749_v45 = vld [vmem:[#allocation2 + $0x68] sm:$0xf] }
  0x3a   : > { %v763_v31 = vor.u32 %v762_v23, %v759_v22  ;;  %v771_v32 = vor.u32 %v770_v25, %v767_v24  ;;  %v842_v34 = vshrl.u32 %v7508_v10, 16  ;;  %v784_v36 = vrot.slane %v782_v29, 3  ;;  %v500_v50 = vld [vmem:[#allocation2 + $0x8] sm:$0x10]  ;;  %v569_v56 = vld [vmem:[#allocation3 + $0x18] sm:$0x10] }
  0x3b   : > { %v780_v35 = vor.u32 %v779_v28, %v776_v27  ;;  %v787_v37 = vrot.slane %v785_v30, 4  ;;  %v822_v42 = vor.u32 %v7501_v4, %v7499_v3  ;;  %v7524_v43 = vrot.slane %v833_v9, 3  ;;  %v566_v55 = vld [vmem:[#allocation3 + $0x8] sm:$0x10]  ;;  %v581_v26 = vld [vmem:[#allocation3 + $0x58] sm:$0x10] }
  0x3c   : > { %v772_v41 = vsel %vm498_vm7, %v763_v31, %v771_v32  ;;  %v7526_v44 = vrot.slane %v836_v21, 4  ;;  %v806_v47 = vsel %vm498_vm7, %v797_v7, %v805_v20  ;;  %v845_v48 = vshll.u32 %v7508_v10, 16  ;;  %v572_v63 = vld [vmem:[#allocation3 + $0x28] sm:$0x10]  ;;  %v7549_v6 = vld [vmem:[%s8717_s3 + $0x6] sm:$0x3] }
  0x3d   : > { %6529 = vmatprep.mubr.msk.bf16.mxu0 %vm990_vm8, %v772_v41  ;;  %v788_v46 = vor.u32 %v787_v37, %v784_v36  ;;  %v635_v49 = vpack.c.bf16 %v627_v0, %v626_v60  ;;  %v7531_v51 = vrot.slane %v842_v34, 3  ;;  %v850_v52 = vshrl.u32 %v747_v39, 16  ;;  %v575_v60 = vld [vmem:[#allocation3 + $0x38] sm:$0x10]  ;;  %v578_v0 = vld [vmem:[#allocation3 + $0x48] sm:$0x10] }
  0x3e   : > { %v853_v53 = vshll.u32 %v747_v39, 16  ;;  %v859_v54 = vshrl.u32 %v748_v40, 16  ;;  %v862_v59 = vshll.u32 %v748_v40, 16  ;;  %v867_v61 = vshrl.u32 %v749_v45, 16  ;;  %v584_v5 = vld [vmem:[#allocation3 + $0x68] sm:$0x10] }
  0x3f   : > { %v789_v57 = vsel %vm498_vm7, %v780_v35, %v788_v46  ;;  %v823_v1 = vsel %vm498_vm7, %v814_v38, %v822_v42  ;;  %v831_v3 = vor.u32 %v7516_v33, %v7506_v8  ;;  %v839_v4 = vor.u32 %v7526_v44, %v7524_v43  ;;  %v587_v12 = vld [vmem:[#allocation3 + $0x78] sm:$0x10]  ;;  %v590_v17 = vld [vmem:[#allocation3 + $0x88] sm:$0x10]  ;;  %v750_v19 = vld [vmem:[#allocation2 + $0x70] sm:$0xf8] }
  0x40   : > { %6530 = vmatmul.mubr.msk.bf16.vlgmr.msra.gmra.mrb[0].mxu0 %vm990_vm8, %v789_v57  ;;  %v7553_v7 = vrot.slane %v845_v48, 4  ;;  %v870_v9 = vshll.u32 %v749_v45, 16  ;;  %v650_v10 = vrot.slane %v7510_v11, 4  ;;  %v651_v8 = vrot.slane %v635_v49, 4  ;;  %v593_v21 = vld [vmem:[#allocation3 + $0x98] sm:$0x10] }
  0x41   : > { %6550 = vmatpush3.bf16.msra.mxu0 %v7489_v58  ;;  %6533 = vmatprep.mubr.msk.bf16.mxu0 %vm990_vm8, %v806_v47  ;;  %v7556_v13 = vrot.slane %v850_v52, 3  ;;  %v7558_v14 = vrot.slane %v853_v53, 4  ;;  %v7560_v15 = vrot.slane %v859_v54, 3  ;;  %v501_v16 = vsel %vm7536_vm10, 0, %v500_v50  ;;  %v503_v27 = vld [vmem:[#allocation2 + $0x18] sm:$0x10] }
  0x42   : > { %7156 = vmatprep.subr.msk.bf16.mxu0 %vm1021_vm0, %v7549_v6  ;;  %v864_v58 = vrot.slane %v862_v59, 4  ;;  %v869_v18 = vrot.slane %v867_v61, 3  ;;  %675 = vst.msk [vmem:[#allocation2 + $0x80] sm:$0xf0] %vm661_vm4, %v650_v10  ;;  %677 = vst.msk [vmem:[#allocation2 + $0x90] sm:$0xf0] %vm661_vm4, %v651_v8  ;;  %v840_v33 = vsel %vm498_vm7, %v831_v3, %v839_v4  ;;  %v848_v36 = vor.u32 %v7553_v7, %v7531_v51 }
  0x43   : > { %676 = vst.msk [vmem:[#allocation2 + $0x88] sm:$0xf] %vm663_vm5, %v650_v10  ;;  %678 = vst.msk [vmem:[#allocation2 + $0x98] sm:$0xf] %vm663_vm5, %v651_v8  ;;  %v567_v11 = vsel %vm7536_vm10, 0, %v566_v55  ;;  %v570_v20 = vsel %vm7536_vm10, 0, %v569_v56  ;;  %v856_v38 = vor.u32 %v7558_v14, %v7556_v13 }
  0x44   : > { %502 = vst [vmem:[#allocation2 + $0x8] sm:$0x10] %v501_v16  ;;  %568 = vst [vmem:[#allocation3 + $0x8] sm:$0x10] %v567_v11  ;;  %v573_v22 = vsel %vm7536_vm10, 0, %v572_v63  ;;  %v576_v23 = vsel %vm7536_vm10, 0, %v575_v60  ;;  %v865_v42 = vor.u32 %v864_v58, %v7560_v15 }
  0x45   : > { %571 = vst [vmem:[#allocation3 + $0x18] sm:$0x10] %v570_v20  ;;  %v579_v24 = vsel %vm7536_vm10, 0, %v578_v0  ;;  %v582_v25 = vsel %vm7536_vm10, 0, %v581_v26  ;;  %v872_v28 = vrot.slane %v870_v9, 4  ;;  %v585_v29 = vsel %vm7536_vm10, 0, %v584_v5 }
  0x46   : > { %574 = vst [vmem:[#allocation3 + $0x28] sm:$0x10] %v573_v22  ;;  %577 = vst [vmem:[#allocation3 + $0x38] sm:$0x10] %v576_v23  ;;  %v588_v30 = vsel %vm7536_vm10, 0, %v587_v12  ;;  %v591_v31 = vsel %vm7536_vm10, 0, %v590_v17  ;;  %v857_v55 = vsel %vm498_vm7, %v848_v36, %v856_v38 }
  0x47   : > { %580 = vst [vmem:[#allocation3 + $0x48] sm:$0x10] %v579_v24  ;;  %583 = vst [vmem:[#allocation3 + $0x58] sm:$0x10] %v582_v25  ;;  %v506_v32 = vld [vmem:[#allocation2 + $0x28] sm:$0x10]  ;;  %v873_v43 = vor.u32 %v872_v28, %v869_v18 }
  0x48   : > { %v751_v34 = vld [vmem:[#allocation2 + $0x78] sm:$0xf]  ;;  %586 = vst [vmem:[#allocation3 + $0x68] sm:$0x10] %v585_v29  ;;  %589 = vst [vmem:[#allocation3 + $0x78] sm:$0x10] %v588_v30  ;;  %6534 = vmatmul.mubr.msk.bf16.gmra.mrb[4].mxu0 %vm990_vm8, %v823_v1 }
  0x49   : > { %592 = vst [vmem:[#allocation3 + $0x88] sm:$0x10] %v591_v31  ;;  %v594_v35 = vsel %vm7536_vm10, 0, %v593_v21  ;;  %v504_v37 = vsel %vm7536_vm10, 0, %v503_v27  ;;  %v876_v39 = vshrl.u32 %v750_v19, 16  ;;  %v879_v40 = vshll.u32 %v750_v19, 16  ;;  %6537 = vmatprep.mubr.msk.bf16.mxu0 %vm990_vm8, %v840_v33 }
  0x4a   : > { %595 = vst [vmem:[#allocation3 + $0x98] sm:$0x10] %v594_v35  ;;  %505 = vst [vmem:[#allocation2 + $0x18] sm:$0x10] %v504_v37  ;;  %v507_v41 = vsel %vm7536_vm10, 0, %v506_v32  ;;  %v884_v44 = vshrl.u32 %v751_v34, 16  ;;  %v874_v56 = vsel %vm498_vm7, %v865_v42, %v873_v43 }
  0x4b   : > { %v887_v45 = vshll.u32 %v751_v34, 16  ;;  %508 = vst [vmem:[#allocation2 + $0x28] sm:$0x10] %v507_v41  ;;  %v752_v46 = vld [vmem:[#allocation2 + $0x80] sm:$0xf8]  ;;  %v878_v52 = vrot.slane %v876_v39, 3 }
  0x4c   : > { %v753_v47 = vld [vmem:[#allocation2 + $0x88] sm:$0xf]  ;;  %v893_v48 = vshrl.u32 %v752_v46, 16  ;;  %v896_v49 = vshll.u32 %v752_v46, 16  ;;  %v881_v53 = vrot.slane %v879_v40, 4  ;;  %v886_v57 = vrot.slane %v884_v44, 3 }
  0x4d   : > { %v901_v50 = vshrl.u32 %v753_v47, 16  ;;  %v904_v51 = vshll.u32 %v753_v47, 16  ;;  %v7602_v54 = vld [vmem:[#allocation2] sm:$0xf0]  ;;  %v889_v59 = vrot.slane %v887_v45, 4  ;;  %s6136_s9 = sshll.u32 %s7514_s21, 3 }
  0x4e   : > { %v754_v61 = vld [vmem:[#allocation2 + $0x90] sm:$0xf8]  ;;  %v895_v63 = vrot.slane %v893_v48, 3  ;;  %v898_v60 = vrot.slane %v896_v49, 4  ;;  %v755_v3 = vld [vmem:[#allocation2 + $0x98] sm:$0xf]  ;;  %v882_v10 = vor.u32 %v881_v53, %v878_v52  ;;  %s7701_s13 = scalar_lea.vmem %s8716_s2, %s6136_s9 }
  0x4f   : > { %v903_v0 = vrot.slane %v901_v50, 3  ;;  %v906_v1 = vrot.slane %v904_v51, 4  ;;  %v1284_v4 = vld [vmem:[#allocation2 + $0x8] sm:$0x1f]  ;;  %v1296_v26 = vshrl.u32 %v7602_v54, 16  ;;  %v910_v5 = vshrl.u32 %v754_v61, 16 }
  0x50   : > { %6538 = vmatmul.mubr.msk.bf16.gmra.mrb[8].mxu0 %vm990_vm8, %v857_v55  ;;  %v913_v7 = vshll.u32 %v754_v61, 16  ;;  %v1299_v9 = vshll.u32 %v7602_v54, 16  ;;  %v890_v8 = vor.u32 %v889_v59, %v886_v57  ;;  %v918_v12 = vshrl.u32 %v755_v3, 16  ;;  %v509_v14 = vld [vmem:[#allocation2 + $0x38] sm:$0x10] }
  0x51   : > { %6541 = vmatprep.mubr.msk.bf16.mxu0 %vm990_vm8, %v874_v56  ;;  %v921_v13 = vshll.u32 %v755_v3, 16  ;;  %v899_v15 = vor.u32 %v898_v60, %v895_v63  ;;  %v907_v16 = vor.u32 %v906_v1, %v903_v0  ;;  %v1304_v17 = vshrl.u32 %v1284_v4, 16  ;;  %v7610_v18 = vld [vmem:[#allocation2 + $0x10] sm:$0xf0]  ;;  %v7612_v11 = vld [vmem:[#allocation2 + $0x20] sm:$0xf0] }
  0x52   : > { %v1307_v58 = vshll.u32 %v1284_v4, 16  ;;  %v1298_v19 = vrot.slane %v1296_v26, 4  ;;  %v512_v20 = vld [vmem:[#allocation2 + $0x48] sm:$0x10]  ;;  %v912_v21 = vrot.slane %v910_v5, 3  ;;  %v915_v22 = vrot.slane %v913_v7, 4 }
  0x53   : > { %v1301_v23 = vrot.slane %v1299_v9, 5  ;;  %v510_v24 = vsel %vm7536_vm10, 0, %v509_v14  ;;  %v515_v25 = vld [vmem:[#allocation2 + $0x58] sm:$0x10]  ;;  %v891_v27 = vsel %vm498_vm7, %v882_v10, %v890_v8  ;;  %v920_v28 = vrot.slane %v918_v12, 3 }
  0x54   : > { %v923_v29 = vrot.slane %v921_v13, 4  ;;  %v1313_v30 = vshrl.u32 %v7610_v18, 16  ;;  %511 = vst [vmem:[#allocation2 + $0x38] sm:$0x10] %v510_v24  ;;  %v518_v31 = vld [vmem:[#allocation2 + $0x68] sm:$0x10]  ;;  %v908_v32 = vsel %vm498_vm7, %v899_v15, %v907_v16  ;;  %v916_v41 = vor.u32 %v915_v22, %v912_v21 }
  0x55   : > { %v1306_v33 = vrot.slane %v1304_v17, 4  ;;  %v1309_v34 = vrot.slane %v1307_v58, 5  ;;  %v1285_v35 = vld [vmem:[#allocation2 + $0x18] sm:$0x1f]  ;;  %v513_v36 = vsel %vm7536_vm10, 0, %v512_v20  ;;  %v1316_v37 = vshll.u32 %v7610_v18, 16 }
  0x56   : > { %v1286_v38 = vld [vmem:[#allocation2 + $0x28] sm:$0x1f]  ;;  %514 = vst [vmem:[#allocation2 + $0x48] sm:$0x10] %v513_v36  ;;  %v516_v39 = vsel %vm7536_vm10, 0, %v515_v25  ;;  %v1302_v42 = vor.u32 %v1301_v23, %v1298_v19  ;;  %v1330_v43 = vshrl.u32 %v7612_v11, 16  ;;  %v924_v45 = vor.u32 %v923_v29, %v920_v28 }
  0x57   : > { %v521_v40 = vld [vmem:[#allocation2 + $0x78] sm:$0x10]  ;;  %v1333_v44 = vshll.u32 %v7612_v11, 16  ;;  %517 = vst [vmem:[#allocation2 + $0x58] sm:$0x10] %v516_v39  ;;  %v1321_v46 = vshrl.u32 %v1285_v35, 16  ;;  %v1310_v50 = vor.u32 %v1309_v34, %v1306_v33 }
  0x58   : > { %6542 = vmatmul.mubr.msk.bf16.gmra.mrb[12].mxu0 %vm990_vm8, %v891_v27  ;;  %v1324_v47 = vshll.u32 %v1285_v35, 16  ;;  %v519_v48 = vsel %vm7536_vm10, 0, %v518_v31  ;;  %v524_v49 = vld [vmem:[#allocation2 + $0x88] sm:$0x10]  ;;  %v1338_v51 = vshrl.u32 %v1286_v38, 16  ;;  %v1341_v52 = vshll.u32 %v1286_v38, 16 }
  0x59   : > { %6545 = vmatprep.mubr.msk.bf16.mxu0 %vm990_vm8, %v908_v32  ;;  %520 = vst [vmem:[#allocation2 + $0x68] sm:$0x10] %v519_v48  ;;  %v522_v53 = vsel %vm7536_vm10, 0, %v521_v40  ;;  %vm1294_vm11 = vsmask.f32 3328  ;;  %v1315_v55 = vrot.slane %v1313_v30, 4  ;;  %v925_v60 = vsel %vm498_vm7, %v916_v41, %v924_v45 }
  0x5a   : > { %523 = vst [vmem:[#allocation2 + $0x78] sm:$0x10] %v522_v53  ;;  %v527_v56 = vld [vmem:[#allocation2 + $0x98] sm:$0x10]  ;;  %v1318_v57 = vrot.slane %v1316_v37, 5  ;;  %v1332_v59 = vrot.slane %v1330_v43, 4  ;;  %v1311_v26 = vsel %vm1294_vm11, %v1302_v42, %v1310_v50 }
  0x5b   : > { %v1335_v61 = vrot.slane %v1333_v44, 5  ;;  %v525_v63 = vsel %vm7536_vm10, 0, %v524_v49  ;;  %v1323_v0 = vrot.slane %v1321_v46, 4  ;;  %v1326_v1 = vrot.slane %v1324_v47, 5  ;;  %v7635_v3 = vld [vmem:[#allocation2 + $0x30] sm:$0xf0] }
  0x5c   : > { %v7637_v4 = vld [vmem:[#allocation2 + $0x40] sm:$0xf0]  ;;  %526 = vst [vmem:[#allocation2 + $0x88] sm:$0x10] %v525_v63  ;;  %v1340_v5 = vrot.slane %v1338_v51, 4  ;;  %v1343_v7 = vrot.slane %v1341_v52, 5  ;;  %v1319_v12 = vor.u32 %v1318_v57, %v1315_v55 }
  0x5d   : > { %v1287_v9 = vld [vmem:[#allocation2 + $0x38] sm:$0x1f]  ;;  %v528_v10 = vsel %vm7536_vm10, 0, %v527_v56  ;;  %v1288_v8 = vld [vmem:[#allocation2 + $0x48] sm:$0x1f]  ;;  %v1336_v13 = vor.u32 %v1335_v61, %v1332_v59  ;;  %v1347_v14 = vshrl.u32 %v7635_v3, 16  ;;  %v1327_v16 = vor.u32 %v1326_v1, %v1323_v0 }
  0x5e   : > { %529 = vst [vmem:[#allocation2 + $0x98] sm:$0x10] %v528_v10  ;;  %v1350_v15 = vshll.u32 %v7635_v3, 16  ;;  %v1355_v17 = vshrl.u32 %v1287_v9, 16  ;;  %v1358_v58 = vshll.u32 %v1287_v9, 16  ;;  %v1364_v19 = vshrl.u32 %v7637_v4, 16 }
  0x5f   : > { %v1344_v20 = vor.u32 %v1343_v7, %v1340_v5  ;;  %v1367_v21 = vshll.u32 %v7637_v4, 16  ;;  %v1372_v22 = vshrl.u32 %v1288_v8, 16  ;;  %v1375_v23 = vshll.u32 %v1288_v8, 16  ;;  %v7650_v28 = vld [vmem:[#allocation2 + $0x50] sm:$0xf0] }
  0x60   : > { %6546 = vmatmul.mubr.msk.bf16.gmra.mrb[16].mxu0 %vm990_vm8, %v925_v60  ;;  %v1857_v24 = vsel %vm1021_vm0, %v7549_v6, 0  ;;  %v1349_v25 = vrot.slane %v1347_v14, 4  ;;  %v1352_v27 = vrot.slane %v1350_v15, 5  ;;  %v1328_v29 = vsel %vm1294_vm11, %v1319_v12, %v1327_v16  ;;  %v7653_v33 = vld [vmem:[#allocation2 + $0x60] sm:$0xf0] }
  0x61   : > { %6551 = vmatprep.mubr.msk.bf16.mxu0 %vm990_vm8, %v1311_v26  ;;  %v1357_v30 = vrot.slane %v1355_v17, 4  ;;  %v1360_v31 = vrot.slane %v1358_v58, 5  ;;  %v1366_v32 = vrot.slane %v1364_v19, 4  ;;  %v1345_v34 = vsel %vm1294_vm11, %v1336_v13, %v1344_v20  ;;  %v1289_v38 = vld [vmem:[#allocation2 + $0x58] sm:$0x1f] }
  0x62   : > { %v1369_v35 = vrot.slane %v1367_v21, 5  ;;  %v1374_v36 = vrot.slane %v1372_v22, 4  ;;  %v1377_v37 = vrot.slane %v1375_v23, 5  ;;  %v1290_v39 = vld [vmem:[#allocation2 + $0x68] sm:$0x1f]  ;;  %v1353_v40 = vor.u32 %v1352_v27, %v1349_v25 }
  0x63   : > { %v7659_v6 = vld [vmem:[%s8717_s3 + $0x8] sm:$0x3]  ;;  %v1381_v41 = vshrl.u32 %v7650_v28, 16  ;;  %v1384_v42 = vshll.u32 %v7650_v28, 16  ;;  %v1398_v43 = vshrl.u32 %v7653_v33, 16  ;;  %v1361_v44 = vor.u32 %v1360_v31, %v1357_v30 }
  0x64   : > { %v1389_v45 = vshrl.u32 %v1289_v38, 16  ;;  %v1392_v46 = vshll.u32 %v1289_v38, 16  ;;  %v1401_v47 = vshll.u32 %v7653_v33, 16  ;;  %v1370_v48 = vor.u32 %v1369_v35, %v1366_v32  ;;  %v7669_v56 = vld [vmem:[#allocation2 + $0x70] sm:$0xf0] }
  0x65   : > { %v1378_v49 = vor.u32 %v1377_v37, %v1374_v36  ;;  %v1406_v50 = vshrl.u32 %v1290_v39, 16  ;;  %v1409_v51 = vshll.u32 %v1290_v39, 16  ;;  %v1383_v52 = vrot.slane %v1381_v41, 4  ;;  %v1291_v60 = vld [vmem:[#allocation2 + $0x78] sm:$0x1f] }
  0x66   : > { %v1386_v53 = vrot.slane %v1384_v42, 5  ;;  %v1400_v55 = vrot.slane %v1398_v43, 4  ;;  %v1362_v57 = vsel %vm1294_vm11, %v1353_v40, %v1361_v44  ;;  %v1391_v59 = vrot.slane %v1389_v45, 4  ;;  %v7673_v5 = vld [vmem:[#allocation2 + $0x80] sm:$0xf0] }
  0x67   : > { %v1394_v61 = vrot.slane %v1392_v46, 5  ;;  %v1403_v63 = vrot.slane %v1401_v47, 5  ;;  %v1379_v0 = vsel %vm1294_vm11, %v1370_v48, %v1378_v49  ;;  %v1408_v1 = vrot.slane %v1406_v50, 4  ;;  %v1292_v7 = vld [vmem:[#allocation2 + $0x88] sm:$0x1f] }
  0x68   : > { %6552 = vmatmul.mubr.msk.bf16.vlgmr.msra.gmra.mrb[0].mxu0 %vm990_vm8, %v1328_v29  ;;  %v1411_v26 = vrot.slane %v1409_v51, 5  ;;  %v1415_v9 = vshrl.u32 %v7669_v56, 16  ;;  %v1418_v10 = vshll.u32 %v7669_v56, 16  ;;  %v1423_v8 = vshrl.u32 %v1291_v60, 16  ;;  %v7681_v21 = vld [vmem:[#allocation2 + $0x90] sm:$0xf0] }
  0x69   : > { %6572 = vmatpush3.bf16.msra.mxu0 %v1857_v24  ;;  %6555 = vmatprep.mubr.msk.bf16.mxu0 %vm990_vm8, %v1345_v34  ;;  %v1426_v12 = vshll.u32 %v1291_v60, 16  ;;  %v1387_v13 = vor.u32 %v1386_v53, %v1383_v52  ;;  %v1395_v14 = vor.u32 %v1394_v61, %v1391_v59  ;;  %v1404_v15 = vor.u32 %v1403_v63, %v1400_v55  ;;  %v1293_v27 = vld [vmem:[#allocation2 + $0x98] sm:$0x1f]  ;;  %v1634_v31 = vld [vmem:[#allocation2 + $0x10] sm:$0xf8] }
  0x6a   : > { %7157 = vmatprep.subr.msk.bf16.mxu0 %vm1021_vm0, %v7659_v6  ;;  %v1432_v16 = vshrl.u32 %v7673_v5, 16  ;;  %v1412_v17 = vor.u32 %v1411_v26, %v1408_v1  ;;  %v1435_v58 = vshll.u32 %v7673_v5, 16  ;;  %v1440_v19 = vshrl.u32 %v1292_v7, 16  ;;  %v7685_v37 = vld [vmem:[#allocation2 + $0x18] sm:$0xf] }
  0x6b   : > { %v1443_v20 = vshll.u32 %v1292_v7, 16  ;;  %v1417_v22 = vrot.slane %v1415_v9, 4  ;;  %v1420_v23 = vrot.slane %v1418_v10, 5  ;;  %v1425_v24 = vrot.slane %v1423_v8, 4  ;;  %v1636_v50 = vld [vmem:[#allocation2 + $0x20] sm:$0xf8] }
  0x6c   : > { %v1428_v25 = vrot.slane %v1426_v12, 5  ;;  %v1396_v29 = vsel %vm1294_vm11, %v1387_v13, %v1395_v14  ;;  %v1434_v30 = vrot.slane %v1432_v16, 4  ;;  %v1413_v32 = vsel %vm1294_vm11, %v1404_v15, %v1412_v17  ;;  %v1638_v7 = vld [vmem:[#allocation2 + $0x30] sm:$0xf8]  ;;  %v7704_v8 = vld [vmem:[#allocation2 + $0x38] sm:$0xf] }
  0x6d   : > { %v1437_v34 = vrot.slane %v1435_v58, 5  ;;  %v1442_v35 = vrot.slane %v1440_v19, 4  ;;  %v1445_v36 = vrot.slane %v1443_v20, 5  ;;  %v1449_v38 = vshrl.u32 %v7681_v21, 16  ;;  %v491_v12 = vld [vmem:[#allocation2 + $0xa0] sm:$0x8] }
  0x6e   : > { %v1452_v39 = vshll.u32 %v7681_v21, 16  ;;  %v1457_v40 = vshrl.u32 %v1293_v27, 16  ;;  %v1460_v41 = vshll.u32 %v1293_v27, 16  ;;  %v1421_v42 = vor.u32 %v1420_v23, %v1417_v22  ;;  %s716_s14 = scalar_select %p707_p12, 1, 0  ;;  %v708_v16 = vld [vmem:[%s7701_s13] sm:$0xff] }
  0x6f   : > { %v1429_v43 = vor.u32 %v1428_v25, %v1425_v24  ;;  %v1655_v44 = vshrl.u32 %v1634_v31, 16  ;;  %v1658_v45 = vshll.u32 %v1634_v31, 16  ;;  %v1663_v46 = vshrl.u32 %v7685_v37, 16  ;;  %v709_v17 = vld [vmem:[%s7701_s13 + $0x8] sm:$0xff] }
  0x70   : > { %6556 = vmatmul.mubr.msk.bf16.gmra.mrb[4].mxu0 %vm990_vm8, %v1362_v57  ;;  %v1666_v47 = vshll.u32 %v7685_v37, 16  ;;  %v1438_v48 = vor.u32 %v1437_v34, %v1434_v30  ;;  %v1446_v49 = vor.u32 %v1445_v36, %v1442_v35  ;;  %v1451_v51 = vrot.slane %v1449_v38, 4  ;;  %v1640_v38 = vld [vmem:[#allocation2 + $0x40] sm:$0xf8] }
  0x71   : > { %6559 = vmatprep.mubr.msk.bf16.mxu0 %vm990_vm8, %v1379_v0  ;;  %v1454_v52 = vrot.slane %v1452_v39, 5  ;;  %v1459_v53 = vrot.slane %v1457_v40, 4  ;;  %v1462_v55 = vrot.slane %v1460_v41, 5  ;;  %v1430_v57 = vsel %vm1294_vm11, %v1421_v42, %v1429_v43  ;;  %v7696_v0 = vld [vmem:[#allocation2 + $0x28] sm:$0xf] }
  0x72   : > { %v1657_v59 = vrot.slane %v1655_v44, 3  ;;  %v1660_v61 = vrot.slane %v1658_v45, 4  ;;  %v1665_v63 = vrot.slane %v1663_v46, 3  ;;  %v1668_v60 = vrot.slane %v1666_v47, 4  ;;  %v7724_v42 = vld [vmem:[#allocation2 + $0x48] sm:$0xf] }
  0x73   : > { %v1672_v1 = vshrl.u32 %v1636_v50, 16  ;;  %v1447_v26 = vsel %vm1294_vm11, %v1438_v48, %v1446_v49  ;;  %v1455_v9 = vor.u32 %v1454_v52, %v1451_v51  ;;  %v1463_v10 = vor.u32 %v1462_v55, %v1459_v53  ;;  %v1642_v48 = vld [vmem:[#allocation2 + $0x50] sm:$0xf8]  ;;  %v7730_v51 = vld [vmem:[#allocation2 + $0x58] sm:$0xf] }
  0x74   : > { %v1675_v13 = vshll.u32 %v1636_v50, 16  ;;  %v1680_v14 = vshrl.u32 %v7696_v0, 16  ;;  %v1683_v15 = vshll.u32 %v7696_v0, 16  ;;  %v1661_v58 = vor.u32 %v1660_v61, %v1657_v59 }
  0x75   : > { %v1669_v19 = vor.u32 %v1668_v60, %v1665_v63  ;;  %v1674_v20 = vrot.slane %v1672_v1, 3  ;;  %v1689_v22 = vshrl.u32 %v1638_v7, 16  ;;  %v1692_v23 = vshll.u32 %v1638_v7, 16 }
  0x76   : > { %v1697_v24 = vshrl.u32 %v7704_v8, 16  ;;  %v1700_v25 = vshll.u32 %v7704_v8, 16  ;;  %v492_v27 = vsel %vm7344_vm3, 0, %v491_v12  ;;  %v712_v30 = vmax.f32 %v708_v16, 0.0 }
  0x77   : > { %493 = vst [vmem:[#allocation2 + $0xa0] sm:$0x8] %v492_v27  ;;  %v713_v31 = vmax.f32 %v709_v17, 0.0  ;;  %v1677_v34 = vrot.slane %v1675_v13, 4  ;;  %v1682_v35 = vrot.slane %v1680_v14, 3  ;;  %v1685_v36 = vrot.slane %v1683_v15, 4 }
  0x78   : > { %6560 = vmatmul.mubr.msk.bf16.gmra.mrb[8].mxu0 %vm990_vm8, %v1396_v29  ;;  %v1464_v29 = vsel %vm1294_vm11, %v1455_v9, %v1463_v10  ;;  %v1670_v40 = vsel %vm498_vm7, %v1661_v58, %v1669_v19  ;;  %v1691_v41 = vrot.slane %v1689_v22, 3  ;;  %v1694_v45 = vrot.slane %v1692_v23, 4  ;;  %v1644_v58 = vld [vmem:[#allocation2 + $0x60] sm:$0xf8]  ;;  %v7741_v19 = vld [vmem:[#allocation2 + $0x68] sm:$0xf] }
  0x79   : > { %6563 = vmatprep.mubr.msk.bf16.mxu0 %vm990_vm8, %v1413_v32  ;;  %v717_v32 = vstv %s716_s14  ;;  %v1699_v46 = vrot.slane %v1697_v24, 3  ;;  %v1702_v47 = vrot.slane %v1700_v25, 4  ;;  %v1706_v50 = vshrl.u32 %v1640_v38, 16  ;;  %v1646_v25 = vld [vmem:[#allocation2 + $0x70] sm:$0xf8] }
  0x7a   : > { %vm7719_vm12 = vcmp.eq.s32.totalorder %v717_v32, 1  ;;  %v1709_v52 = vshll.u32 %v1640_v38, 16  ;;  %v1714_v53 = vshrl.u32 %v7724_v42, 16  ;;  %v1717_v55 = vshll.u32 %v7724_v42, 16  ;;  %v7746_v27 = vld [vmem:[#allocation2 + $0x78] sm:$0xf] }
  0x7b   : > { %v719_v43 = vsel %vm7719_vm12, 0.0, %v712_v30  ;;  %v720_v44 = vsel %vm7719_vm12, 0.0, %v713_v31  ;;  %v1678_v59 = vor.u32 %v1677_v34, %v1674_v20  ;;  %v1686_v61 = vor.u32 %v1685_v36, %v1682_v35 }
  0x7c   : > { %v723_v49 = vpack.c.bf16 %v720_v44, %v719_v43  ;;  %v1723_v63 = vshrl.u32 %v1642_v48, 16  ;;  %v1726_v60 = vshll.u32 %v1642_v48, 16  ;;  %v1695_v1 = vor.u32 %v1694_v45, %v1691_v41 }
  0x7d   : > { %v1731_v7 = vshrl.u32 %v7730_v51, 16  ;;  %v1734_v9 = vshll.u32 %v7730_v51, 16  ;;  %v1708_v10 = vrot.slane %v1706_v50, 3  ;;  %v1711_v12 = vrot.slane %v1709_v52, 4 }
  0x7e   : > { %v1716_v13 = vrot.slane %v1714_v53, 3  ;;  %v1719_v14 = vrot.slane %v1717_v55, 4  ;;  %v1687_v15 = vsel %vm498_vm7, %v1678_v59, %v1686_v61  ;;  %v1725_v16 = vrot.slane %v1723_v63, 3  ;;  %v7762_v53 = vld [vmem:[#allocation2 + $0x88] sm:$0xf] }
  0x7f   : > { %v1728_v17 = vrot.slane %v1726_v60, 4  ;;  %v2085_v20 = vsel %vm1021_vm0, %v7659_v6, 0  ;;  %v1733_v23 = vrot.slane %v1731_v7, 3  ;;  %v1736_v24 = vrot.slane %v1734_v9, 4  ;;  %v1650_v63 = vld [vmem:[#allocation2 + $0x90] sm:$0xf8] }
  0x80   : > { %6564 = vmatmul.mubr.msk.bf16.gmra.mrb[12].mxu0 %vm990_vm8, %v1430_v57  ;;  %v727_v57 = vrot.slane %v723_v49, 4  ;;  %v1712_v30 = vor.u32 %v1711_v12, %v1708_v10  ;;  %v1720_v31 = vor.u32 %v1719_v14, %v1716_v13  ;;  %v1740_v32 = vshrl.u32 %v1644_v58, 16  ;;  %v7765_v60 = vld [vmem:[#allocation2 + $0x98] sm:$0xf] }
  0x81   : > { %6567 = vmatprep.mubr.msk.bf16.mxu0 %vm990_vm8, %v1447_v26  ;;  %v1703_v26 = vor.u32 %v1702_v47, %v1699_v46  ;;  %v1743_v34 = vshll.u32 %v1644_v58, 16  ;;  %v1729_v6 = vor.u32 %v1728_v17, %v1725_v16  ;;  %v1748_v35 = vshrl.u32 %v7741_v19, 16  ;;  %v1648_v47 = vld [vmem:[#allocation2 + $0x80] sm:$0xf8] }
  0x82   : > { %732 = vst.msk [vmem:[#allocation2 + $0xa0] sm:$0xf0] %vm661_vm4, %v727_v57  ;;  %v1751_v36 = vshll.u32 %v7741_v19, 16  ;;  %v1757_v38 = vshrl.u32 %v1646_v25, 16  ;;  %v1760_v41 = vshll.u32 %v1646_v25, 16  ;;  %v1765_v43 = vshrl.u32 %v7746_v27, 16 }
  0x83   : > { %733 = vst.msk [vmem:[#allocation2 + $0xa8] sm:$0xf] %vm663_vm5, %v727_v57  ;;  %v1704_v22 = vsel %vm498_vm7, %v1695_v1, %v1703_v26  ;;  %v1768_v44 = vshll.u32 %v7746_v27, 16  ;;  %v1721_v45 = vsel %vm498_vm7, %v1712_v30, %v1720_v31  ;;  %v1742_v46 = vrot.slane %v1740_v32, 3 }
  0x84   : > { %v1745_v48 = vrot.slane %v1743_v34, 4  ;;  %v1750_v49 = vrot.slane %v1748_v35, 3  ;;  %v1753_v50 = vrot.slane %v1751_v36, 4  ;;  %v1759_v52 = vrot.slane %v1757_v38, 3 }
  0x85   : > { %v1762_v57 = vrot.slane %v1760_v41, 4  ;;  %v1767_v59 = vrot.slane %v1765_v43, 3  ;;  %v1770_v61 = vrot.slane %v1768_v44, 4  ;;  %v1774_v1 = vshrl.u32 %v1648_v47, 16 }
  0x86   : > { %v1777_v26 = vshll.u32 %v1648_v47, 16  ;;  %v1782_v7 = vshrl.u32 %v7762_v53, 16  ;;  %v1785_v9 = vshll.u32 %v7762_v53, 16  ;;  %v1746_v10 = vor.u32 %v1745_v48, %v1742_v46 }
  0x87   : > { %v1754_v12 = vor.u32 %v1753_v50, %v1750_v49  ;;  %v1791_v13 = vshrl.u32 %v1650_v63, 16  ;;  %v1794_v14 = vshll.u32 %v1650_v63, 16  ;;  %v1771_v16 = vor.u32 %v1770_v61, %v1767_v59  ;;  %v7783_v61 = vld [vmem:[#allocation2 + $0x10] sm:$0xf0] }
  0x88   : > { %6568 = vmatmul.mubr.msk.bf16.gmra.mrb[16].mxu0 %vm990_vm8, %v1464_v29  ;;  %v7751_v29 = vld [vmem:[%s8717_s3 + $0xa] sm:$0x3]  ;;  %v1799_v17 = vshrl.u32 %v7765_v60, 16  ;;  %v1802_v58 = vshll.u32 %v7765_v60, 16  ;;  %vm957_vm13 = vcmask 1043456   ;;  %v2044_v2 = vrot.slane %v7762_v53, 4 }
  0x89   : > { %6573 = vmatprep.mubr.msk.bf16.mxu0 %vm990_vm8, %v1670_v40  ;;  %v1737_v40 = vor.u32 %v1736_v24, %v1733_v23  ;;  %v1784_v23 = vrot.slane %v1782_v7, 3  ;;  %v1787_v24 = vrot.slane %v1785_v9, 4  ;;  %v1755_v25 = vsel %vm498_vm7, %v1746_v10, %v1754_v12  ;;  %v1652_v35 = vld [vmem:[#allocation2 + $0xa0] sm:$0xf8] }
  0x8a   : > { %v1793_v30 = vrot.slane %v1791_v13, 3  ;;  %v1796_v31 = vrot.slane %v1794_v14, 4  ;;  %v1801_v34 = vrot.slane %v1799_v17, 3  ;;  %v7775_v36 = vld [vmem:[#allocation2 + $0xa8] sm:$0xf]  ;;  %v1808_v41 = vshrl.u32 %v1652_v35, 16 }
  0x8b   : > { %v1738_v55 = vsel %vm498_vm7, %v1729_v6, %v1737_v40  ;;  %v1804_v6 = vrot.slane %v1802_v58, 4  ;;  %v1788_v40 = vor.u32 %v1787_v24, %v1784_v23  ;;  %v1811_v43 = vshll.u32 %v1652_v35, 16  ;;  %v7793_v13 = vld [vmem:[#allocation2 + $0x20] sm:$0xf0]  ;;  %v7795_v14 = vld [vmem:[#allocation2 + $0x30] sm:$0xf0] }
  0x8c   : > { %v1816_v44 = vshrl.u32 %v7775_v36, 16  ;;  %v1797_v46 = vor.u32 %v1796_v31, %v1793_v30  ;;  %v1810_v49 = vrot.slane %v1808_v41, 3  ;;  %v2022_v7 = vrot.slane %v7783_v61, 4  ;;  %v7807_v23 = vld [vmem:[#allocation2 + $0x40] sm:$0xf0]  ;;  %v710_v41 = vld [vmem:[%s7701_s13 + $0x10] sm:$0xff] }
  0x8d   : > { %v1805_v47 = vor.u32 %v1804_v6, %v1801_v34  ;;  %v1813_v50 = vrot.slane %v1811_v43, 4  ;;  %v2023_v9 = vrot.slane %v7685_v37, 4  ;;  %v2028_v17 = vrot.slane %v7795_v14, 4  ;;  %v7809_v24 = vld [vmem:[#allocation2 + $0x50] sm:$0xf0]  ;;  %v711_v43 = vld [vmem:[%s7701_s13 + $0x18] sm:$0xff] }
  0x8e   : > { %v2029_v37 = vrot.slane %v7704_v8, 4  ;;  %v2032_v8 = vrot.slane %v7724_v42, 4  ;;  %v2035_v30 = vrot.slane %v7730_v51, 4  ;;  %v7826_v34 = vld [vmem:[#allocation2 + $0x60] sm:$0xf0]  ;;  %v2038_v35 = vrot.slane %v7741_v19, 4 }
  0x8f   : > { %v1806_v59 = vsel %vm498_vm7, %v1797_v46, %v1805_v47  ;;  %v2024_v12 = vsel %vm957_vm13, %v2022_v7, %v2023_v9  ;;  %v7828_v6 = vld [vmem:[#allocation2 + $0x70] sm:$0xf0]  ;;  %v2037_v42 = vrot.slane %v7826_v34, 4  ;;  %v494_v51 = vld [vmem:[#allocation2 + $0xb0] sm:$0x8]  ;;  %v2251_v53 = vshll.u32 %v7793_v13, 16 }
  0x90   : > { %6574 = vmatmul.mubr.msk.bf16.vlgmr.msra.gmra.mrb[0].mxu0 %vm990_vm8, %v1687_v15  ;;  %v1763_v15 = vor.u32 %v1762_v57, %v1759_v52  ;;  %v1818_v52 = vrot.slane %v1816_v44, 3  ;;  %v530_v57 = vld [vmem:[#allocation2 + $0xa8] sm:$0x10]  ;;  %v7838_v44 = vld [vmem:[#allocation2 + $0x80] sm:$0xf0] }
  0x91   : > { %6594 = vmatpush3.bf16.msra.mxu0 %v2085_v20  ;;  %6577 = vmatprep.mubr.msk.bf16.mxu0 %vm990_vm8, %v1704_v22  ;;  %v1776_v20 = vrot.slane %v1774_v1, 3  ;;  %v1779_v22 = vrot.slane %v1777_v26, 4  ;;  %v531_v63 = vsel %vm7536_vm10, 0, %v530_v57  ;;  %v1814_v1 = vor.u32 %v1813_v50, %v1810_v49  ;;  %v7843_v47 = vld [vmem:[#allocation2 + $0x90] sm:$0xf0] }
  0x92   : > { %7158 = vmatprep.subr.msk.bf16.mxu0 %vm1021_vm0, %v7751_v29  ;;  %v1772_v32 = vsel %vm498_vm7, %v1763_v15, %v1771_v16  ;;  %532 = vst [vmem:[#allocation2 + $0xa8] sm:$0x10] %v531_v63  ;;  %v2025_v15 = vrot.slane %v7793_v13, 4  ;;  %v2026_v16 = vrot.slane %v7696_v0, 4  ;;  %v2031_v0 = vrot.slane %v7807_v23, 4 }
  0x93   : > { %v1780_v38 = vor.u32 %v1779_v22, %v1776_v20  ;;  %v2433_v20 = vsel %vm1021_vm0, %v7751_v29, 0  ;;  %v2030_v22 = vsel %vm957_vm13, %v2028_v17, %v2029_v37  ;;  %v2034_v29 = vrot.slane %v7809_v24, 4  ;;  %v2220_v49 = vld [vmem:[#allocation2 + $0x18] sm:$0x1f] }
  0x94   : > { %v2027_v58 = vsel %vm957_vm13, %v2025_v15, %v2026_v16  ;;  %v2033_v31 = vsel %vm957_vm13, %v2031_v0, %v2032_v8  ;;  %v2039_v46 = vsel %vm957_vm13, %v2037_v42, %v2038_v35  ;;  %v715_v50 = vmax.f32 %v711_v43, 0.0  ;;  %v7860_v15 = vld [vmem:[#allocation2 + $0xa0] sm:$0xf0] }
  0x95   : > { %v1789_v48 = vsel %vm498_vm7, %v1780_v38, %v1788_v40  ;;  %v2040_v38 = vrot.slane %v7828_v6, 4  ;;  %v2041_v40 = vrot.slane %v7746_v27, 4  ;;  %v2047_v57 = vrot.slane %v7765_v60, 4 }
  0x96   : > { %v722_v63 = vsel %vm7719_vm12, 0.0, %v715_v50  ;;  %v2239_v7 = vshrl.u32 %v2220_v49, 16  ;;  %v2253_v8 = vrot.slane %v2251_v53, 5  ;;  %v2265_v42 = vshrl.u32 %v7795_v14, 16 }
  0x97   : > { %v2042_v19 = vsel %vm957_vm13, %v2040_v38, %v2041_v40  ;;  %v2268_v35 = vshll.u32 %v7795_v14, 16  ;;  %v958_v38 = vrot.slane %v7602_v54, 4  ;;  %v7213_v40 = vld [vmem:[#allocation2 + $0x8] sm:$0xf]  ;;  %v961_v43 = vrot.slane %v7610_v18, 4 }
  0x98   : > { %6578 = vmatmul.mubr.msk.bf16.gmra.mrb[4].mxu0 %vm990_vm8, %v1721_v45  ;;  %v1819_v45 = vshll.u32 %v7775_v36, 16 }
  0x99   : > { %6581 = vmatprep.mubr.msk.bf16.mxu0 %vm990_vm8, %v1738_v55 }
  0x9a   : > { %v1821_v55 = vrot.slane %v1819_v45, 4  ;;  %v495_v45 = vsel %vm7344_vm3, 0, %v494_v51  ;;  %v6141_v51 = vld [vmem:[%s8717_s3 + $0x2] sm:$0x3] }
  0x9b   : > { %496 = vst [vmem:[#allocation2 + $0xb0] sm:$0x8] %v495_v45  ;;  %7153 = vmatprep.subr.msk.bf16.mxu1 %vm1021_vm0, %v6141_v51 }
  0x9c   : > { %v1822_v26 = vor.u32 %v1821_v55, %v1818_v52  ;;  %v2043_v52 = vrot.slane %v7838_v44, 4  ;;  %v2046_v55 = vrot.slane %v7843_v47, 4 }
  0x9e   : > { %v1823_v10 = vsel %vm498_vm7, %v1814_v1, %v1822_v26  ;;  %v2231_v1 = vshrl.u32 %v7783_v61, 16  ;;  %v2234_v26 = vshll.u32 %v7783_v61, 16  ;;  %v2045_v39 = vsel %vm957_vm13, %v2043_v52, %v2044_v2  ;;  %v2223_v2 = vld [vmem:[#allocation2 + $0x48] sm:$0x1f] }
  0x9f   : > { %v2048_v37 = vsel %vm957_vm13, %v2046_v55, %v2047_v57  ;;  %v2049_v61 = vrot.slane %v7860_v15, 4  ;;  %v2267_v55 = vrot.slane %v2265_v42, 4  ;;  %v2270_v57 = vrot.slane %v2268_v35, 5  ;;  %v7216_v42 = vld [vmem:[#allocation2 + $0x38] sm:$0xf] }
  0xa0   : > { %6582 = vmatmul.mubr.msk.bf16.gmra.mrb[8].mxu0 %vm990_vm8, %v1755_v25  ;;  %v7814_v25 = vld [vmem:[%s8717_s3 + $0xc] sm:$0x3]  ;;  %v968_v35 = vrot.slane %v7216_v42, 4 }
  0xa1   : > { %6585 = vmatprep.mubr.msk.bf16.mxu0 %vm990_vm8, %v1772_v32  ;;  %v2036_v32 = vsel %vm957_vm13, %v2034_v29, %v2035_v30  ;;  %v2222_v29 = vld [vmem:[#allocation2 + $0x38] sm:$0x1f]  ;;  %v2050_v30 = vrot.slane %v7775_v36, 4  ;;  %v2791_v53 = vsel %vm1021_vm0, %v7814_v25, 0 }
  0xa2   : > { %v2273_v36 = vshrl.u32 %v2222_v29, 16  ;;  %v2276_v45 = vshll.u32 %v2222_v29, 16  ;;  %v2225_v29 = vld [vmem:[#allocation2 + $0x68] sm:$0x1f] }
  0xa3   : > { %v2051_v18 = vsel %vm957_vm13, %v2049_v61, %v2050_v30  ;;  %v7215_v61 = vld [vmem:[#allocation2 + $0x28] sm:$0xf]  ;;  %v967_v30 = vrot.slane %v7635_v3, 4 }
  0xa5   : > { %v969_v3 = vsel %vm957_vm13, %v967_v30, %v968_v35  ;;  %v2367_v30 = vshrl.u32 %v7843_v47, 16 }
  0xa8   : > { %6586 = vmatmul.mubr.msk.bf16.gmra.mrb[12].mxu0 %vm990_vm8, %v1789_v48  ;;  %v714_v48 = vmax.f32 %v710_v41, 0.0  ;;  %v959_v41 = vrot.slane %v7213_v40, 4  ;;  %v2316_v40 = vshrl.u32 %v7826_v34, 16 }
  0xa9   : > { %6589 = vmatprep.mubr.msk.bf16.mxu0 %vm990_vm8, %v1806_v59  ;;  %v2221_v59 = vld [vmem:[#allocation2 + $0x28] sm:$0x1f] }
  0xaa   : > { %v721_v27 = vsel %vm7719_vm12, 0.0, %v714_v48  ;;  %v2256_v60 = vshrl.u32 %v2221_v59, 16  ;;  %v2259_v16 = vshll.u32 %v2221_v59, 16  ;;  %v7214_v48 = vld [vmem:[#allocation2 + $0x18] sm:$0xf]  ;;  %v960_v50 = vsel %vm957_vm13, %v958_v38, %v959_v41 }
  0xab   : > { %v724_v9 = vpack.c.bf16 %v722_v63, %v721_v27  ;;  %v962_v14 = vrot.slane %v7214_v48, 4  ;;  %6507 = vmatprep.mubr.msk.bf16.mxu1 %vm990_vm8, %v960_v50  ;;  %v2275_v59 = vrot.slane %v2273_v36, 4  ;;  %v2278_v63 = vrot.slane %v2276_v45, 5  ;;  %v2226_v41 = vld [vmem:[#allocation2 + $0x78] sm:$0x1f] }
  0xac   : > { %v2324_v36 = vshrl.u32 %v2225_v29, 16  ;;  %v2327_v45 = vshll.u32 %v2225_v29, 16  ;;  %v2333_v48 = vshrl.u32 %v7828_v6, 16  ;;  %v2341_v50 = vshrl.u32 %v2226_v41, 16 }
  0xad   : > { %v728_v17 = vrot.slane %v724_v9, 4  ;;  %v963_v54 = vsel %vm957_vm13, %v961_v43, %v962_v14  ;;  %v2285_v9 = vshll.u32 %v7807_v23, 16  ;;  %v2336_v14 = vshll.u32 %v7828_v6, 16 }
  0xae   : > { %v970_v6 = vrot.slane %v7637_v4, 4  ;;  %v2350_v4 = vshrl.u32 %v7838_v44, 16 }
  0xaf   : > { %734 = vst.msk [vmem:[#allocation2 + $0xb0] sm:$0xf0] %vm661_vm4, %v728_v17 }
  0xb0   : > { %6590 = vmatmul.mubr.msk.bf16.gmra.mrb[16].mxu0 %vm990_vm8, %v1823_v10  ;;  %v2242_v10 = vshll.u32 %v2220_v49, 16  ;;  %735 = vst.msk [vmem:[#allocation2 + $0xb8] sm:$0xf] %vm663_vm5, %v728_v17 }
  0xb1   : > { %6595 = vmatprep.mubr.msk.bf16.mxu0 %vm990_vm8, %v2024_v12  ;;  %v2248_v12 = vshrl.u32 %v7793_v13, 16 }
  0xb2   : > { %v2244_v0 = vrot.slane %v2242_v10, 5  ;;  %v2290_v10 = vshrl.u32 %v2223_v2, 16 }
  0xb3   : > { %v2250_v13 = vrot.slane %v2248_v12, 4  ;;  %v2293_v12 = vshll.u32 %v2223_v2, 16 }
  0xb5   : > { %v2254_v52 = vor.u32 %v2253_v8, %v2250_v13  ;;  %v2287_v13 = vrot.slane %v2285_v9, 5  ;;  %v2292_v8 = vrot.slane %v2290_v10, 4  ;;  %v7218_v9 = vld [vmem:[#allocation2 + $0x58] sm:$0xf] }
  0xb6   : > { %v974_v10 = vrot.slane %v7218_v9, 4 }
  0xb8   : > { %6596 = vmatmul.mubr.msk.bf16.vlgmr.msra.gmra.mrb[0].mxu0 %vm990_vm8, %v2027_v58  ;;  %v2233_v58 = vrot.slane %v2231_v1, 4 }
  0xb9   : > { %6616 = vmatpush3.bf16.msra.mxu0 %v2433_v20  ;;  %6599 = vmatprep.mubr.msk.bf16.mxu0 %vm990_vm8, %v2030_v22  ;;  %v2236_v20 = vrot.slane %v2234_v26, 5  ;;  %v2241_v22 = vrot.slane %v2239_v7, 4  ;;  %v2282_v26 = vshrl.u32 %v7807_v23, 16  ;;  %v2224_v7 = vld [vmem:[#allocation2 + $0x58] sm:$0x1f] }
  0xba   : > { %7159 = vmatprep.subr.msk.bf16.mxu0 %vm1021_vm0, %v7814_v25  ;;  %v2310_v23 = vshll.u32 %v2224_v7, 16  ;;  %v2295_v25 = vrot.slane %v2293_v12, 5  ;;  %v2343_v12 = vrot.slane %v2341_v50, 4  ;;  %v2387_v50 = vshll.u32 %v7860_v15, 16 }
  0xbb   : > { %v2245_v49 = vor.u32 %v2244_v0, %v2241_v22  ;;  %v964_v22 = vrot.slane %v7612_v11, 4  ;;  %v965_v0 = vrot.slane %v7215_v61, 4  ;;  %v2319_v11 = vshll.u32 %v7826_v34, 16  ;;  %v2228_v61 = vld [vmem:[#allocation2 + $0x98] sm:$0x1f] }
  0xbc   : > { %v2312_v43 = vrot.slane %v2310_v23, 5  ;;  %v2296_v34 = vor.u32 %v2295_v25, %v2292_v8  ;;  %v976_v8 = vrot.slane %v7653_v33, 4  ;;  %v7219_v25 = vld [vmem:[#allocation2 + $0x68] sm:$0xf]  ;;  %v2378_v42 = vshll.u32 %v2228_v61, 16 }
  0xc0   : > { %6600 = vmatmul.mubr.msk.bf16.gmra.mrb[4].mxu0 %vm990_vm8, %v2033_v31  ;;  %v2258_v31 = vrot.slane %v2256_v60, 4  ;;  %v2299_v60 = vshrl.u32 %v7809_v24, 16 }
  0xc1   : > { %6603 = vmatprep.mubr.msk.bf16.mxu0 %vm990_vm8, %v2036_v32  ;;  %v2261_v32 = vrot.slane %v2259_v16, 5  ;;  %v2302_v16 = vshll.u32 %v7809_v24, 16 }
  0xc2   : > { %v2301_v24 = vrot.slane %v2299_v60, 4  ;;  %v2227_v60 = vld [vmem:[#allocation2 + $0x88] sm:$0x1f] }
  0xc3   : > { %v2262_v27 = vor.u32 %v2261_v32, %v2258_v31  ;;  %v2304_v31 = vrot.slane %v2302_v16, 5  ;;  %v966_v32 = vsel %vm957_vm13, %v964_v22, %v965_v0  ;;  %v2358_v23 = vshrl.u32 %v2227_v60, 16 }
  0xc4   : > { %v2361_v22 = vshll.u32 %v2227_v60, 16 }
  0xc5   : > { %v2263_v17 = vsel %vm1294_vm11, %v2254_v52, %v2262_v27  ;;  %v2321_v52 = vrot.slane %v2319_v11, 5  ;;  %v7217_v27 = vld [vmem:[#allocation2 + $0x48] sm:$0xf] }
  0xc6   : > { %v971_v2 = vrot.slane %v7217_v27, 4  ;;  %v2363_v11 = vrot.slane %v2361_v22, 5  ;;  %v7955_v22 = vld [vmem:[#allocation2 + $0x48] sm:$0xf] }
  0xc8   : > { %6604 = vmatmul.mubr.msk.bf16.gmra.mrb[8].mxu0 %vm990_vm8, %v2039_v46  ;;  %v1023_v46 = vsel %vm1021_vm0, %v6141_v51, 0 }
  0xc9   : > { %6607 = vmatprep.mubr.msk.bf16.mxu0 %vm990_vm8, %v2042_v19  ;;  %v2237_v19 = vor.u32 %v2236_v20, %v2233_v58  ;;  %6506 = vmatpush3.bf16.msra.mxu1 %v1023_v46  ;;  %v2307_v58 = vshrl.u32 %v2224_v7, 16  ;;  %v2284_v20 = vrot.slane %v2282_v26, 4  ;;  %v2338_v26 = vrot.slane %v2336_v14, 5 }
  0xca   : > { %v972_v7 = vsel %vm957_vm13, %v970_v6, %v971_v2  ;;  %v2380_v14 = vrot.slane %v2378_v42, 5  ;;  %v982_v2 = vrot.slane %v7673_v5, 4  ;;  %v2389_v5 = vrot.slane %v2387_v50, 5 }
  0xcb   : > { %v2246_v1 = vsel %vm1294_vm11, %v2237_v19, %v2245_v49  ;;  %v2309_v38 = vrot.slane %v2307_v58, 4  ;;  %v2288_v46 = vor.u32 %v2287_v13, %v2284_v20  ;;  %v7907_v19 = vld [vmem:[%s8717_s3 + $0xe] sm:$0x3]  ;;  %v2305_v49 = vor.u32 %v2304_v31, %v2301_v24 }
  0xcc   : > { %6508 = vmatmul.mubr.msk.bf16.vlgmr.msra.gmra.mrb[0].mxu1 %vm990_vm8, %v963_v54  ;;  %v2344_v54 = vshll.u32 %v2226_v41, 16  ;;  %v2352_v13 = vrot.slane %v2350_v4, 4  ;;  %v2370_v24 = vshll.u32 %v7843_v47, 16  ;;  %v979_v31 = vrot.slane %v7669_v56, 4  ;;  %v533_v41 = vld [vmem:[#allocation2 + $0xb8] sm:$0x10] }
  0xcd   : > { %6511 = vmatprep.mubr.msk.bf16.mxu1 %vm990_vm8, %v966_v32  ;;  %v2297_v16 = vsel %vm1294_vm11, %v2288_v46, %v2296_v34  ;;  %v2375_v32 = vshrl.u32 %v2228_v61, 16  ;;  %v2568_v56 = vld [vmem:[#allocation2 + $0x20] sm:$0xf8]  ;;  %v2634_v42 = vshll.u32 %v7955_v22, 16 }
  0xce   : > { %v2372_v46 = vrot.slane %v2370_v24, 5  ;;  %v2589_v6 = vshrl.u32 %v2568_v56, 16  ;;  %v2592_v27 = vshll.u32 %v2568_v56, 16 }
  0xcf   : > { %v2636_v56 = vrot.slane %v2634_v42, 4 }
  0xd0   : > { %6608 = vmatmul.mubr.msk.bf16.gmra.mrb[12].mxu0 %vm990_vm8, %v2045_v39  ;;  %v2271_v39 = vor.u32 %v2270_v57, %v2267_v55  ;;  %v2313_v55 = vor.u32 %v2312_v43, %v2309_v38  ;;  %v2326_v57 = vrot.slane %v2324_v36, 4  ;;  %v2594_v60 = vrot.slane %v2592_v27, 4 }
  0xd1   : > { %6611 = vmatprep.mubr.msk.bf16.mxu0 %vm990_vm8, %v2048_v37  ;;  %v2279_v37 = vor.u32 %v2278_v63, %v2275_v59  ;;  %v2329_v59 = vrot.slane %v2327_v45, 5  ;;  %v973_v63 = vrot.slane %v7650_v28, 4  ;;  %v2229_v45 = vld [vmem:[#allocation2 + $0xa8] sm:$0x1f] }
  0xd2   : > { %v2314_v28 = vsel %vm1294_vm11, %v2305_v49, %v2313_v55  ;;  %v2384_v49 = vshrl.u32 %v7860_v15, 16  ;;  %v2395_v55 = vshll.u32 %v2229_v45, 16 }
  0xd3   : > { %v2280_v51 = vsel %vm1294_vm11, %v2271_v39, %v2279_v37  ;;  %v975_v39 = vsel %vm957_vm13, %v973_v63, %v974_v10  ;;  %v2330_v58 = vor.u32 %v2329_v59, %v2326_v57  ;;  %v7221_v57 = vld [vmem:[#allocation2 + $0x88] sm:$0xf]  ;;  %v985_v59 = vrot.slane %v7681_v21, 4  ;;  %v7222_v63 = vld [vmem:[#allocation2 + $0x98] sm:$0xf] }
  0xd4   : > { %6512 = vmatmul.mubr.msk.bf16.gmra.mrb[4].mxu1 %vm990_vm8, %v969_v3  ;;  %v2369_v3 = vrot.slane %v2367_v30, 4  ;;  %v983_v15 = vrot.slane %v7221_v57, 4  ;;  %v2386_v10 = vrot.slane %v2384_v49, 4 }
  0xd5   : > { %6515 = vmatprep.mubr.msk.bf16.mxu1 %vm990_vm8, %v972_v7 }
  0xd6   : > { %v2390_v61 = vor.u32 %v2389_v5, %v2386_v10  ;;  %v7977_v10 = vld [vmem:[#allocation2 + $0x78] sm:$0xf] }
  0xd8   : > { %6612 = vmatmul.mubr.msk.bf16.gmra.mrb[16].mxu0 %vm990_vm8, %v2051_v18  ;;  %v2318_v18 = vrot.slane %v2316_v40, 4  ;;  %v2360_v40 = vrot.slane %v2358_v23, 4  ;;  %v2572_v23 = vld [vmem:[#allocation2 + $0x40] sm:$0xf8] }
  0xd9   : > { %6617 = vmatprep.mubr.msk.bf16.mxu0 %vm990_vm8, %v2246_v1  ;;  %v2335_v1 = vrot.slane %v2333_v48, 4  ;;  %v2377_v48 = vrot.slane %v2375_v32, 4  ;;  %v2623_v30 = vshrl.u32 %v2572_v23, 16  ;;  %v2631_v32 = vshrl.u32 %v7955_v22, 16 }
  0xda   : > { %v2322_v37 = vor.u32 %v2321_v52, %v2318_v18  ;;  %v2364_v34 = vor.u32 %v2363_v11, %v2360_v40  ;;  %v534_v18 = vsel %vm7536_vm10, 0, %v533_v41  ;;  %v2392_v52 = vshrl.u32 %v2229_v45, 16 }
  0xdb   : > { %v2339_v20 = vor.u32 %v2338_v26, %v2335_v1  ;;  %535 = vst [vmem:[#allocation2 + $0xb8] sm:$0x10] %v534_v18  ;;  %v986_v1 = vrot.slane %v7222_v63, 4  ;;  %v2373_v26 = vor.u32 %v2372_v46, %v2369_v3  ;;  %v2381_v62 = vor.u32 %v2380_v14, %v2377_v48  ;;  %v2576_v3 = vld [vmem:[#allocation2 + $0x60] sm:$0xf8] }
  0xdc   : > { %6516 = vmatmul.mubr.msk.bf16.gmra.mrb[8].mxu1 %vm990_vm8, %v975_v39  ;;  %v2331_v43 = vsel %vm1294_vm11, %v2322_v37, %v2330_v58  ;;  %v2570_v39 = vld [vmem:[#allocation2 + $0x30] sm:$0xf8]  ;;  %v2625_v41 = vrot.slane %v2623_v30, 3  ;;  %v2633_v45 = vrot.slane %v2631_v32, 3  ;;  %v7968_v46 = vld [vmem:[#allocation2 + $0x68] sm:$0xf] }
  0xdd   : > { %v987_v4 = vsel %vm957_vm13, %v985_v59, %v986_v1  ;;  %v2668_v57 = vshll.u32 %v7968_v46, 16  ;;  %v2582_v30 = vld [vmem:[#allocation2 + $0x90] sm:$0xf8] }
  0xe0   : > { %6618 = vmatmul.mubr.msk.bf16.vlgmr.msra.gmra.mrb[0].mxu0 %vm990_vm8, %v2263_v17  ;;  %v2353_v17 = vshll.u32 %v7838_v44, 16  ;;  %v977_v44 = vrot.slane %v7219_v25, 4 }
  0xe1   : > { %6638 = vmatpush3.bf16.msra.mxu0 %v2791_v53  ;;  %6621 = vmatprep.mubr.msk.bf16.mxu0 %vm990_vm8, %v2280_v51  ;;  %v2346_v53 = vrot.slane %v2344_v54, 5  ;;  %v7220_v51 = vld [vmem:[#allocation2 + $0x78] sm:$0xf]  ;;  %v7937_v54 = vld [vmem:[#allocation2 + $0x28] sm:$0xf] }
  0xe2   : > { %7160 = vmatprep.subr.msk.bf16.mxu0 %vm1021_vm0, %v7907_v19  ;;  %v2355_v29 = vrot.slane %v2353_v17, 5  ;;  %v978_v35 = vsel %vm957_vm13, %v976_v8, %v977_v44  ;;  %v980_v38 = vrot.slane %v7220_v51, 4  ;;  %v2597_v7 = vshrl.u32 %v7937_v54, 16 }
  0xe3   : > { %v2347_v0 = vor.u32 %v2346_v53, %v2343_v12  ;;  %6519 = vmatprep.mubr.msk.bf16.mxu1 %vm990_vm8, %v978_v35  ;;  %v2600_v9 = vshll.u32 %v7937_v54, 16  ;;  %v984_v12 = vsel %vm957_vm13, %v982_v2, %v983_v15  ;;  %v2591_v53 = vrot.slane %v2589_v6, 3 }
  0xe4   : > { %v981_v33 = vsel %vm957_vm13, %v979_v31, %v980_v38  ;;  %v2356_v47 = vor.u32 %v2355_v29, %v2352_v13  ;;  %v2397_v17 = vrot.slane %v2395_v55, 5  ;;  %v2599_v37 = vrot.slane %v2597_v7, 3  ;;  %v2574_v38 = vld [vmem:[#allocation2 + $0x50] sm:$0xf8] }
  0xe5   : > { %v2348_v36 = vsel %vm1294_vm11, %v2339_v20, %v2347_v0  ;;  %6520 = vmatmul.mubr.msk.bf16.gmra.mrb[12].mxu1 %vm990_vm8, %v981_v33  ;;  %v2602_v58 = vrot.slane %v2600_v9, 4  ;;  %v7953_v20 = vld [vmem:[#allocation2 + $0x38] sm:$0xf]  ;;  %v2595_v0 = vor.u32 %v2594_v60, %v2591_v53  ;;  %v2606_v13 = vshrl.u32 %v2570_v39, 16  ;;  %v2578_v9 = vld [vmem:[#allocation2 + $0x70] sm:$0xf8] }
  0xe6   : > { %6523 = vmatprep.mubr.msk.bf16.mxu1 %vm990_vm8, %v984_v12  ;;  %v2365_v21 = vsel %vm1294_vm11, %v2356_v47, %v2364_v34  ;;  %v2609_v8 = vshll.u32 %v2570_v39, 16  ;;  %v2614_v44 = vshrl.u32 %v7953_v20, 16  ;;  %v2617_v29 = vshll.u32 %v7953_v20, 16 }
  0xe7   : > { %v2603_v24 = vor.u32 %v2602_v58, %v2599_v37  ;;  %v2626_v31 = vshll.u32 %v2572_v23, 16  ;;  %v2608_v35 = vrot.slane %v2606_v13, 3  ;;  %v2640_v48 = vshrl.u32 %v2574_v38, 16 }
  0xe8   : > { %6622 = vmatmul.mubr.msk.bf16.gmra.mrb[4].mxu0 %vm990_vm8, %v2297_v16  ;;  %v2394_v16 = vrot.slane %v2392_v52, 4  ;;  %v2611_v51 = vrot.slane %v2609_v8, 4  ;;  %v2616_v11 = vrot.slane %v2614_v44, 3  ;;  %v2619_v33 = vrot.slane %v2617_v29, 4 }
  0xe9   : > { %6625 = vmatprep.mubr.msk.bf16.mxu0 %vm990_vm8, %v2314_v28  ;;  %v2382_v28 = vsel %vm1294_vm11, %v2373_v26, %v2381_v62  ;;  %v2628_v47 = vrot.slane %v2626_v31, 4  ;;  %v2643_v14 = vshll.u32 %v2574_v38, 16  ;;  %v2657_v52 = vshrl.u32 %v2576_v3, 16 }
  0xea   : > { %v2398_v25 = vor.u32 %v2397_v17, %v2394_v16  ;;  %v2612_v50 = vor.u32 %v2611_v51, %v2608_v35  ;;  %v2620_v18 = vor.u32 %v2619_v33, %v2616_v11  ;;  %v2660_v6 = vshll.u32 %v2576_v3, 16  ;;  %v7987_v16 = vld [vmem:[%s8717_s3 + $0x10] sm:$0x3]  ;;  %v7998_v35 = vld [vmem:[#allocation2 + $0x98] sm:$0xf] }
  0xeb   : > { %v2629_v27 = vor.u32 %v2628_v47, %v2625_v41  ;;  %v2637_v2 = vor.u32 %v2636_v56, %v2633_v45  ;;  %v2665_v55 = vshrl.u32 %v7968_v46, 16  ;;  %v2642_v15 = vrot.slane %v2640_v48, 3  ;;  %v2584_v33 = vld [vmem:[#allocation2 + $0xa0] sm:$0xf8]  ;;  %v8001_v41 = vld [vmem:[#allocation2 + $0xa8] sm:$0xf] }
  0xec   : > { %v2399_v40 = vsel %vm1294_vm11, %v2390_v61, %v2398_v25  ;;  %v2645_v59 = vrot.slane %v2643_v14, 4  ;;  %v2621_v26 = vsel %vm498_vm7, %v2612_v50, %v2620_v18  ;;  %v2659_v62 = vrot.slane %v2657_v52, 3 }
  0xed   : > { %6524 = vmatmul.mubr.msk.bf16.gmra.mrb[16].mxu1 %vm990_vm8, %v987_v4  ;;  %v2662_v7 = vrot.slane %v2660_v6, 4  ;;  %v3019_v12 = vsel %vm1021_vm0, %v7907_v19, 0  ;;  %v2638_v5 = vsel %vm498_vm7, %v2629_v27, %v2637_v2  ;;  %v2667_v53 = vrot.slane %v2665_v55, 3  ;;  %v2580_v4 = vld [vmem:[#allocation2 + $0x80] sm:$0xf8] }
  0xee   : > { %v2670_v60 = vrot.slane %v2668_v57, 4  ;;  %v2646_v17 = vor.u32 %v2645_v59, %v2642_v15  ;;  %v2677_v37 = vshll.u32 %v2578_v9, 16  ;;  %v2682_v58 = vshrl.u32 %v7977_v10, 16 }
  0xef   : > { %v2663_v19 = vor.u32 %v2662_v7, %v2659_v62  ;;  %v2685_v23 = vshll.u32 %v7977_v10, 16  ;;  %v2691_v61 = vshrl.u32 %v2580_v4, 16  ;;  %v2694_v13 = vshll.u32 %v2580_v4, 16  ;;  %v2586_v62 = vld [vmem:[#allocation2 + $0xb0] sm:$0xf8] }
  0xf0   : > { %6626 = vmatmul.mubr.msk.bf16.gmra.mrb[8].mxu0 %vm990_vm8, %v2331_v43  ;;  %v7965_v43 = vld [vmem:[#allocation2 + $0x58] sm:$0xf]  ;;  %v2684_v31 = vrot.slane %v2682_v58, 3  ;;  %v2711_v47 = vshll.u32 %v2582_v30, 16  ;;  %v2716_v45 = vshrl.u32 %v7998_v35, 16  ;;  %v2719_v56 = vshll.u32 %v7998_v35, 16 }
  0xf1   : > { %6629 = vmatprep.mubr.msk.bf16.mxu0 %vm990_vm8, %v2348_v36  ;;  %v2604_v36 = vsel %vm498_vm7, %v2595_v0, %v2603_v24  ;;  %v2648_v34 = vshrl.u32 %v7965_v43, 16  ;;  %v2651_v49 = vshll.u32 %v7965_v43, 16  ;;  %v2671_v0 = vor.u32 %v2670_v60, %v2667_v53  ;;  %v8011_v7 = vld [vmem:[#allocation2 + $0xb8] sm:$0xf] }
  0xf2   : > { %v2679_v24 = vrot.slane %v2677_v37, 4  ;;  %v2687_v32 = vrot.slane %v2685_v23, 4  ;;  %v2693_v42 = vrot.slane %v2691_v61, 3  ;;  %v2696_v38 = vrot.slane %v2694_v13, 4 }
  0xf3   : > { %v2650_v63 = vrot.slane %v2648_v34, 3  ;;  %v2653_v1 = vrot.slane %v2651_v49, 4  ;;  %v2672_v51 = vsel %vm498_vm7, %v2663_v19, %v2671_v0  ;;  %v2725_v14 = vshrl.u32 %v2584_v33, 16  ;;  %v2926_v0 = vld [vmem:[#allocation2 + $0x20] sm:$0xf0] }
  0xf4   : > { %v2688_v48 = vor.u32 %v2687_v32, %v2684_v31  ;;  %v2728_v34 = vshll.u32 %v2584_v33, 16  ;;  %v2697_v49 = vor.u32 %v2696_v38, %v2693_v42  ;;  %v2733_v18 = vshrl.u32 %v8001_v41, 16  ;;  %v8026_v31 = vld [vmem:[#allocation2 + $0x40] sm:$0xf0]  ;;  %v8038_v33 = vld [vmem:[#allocation2 + $0x50] sm:$0xf0] }
  0xf5   : > { %v2654_v39 = vor.u32 %v2653_v1, %v2650_v63  ;;  %v2736_v52 = vshll.u32 %v8001_v41, 16  ;;  %v2713_v27 = vrot.slane %v2711_v47, 4  ;;  %v2718_v2 = vrot.slane %v2716_v45, 3 }
  0xf6   : > { %v2721_v55 = vrot.slane %v2719_v56, 4  ;;  %v2727_v15 = vrot.slane %v2725_v14, 3  ;;  %v2730_v59 = vrot.slane %v2728_v34, 4  ;;  %v2735_v1 = vrot.slane %v2733_v18, 3  ;;  %v8062_v18 = vld [vmem:[#allocation2 + $0x90] sm:$0xf0] }
  0xf7   : > { %v2655_v44 = vsel %vm498_vm7, %v2646_v17, %v2654_v39  ;;  %v2745_v53 = vshll.u32 %v2586_v62, 16  ;;  %v2750_v60 = vshrl.u32 %v8011_v7, 16  ;;  %v2753_v4 = vshll.u32 %v8011_v7, 16 }
  0xf8   : > { %6630 = vmatmul.mubr.msk.bf16.gmra.mrb[12].mxu0 %vm990_vm8, %v2365_v21  ;;  %v7982_v21 = vld [vmem:[#allocation2 + $0x88] sm:$0xf]  ;;  %v2731_v17 = vor.u32 %v2730_v59, %v2727_v15  ;;  %v2960_v42 = vrot.slane %v7953_v20, 4  ;;  %v2965_v20 = vrot.slane %v8038_v33, 4  ;;  %v2969_v45 = vrot.slane %v7968_v46, 4 }
  0xf9   : > { %6633 = vmatprep.mubr.msk.bf16.mxu0 %vm990_vm8, %v2382_v28  ;;  %v2674_v28 = vshrl.u32 %v2578_v9, 16  ;;  %v2699_v8 = vshrl.u32 %v7982_v21, 16  ;;  %v2702_v25 = vshll.u32 %v7982_v21, 16  ;;  %v2747_v19 = vrot.slane %v2745_v53, 4 }
  0xfa   : > { %v2752_v58 = vrot.slane %v2750_v60, 3  ;;  %v2755_v23 = vrot.slane %v2753_v4, 4  ;;  %v2975_v46 = vrot.slane %v7982_v21, 4  ;;  %v2981_v21 = vrot.slane %v8001_v41, 4 }
  0xfb   : > { %v2676_v29 = vrot.slane %v2674_v28, 3  ;;  %v2704_v11 = vrot.slane %v2702_v25, 4  ;;  %v2956_v25 = vrot.slane %v2926_v0, 4  ;;  %v2984_v41 = vrot.slane %v8011_v7, 4 }
  0xfd   : > { %v2680_v3 = vor.u32 %v2679_v24, %v2676_v29  ;;  %v8024_v24 = vld [vmem:[#allocation2 + $0x30] sm:$0xf0] }
  0xfe   : > { %v2959_v32 = vrot.slane %v8024_v24, 4  ;;  %v3182_v4 = vshrl.u32 %v8024_v24, 16 }
  0xff   : > { %v2689_v57 = vsel %vm498_vm7, %v2680_v3, %v2688_v48  ;;  %v8050_v3 = vld [vmem:[#allocation2 + $0x70] sm:$0xf0]  ;;  %v8052_v48 = vld [vmem:[#allocation2 + $0x80] sm:$0xf0] }
 0x100   : > { %6634 = vmatmul.mubr.msk.bf16.gmra.mrb[16].mxu0 %vm990_vm8, %v2399_v40  ;;  %v2701_v40 = vrot.slane %v2699_v8, 3  ;;  %v2756_v8 = vor.u32 %v2755_v23, %v2752_v58  ;;  %v2961_v38 = vsel %vm957_vm13, %v2959_v32, %v2960_v42  ;;  %v2971_v14 = vrot.slane %v8050_v3, 4 }
 0x101   : > { %6639 = vmatprep.mubr.msk.bf16.mxu0 %vm990_vm8, %v2604_v36  ;;  %v2708_v36 = vshrl.u32 %v2582_v30, 16  ;;  %v2974_v34 = vrot.slane %v8052_v48, 4 }
 0x102   : > { %v2705_v50 = vor.u32 %v2704_v11, %v2701_v40  ;;  %v3367_v40 = vsel %vm1021_vm0, %v7987_v16, 0 }
 0x103   : > { %v2710_v6 = vrot.slane %v2708_v36, 3  ;;  %v8040_v36 = vld [vmem:[#allocation2 + $0x60] sm:$0xf0] }
 0x104   : > { %v2706_v63 = vsel %vm498_vm7, %v2697_v49, %v2705_v50  ;;  %v2968_v47 = vrot.slane %v8040_v36, 4  ;;  %v2976_v50 = vsel %vm957_vm13, %v2974_v34, %v2975_v46 }
 0x105   : > { %v2714_v9 = vor.u32 %v2713_v27, %v2710_v6  ;;  %v3154_v6 = vld [vmem:[#allocation2 + $0x28] sm:$0x1f]  ;;  %v2977_v27 = vrot.slane %v8062_v18, 4 }
 0x106   : > { %v2970_v56 = vsel %vm957_vm13, %v2968_v47, %v2969_v45  ;;  %v3173_v15 = vshrl.u32 %v3154_v6, 16  ;;  %v3176_v59 = vshll.u32 %v3154_v6, 16 }
 0x108   : > { %6640 = vmatmul.mubr.msk.bf16.vlgmr.msra.gmra.mrb[0].mxu0 %vm990_vm8, %v2621_v26  ;;  %v2738_v26 = vrot.slane %v2736_v52, 4  ;;  %v8064_v52 = vld [vmem:[#allocation2 + $0xa0] sm:$0xf0]  ;;  %v3178_v53 = vrot.slane %v3176_v59, 5 }
 0x109   : > { %6660 = vmatpush3.bf16.msra.mxu0 %v3019_v12  ;;  %6643 = vmatprep.mubr.msk.bf16.mxu0 %vm990_vm8, %v2638_v5  ;;  %v2722_v12 = vor.u32 %v2721_v55, %v2718_v2  ;;  %v2742_v5 = vshrl.u32 %v2586_v62, 16  ;;  %v2980_v2 = vrot.slane %v8064_v52, 4  ;;  %v3165_v55 = vshrl.u32 %v2926_v0, 16  ;;  %v3155_v62 = vld [vmem:[#allocation2 + $0x38] sm:$0x1f] }
 0x10a   : > { %7161 = vmatprep.subr.msk.bf16.mxu0 %vm1021_vm0, %v7987_v16  ;;  %v2739_v39 = vor.u32 %v2738_v26, %v2735_v1 }
 0x10b   : > { %v2723_v28 = vsel %vm498_vm7, %v2714_v9, %v2722_v12  ;;  %v2744_v37 = vrot.slane %v2742_v5, 3  ;;  %v2982_v26 = vsel %vm957_vm13, %v2980_v2, %v2981_v21  ;;  %v3167_v9 = vrot.slane %v3165_v55, 4 }
 0x10c   : > { %v2740_v61 = vsel %vm498_vm7, %v2731_v17, %v2739_v39  ;;  %v3175_v5 = vrot.slane %v3173_v15, 4  ;;  %v3185_v17 = vshll.u32 %v8024_v24, 16  ;;  %v3190_v39 = vshrl.u32 %v3155_v62, 16 }
 0x10d   : > { %v2748_v13 = vor.u32 %v2747_v19, %v2744_v37  ;;  %v3199_v37 = vshrl.u32 %v8026_v31, 16  ;;  %v3202_v19 = vshll.u32 %v8026_v31, 16 }
 0x10f   : > { %v2757_v29 = vsel %vm498_vm7, %v2748_v13, %v2756_v8  ;;  %v3184_v13 = vrot.slane %v3182_v4, 4  ;;  %v3187_v8 = vrot.slane %v3185_v17, 5  ;;  %v3204_v24 = vrot.slane %v3202_v19, 5 }
 0x110   : > { %6644 = vmatmul.mubr.msk.bf16.gmra.mrb[4].mxu0 %vm990_vm8, %v2655_v44  ;;  %v2957_v44 = vrot.slane %v7937_v54, 4  ;;  %v2963_v54 = vrot.slane %v7955_v22, 4  ;;  %v2966_v22 = vrot.slane %v7965_v43, 4  ;;  %v2972_v43 = vrot.slane %v7977_v10, 4 }
 0x111   : > { %6647 = vmatprep.mubr.msk.bf16.mxu0 %vm990_vm8, %v2672_v51  ;;  %v2962_v51 = vrot.slane %v8026_v31, 4  ;;  %v2978_v10 = vrot.slane %v7998_v35, 4  ;;  %v3156_v35 = vld [vmem:[#allocation2 + $0x48] sm:$0x1f]  ;;  %v3219_v31 = vshll.u32 %v8038_v33, 16 }
 0x112   : > { %v2958_v30 = vsel %vm957_vm13, %v2956_v25, %v2957_v44  ;;  %v2967_v16 = vsel %vm957_vm13, %v2965_v20, %v2966_v22  ;;  %v2973_v49 = vsel %vm957_vm13, %v2971_v14, %v2972_v43  ;;  %v3207_v58 = vshrl.u32 %v3156_v35, 16 }
 0x113   : > { %v2964_v11 = vsel %vm957_vm13, %v2962_v51, %v2963_v54  ;;  %v2979_v1 = vsel %vm957_vm13, %v2977_v27, %v2978_v10  ;;  %v3210_v23 = vshll.u32 %v3156_v35, 16  ;;  %v3192_v25 = vrot.slane %v3190_v39, 4  ;;  %v3159_v27 = vld [vmem:[#allocation2 + $0x78] sm:$0x1f] }
 0x114   : > { %v3209_v32 = vrot.slane %v3207_v58, 4  ;;  %v3216_v54 = vshrl.u32 %v8038_v33, 16  ;;  %v3188_v20 = vor.u32 %v3187_v8, %v3184_v13  ;;  %v3221_v46 = vrot.slane %v3219_v31, 5 }
 0x115   : > { %v3212_v42 = vrot.slane %v3210_v23, 5  ;;  %v3161_v23 = vld [vmem:[#allocation2 + $0x98] sm:$0x1f] }
 0x116   : > { %v3218_v34 = vrot.slane %v3216_v54, 4  ;;  %v3292_v13 = vshrl.u32 %v3161_v23, 16  ;;  %v3295_v8 = vshll.u32 %v3161_v23, 16  ;;  %v8141_v23 = vld [vmem:[%s8718_s4] ss:$0 sm:$0xff] }
 0x117   : > { %v3213_v45 = vor.u32 %v3212_v42, %v3209_v32  ;;  %v3304_v32 = vshll.u32 %v8064_v52, 16 }
 0x118   : > { %6648 = vmatmul.mubr.msk.bf16.gmra.mrb[8].mxu0 %vm990_vm8, %v2689_v57  ;;  %v3168_v57 = vshll.u32 %v2926_v0, 16  ;;  %v3179_v0 = vor.u32 %v3178_v53, %v3175_v5  ;;  %v3222_v15 = vor.u32 %v3221_v46, %v3218_v34 }
 0x119   : > { %6651 = vmatprep.mubr.msk.bf16.mxu0 %vm990_vm8, %v2706_v63  ;;  %v8072_v63 = vld [vmem:[#allocation2 + $0xb0] sm:$0xf0] }
 0x11a   : > { %v3170_v12 = vrot.slane %v3168_v57, 5  ;;  %v2983_v60 = vrot.slane %v8072_v63, 4  ;;  %v3160_v57 = vld [vmem:[#allocation2 + $0x88] sm:$0x1f] }
 0x11b   : > { %v3275_v5 = vshrl.u32 %v3160_v57, 16  ;;  %v3278_v53 = vshll.u32 %v3160_v57, 16 }
 0x11c   : > { %v2985_v7 = vsel %vm957_vm13, %v2983_v60, %v2984_v41 }
 0x11d   : > { %v3277_v19 = vrot.slane %v3275_v5, 4  ;;  %v3280_v58 = vrot.slane %v3278_v53, 5 }
 0x120   : > { %6652 = vmatmul.mubr.msk.bf16.gmra.mrb[12].mxu0 %vm990_vm8, %v2723_v28  ;;  %v3193_v28 = vshll.u32 %v3155_v62, 16  ;;  %v3261_v62 = vshll.u32 %v3159_v27, 16 }
 0x121   : > { %6655 = vmatprep.mubr.msk.bf16.mxu0 %vm990_vm8, %v2740_v61  ;;  %v3171_v61 = vor.u32 %v3170_v12, %v3167_v9  ;;  %v3267_v9 = vshrl.u32 %v8052_v48, 16  ;;  %v3270_v12 = vshll.u32 %v8052_v48, 16  ;;  %v3284_v48 = vshrl.u32 %v8062_v18, 16 }
 0x122   : > { %v3195_v44 = vrot.slane %v3193_v28, 5  ;;  %v3263_v28 = vrot.slane %v3261_v62, 5 }
 0x123   : > { %v3180_v51 = vsel %vm1294_vm11, %v3171_v61, %v3179_v0  ;;  %v3162_v0 = vld [vmem:[#allocation2 + $0xa8] sm:$0x1f]  ;;  %v3286_v54 = vrot.slane %v3284_v48, 4 }
 0x124   : > { %v3196_v22 = vor.u32 %v3195_v44, %v3192_v25  ;;  %v3309_v42 = vshrl.u32 %v3162_v0, 16 }
 0x128   : > { %6656 = vmatmul.mubr.msk.bf16.gmra.mrb[16].mxu0 %vm990_vm8, %v2757_v29  ;;  %v3157_v29 = vld [vmem:[#allocation2 + $0x58] sm:$0x1f] }
 0x129   : > { %6661 = vmatprep.mubr.msk.bf16.mxu0 %vm990_vm8, %v2958_v30  ;;  %v3201_v30 = vrot.slane %v3199_v37, 4  ;;  %v3269_v37 = vrot.slane %v3267_v9, 4 }
 0x12b   : > { %v3205_v47 = vor.u32 %v3204_v24, %v3201_v30  ;;  %v3281_v30 = vor.u32 %v3280_v58, %v3277_v19  ;;  %v3301_v24 = vshrl.u32 %v8064_v52, 16  ;;  %v3318_v52 = vshrl.u32 %v8072_v63, 16 }
 0x12d   : > { %v3214_v6 = vsel %vm1294_vm11, %v3205_v47, %v3213_v45  ;;  %v3311_v47 = vrot.slane %v3309_v42, 4 }
 0x130   : > { %6662 = vmatmul.mubr.msk.bf16.vlgmr.msra.gmra.mrb[0].mxu0 %vm990_vm8, %v2961_v38  ;;  %v3224_v38 = vshrl.u32 %v3157_v29, 16 }
 0x131   : > { %6682 = vmatpush3.bf16.msra.mxu0 %v3367_v40  ;;  %6665 = vmatprep.mubr.msk.bf16.mxu0 %vm990_vm8, %v2964_v11  ;;  %v3227_v40 = vshll.u32 %v3157_v29, 16  ;;  %v3158_v11 = vld [vmem:[#allocation2 + $0x68] sm:$0x1f] }
 0x132   : > { %v3241_v14 = vshrl.u32 %v3158_v11, 16  ;;  %v3244_v43 = vshll.u32 %v3158_v11, 16  ;;  %v3226_v33 = vrot.slane %v3224_v38, 4  ;;  %v3294_v38 = vrot.slane %v3292_v13, 4 }
 0x134   : > { %v3243_v21 = vrot.slane %v3241_v14, 4  ;;  %v3246_v55 = vrot.slane %v3244_v43, 5  ;;  %v3321_v43 = vshll.u32 %v8072_v63, 16 }
 0x136   : > { %v3247_v60 = vor.u32 %v3246_v55, %v3243_v21 }
 0x138   : > { %6666 = vmatmul.mubr.msk.bf16.gmra.mrb[4].mxu0 %vm990_vm8, %v2967_v16  ;;  %v3233_v16 = vshrl.u32 %v8040_v36, 16 }
 0x139   : > { %6669 = vmatprep.mubr.msk.bf16.mxu0 %vm990_vm8, %v2970_v56  ;;  %v3236_v56 = vshll.u32 %v8040_v36, 16  ;;  %v3250_v36 = vshrl.u32 %v8050_v3, 16 }
 0x13a   : > { %v3235_v10 = vrot.slane %v3233_v16, 4  ;;  %v3163_v16 = vld [vmem:[#allocation2 + $0xb8] sm:$0x1f] }
 0x13b   : > { %v3238_v2 = vrot.slane %v3236_v56, 5  ;;  %v3252_v4 = vrot.slane %v3250_v36, 4  ;;  %v3326_v34 = vshrl.u32 %v3163_v16, 16  ;;  %v3329_v46 = vshll.u32 %v3163_v16, 16 }
 0x13d   : > { %v3239_v35 = vor.u32 %v3238_v2, %v3235_v10  ;;  %v3328_v10 = vrot.slane %v3326_v34, 4  ;;  %v3331_v2 = vrot.slane %v3329_v46, 5 }
 0x13f   : > { %v3248_v61 = vsel %vm1294_vm11, %v3239_v35, %v3247_v60  ;;  %v3332_v57 = vor.u32 %v3331_v2, %v3328_v10 }
 0x140   : > { %6670 = vmatmul.mubr.msk.bf16.gmra.mrb[8].mxu0 %vm990_vm8, %v2973_v49  ;;  %v3229_v49 = vrot.slane %v3227_v40, 5  ;;  %v3297_v40 = vrot.slane %v3295_v8, 5 }
 0x141   : > { %6673 = vmatprep.mubr.msk.bf16.mxu0 %vm990_vm8, %v2976_v50  ;;  %v3197_v50 = vsel %vm1294_vm11, %v3188_v20, %v3196_v22  ;;  %v3303_v20 = vrot.slane %v3301_v24, 4  ;;  %v3306_v22 = vrot.slane %v3304_v32, 5 }
 0x142   : > { %v3230_v59 = vor.u32 %v3229_v49, %v3226_v33  ;;  %v3298_v14 = vor.u32 %v3297_v40, %v3294_v38 }
 0x143   : > { %v3307_v33 = vor.u32 %v3306_v22, %v3303_v20 }
 0x144   : > { %v3231_v41 = vsel %vm1294_vm11, %v3222_v15, %v3230_v59 }
 0x148   : > { %6674 = vmatmul.mubr.msk.bf16.gmra.mrb[12].mxu0 %vm990_vm8, %v2979_v1  ;;  %v3253_v1 = vshll.u32 %v8050_v3, 16  ;;  %v3272_v3 = vrot.slane %v3270_v12, 5 }
 0x149   : > { %6677 = vmatprep.mubr.msk.bf16.mxu0 %vm990_vm8, %v2982_v26  ;;  %v3258_v26 = vshrl.u32 %v3159_v27, 16  ;;  %v3323_v27 = vrot.slane %v3321_v43, 5 }
 0x14a   : > { %v3255_v17 = vrot.slane %v3253_v1, 5  ;;  %v3273_v29 = vor.u32 %v3272_v3, %v3269_v37 }
 0x14b   : > { %v3260_v39 = vrot.slane %v3258_v26, 4 }
 0x14c   : > { %v3256_v25 = vor.u32 %v3255_v17, %v3252_v4  ;;  %v3282_v11 = vsel %vm1294_vm11, %v3273_v29, %v3281_v30 }
 0x14d   : > { %v3264_v44 = vor.u32 %v3263_v28, %v3260_v39 }
 0x150   : > { %6678 = vmatmul.mubr.msk.bf16.gmra.mrb[16].mxu0 %vm990_vm8, %v2985_v7  ;;  %v3287_v7 = vshll.u32 %v8062_v18, 16  ;;  %v3265_v18 = vsel %vm1294_vm11, %v3256_v25, %v3264_v44 }
 0x151   : > { %6683 = vmatprep.mubr.msk.bf16.mxu0 %vm990_vm8, %v3180_v51  ;;  %v3312_v51 = vshll.u32 %v3162_v0, 16 }
 0x152   : > { %v3289_v31 = vrot.slane %v3287_v7, 5 }
 0x153   : > { %v3314_v45 = vrot.slane %v3312_v51, 5 }
 0x154   : > { %v3290_v56 = vor.u32 %v3289_v31, %v3286_v54 }
 0x155   : > { %v3315_v49 = vor.u32 %v3314_v45, %v3311_v47 }
 0x157   : > { %v3316_v21 = vsel %vm1294_vm11, %v3307_v33, %v3315_v49 }
 0x158   : > { %6684 = vmatmul.mubr.msk.bf16.vlgmr.msra.gmra.mrb[0].mxu0 %vm990_vm8, %v3197_v50  ;;  %v3299_v50 = vsel %vm1294_vm11, %v3290_v56, %v3298_v14 }
 0x159   : > { %6687 = vmatprep.mubr.msk.bf16.mxu0 %vm990_vm8, %v3214_v6  ;;  %v3320_v6 = vrot.slane %v3318_v52, 4 }
 0x15b   : > { %v3324_v55 = vor.u32 %v3323_v27, %v3320_v6 }
 0x15d   : > { %v3333_v63 = vsel %vm1294_vm11, %v3324_v55, %v3332_v57 }
 0x160   : > { %6688 = vmatmul.mubr.msk.bf16.gmra.mrb[4].mxu0 %vm990_vm8, %v3231_v41 }
 0x161   : > { %6691 = vmatprep.mubr.msk.bf16.mxu0 %vm990_vm8, %v3248_v61 }
 0x168   : > { %6692 = vmatmul.mubr.msk.bf16.gmra.mrb[8].mxu0 %vm990_vm8, %v3265_v18 }
 0x169   : > { %6695 = vmatprep.mubr.msk.bf16.mxu0 %vm990_vm8, %v3282_v11 }
 0x170   : > { %6696 = vmatmul.mubr.msk.bf16.gmra.mrb[12].mxu0 %vm990_vm8, %v3299_v50 }
 0x171   : > { %6699 = vmatprep.mubr.msk.bf16.mxu0 %vm990_vm8, %v3316_v21 }
 0x178   : > { %6700 = vmatmul.mubr.msk.bf16.gmra.mrb[16].mxu0 %vm990_vm8, %v3333_v63 }
 0x19f   : > { %v6509_v15 = vpop.f32.mrb[0].mxu1 }
 0x1a0   : > { %v1059_v59 = vpop.f32.mrb[1].mxu1 }
 0x1a1   : > { %v6510_v36 = vpop.f32.mrb[2].mxu1 }
 0x1a2   : > { %v1062_v1 = vpop.f32.mrb[3].mxu1 }
 0x1a7   : > { %v6513_v26 = vpop.f32.mrb[4].mxu1 }
 0x1a8   : > { %v1075_v62 = vpop.f32.mrb[5].mxu1 }
 0x1a9   : > { %v6514_v9 = vpop.f32.mrb[6].mxu1 }
 0x1aa   : > { %v1078_v12 = vpop.f32.mrb[7].mxu1 }
 0x1af   : > { %v6517_v5 = vpop.f32.mrb[8].mxu1 }
 0x1b0   : > { %v1091_v53 = vpop.f32.mrb[9].mxu1 }
 0x1b1   : > { %v6518_v35 = vpop.f32.mrb[10].mxu1 }
 0x1b2   : > { %v8120_v60 = vpop.f32.mrb[11].mxu1 }
 0x1b8   : > { %v8122_v41 = vpop.f32.mrb[12].mxu1 }
 0x1b9   : > { %v8124_v4 = vpop.f32.mrb[13].mxu1 }
 0x1ba   : > { %v8126_v17 = vpop.f32.mrb[14].mxu1 }
 0x1bb   : > { %v8128_v39 = vpop.f32.mrb[15].mxu1 }
 0x1c0   : > { %v8130_v28 = vpop.f32.mrb[16].mxu1 }
 0x1c1   : > { %v8132_v37 = vpop.f32.mrb[17].mxu1 }
 0x1c2   : > { %v8134_v3 = vpop.f32.mrb[18].mxu1 }
 0x1c3   : > { %v8136_v19 = vpop.f32.mrb[19].mxu1 }
 0x22b   : > { %v6685_v58 = vpop.f32.mrb[0].mxu0 }
 0x22c   : > { %v6865_v61 = vadd.f32 %v6685_v58, %v6509_v15  ;;  %v3403_v0 = vpop.f32.mrb[1].mxu0 }
 0x22d   : > { %v6866_v48 = vadd.f32 %v3403_v0, %v1059_v59  ;;  %v6686_v7 = vpop.f32.mrb[2].mxu0 }
 0x22e   : > { %v3511_v13 = vadd.f32 %v6865_v61, %v8141_v23  ;;  %v6867_v8 = vadd.f32 %v6686_v7, %v6510_v36  ;;  %v3406_v25 = vpop.f32.mrb[3].mxu0 }
 0x22f   : > { %v3509_v44 = vadd.f32 %v6866_v48, %v8141_v23  ;;  %v6868_v29 = vadd.f32 %v3406_v25, %v1062_v1 }
 0x230   : > { %v3512_v30 = vadd.f32 %v6867_v8, %v8141_v23  ;;  %v3531_v32 = vmax.f32 %v3511_v13, 0.0 }
 0x231   : > { %v3510_v24 = vadd.f32 %v6868_v29, %v8141_v23  ;;  %v3529_v51 = vmax.f32 %v3509_v44, 0.0 }
 0x232   : > { %v3532_v42 = vmax.f32 %v3512_v30, 0.0 }
 0x233   : > { %v3530_v54 = vmax.f32 %v3510_v24, 0.0  ;;  %v6689_v31 = vpop.f32.mrb[4].mxu0 }
 0x234   : > { %v3550_v38 = vpack.c.bf16 %v3532_v42, %v3531_v32  ;;  %v6869_v40 = vadd.f32 %v6689_v31, %v6513_v26  ;;  %v3419_v18 = vpop.f32.mrb[5].mxu0 }
 0x235   : > { %v3549_v11 = vpack.c.bf16 %v3530_v54, %v3529_v51  ;;  %v6870_v20 = vadd.f32 %v3419_v18, %v1075_v62  ;;  %v6690_v22 = vpop.f32.mrb[6].mxu0 }
 0x236   : > { %v3570_v47 = vrot.slane %v3550_v38, 4  ;;  %v3515_v45 = vadd.f32 %v6869_v40, %v8141_v23  ;;  %v6871_v16 = vadd.f32 %v6690_v22, %v6514_v9  ;;  %v3422_v56 = vpop.f32.mrb[7].mxu0 }
 0x237   : > { %v3569_v14 = vrot.slane %v3549_v11, 4  ;;  %v3513_v52 = vadd.f32 %v6870_v20, %v8141_v23  ;;  %v6872_v43 = vadd.f32 %v3422_v56, %v1078_v12 }
 0x238   : > { %3591 = vst.msk [vmem:[#allocation3 + $0x10] sm:$0xf0] %vm661_vm4, %v3570_v47  ;;  %v3516_v34 = vadd.f32 %v6871_v16, %v8141_v23  ;;  %v3535_v33 = vmax.f32 %v3515_v45, 0.0 }
 0x239   : > { %3592 = vst.msk [vmem:[#allocation3 + $0x18] sm:$0xf] %vm663_vm5, %v3570_v47  ;;  %3590 = vst.msk [vmem:[#allocation3 + $0x8] sm:$0xf] %vm663_vm5, %v3569_v14  ;;  %v3514_v46 = vadd.f32 %v6872_v43, %v8141_v23  ;;  %v3533_v50 = vmax.f32 %v3513_v52, 0.0 }
 0x23a   : > { %3589 = vst.msk [vmem:[#allocation3] sm:$0xf0] %vm661_vm4, %v3569_v14  ;;  %v3536_v49 = vmax.f32 %v3516_v34, 0.0 }
 0x23b   : > { %v3534_v6 = vmax.f32 %v3514_v46, 0.0  ;;  %v6693_v27 = vpop.f32.mrb[8].mxu0 }
 0x23c   : > { %v3552_v10 = vpack.c.bf16 %v3536_v49, %v3535_v33  ;;  %v6873_v2 = vadd.f32 %v6693_v27, %v6517_v5  ;;  %v3435_v21 = vpop.f32.mrb[9].mxu0 }
 0x23d   : > { %v3551_v55 = vpack.c.bf16 %v3534_v6, %v3533_v50  ;;  %v6874_v57 = vadd.f32 %v3435_v21, %v1091_v53  ;;  %v6694_v63 = vpop.f32.mrb[10].mxu0 }
 0x23e   : > { %v3572_v15 = vrot.slane %v3552_v10, 4  ;;  %v3519_v59 = vadd.f32 %v6873_v2, %v8141_v23  ;;  %v6875_v36 = vadd.f32 %v6694_v63, %v6518_v35  ;;  %v3438_v1 = vpop.f32.mrb[11].mxu0 }
 0x23f   : > { %v3571_v26 = vrot.slane %v3551_v55, 4  ;;  %v3517_v62 = vadd.f32 %v6874_v57, %v8141_v23  ;;  %v6876_v9 = vadd.f32 %v3438_v1, %v8120_v60 }
 0x240   : > { %3595 = vst.msk [vmem:[#allocation3 + $0x30] sm:$0xf0] %vm661_vm4, %v3572_v15  ;;  %v3520_v12 = vadd.f32 %v6875_v36, %v8141_v23  ;;  %v3539_v53 = vmax.f32 %v3519_v59, 0.0 }
 0x241   : > { %3596 = vst.msk [vmem:[#allocation3 + $0x38] sm:$0xf] %vm663_vm5, %v3572_v15  ;;  %3594 = vst.msk [vmem:[#allocation3 + $0x28] sm:$0xf] %vm663_vm5, %v3571_v26  ;;  %v3518_v5 = vadd.f32 %v6876_v9, %v8141_v23  ;;  %v3537_v58 = vmax.f32 %v3517_v62, 0.0 }
 0x242   : > { %3593 = vst.msk [vmem:[#allocation3 + $0x20] sm:$0xf0] %vm661_vm4, %v3571_v26  ;;  %v3540_v35 = vmax.f32 %v3520_v12, 0.0 }
 0x243   : > { %v3538_v61 = vmax.f32 %v3518_v5, 0.0  ;;  %v6697_v0 = vpop.f32.mrb[12].mxu0 }
 0x244   : > { %v3554_v48 = vpack.c.bf16 %v3540_v35, %v3539_v53  ;;  %v6877_v60 = vadd.f32 %v6697_v0, %v8122_v41  ;;  %v3451_v7 = vpop.f32.mrb[13].mxu0 }
 0x245   : > { %v3553_v13 = vpack.c.bf16 %v3538_v61, %v3537_v58  ;;  %v6878_v8 = vadd.f32 %v3451_v7, %v8124_v4  ;;  %v6698_v25 = vpop.f32.mrb[14].mxu0 }
 0x246   : > { %v3574_v44 = vrot.slane %v3554_v48, 4  ;;  %v3523_v29 = vadd.f32 %v6877_v60, %v8141_v23  ;;  %v6879_v30 = vadd.f32 %v6698_v25, %v8126_v17  ;;  %v3454_v24 = vpop.f32.mrb[15].mxu0 }
 0x247   : > { %v3573_v32 = vrot.slane %v3553_v13, 4  ;;  %v3521_v42 = vadd.f32 %v6878_v8, %v8141_v23  ;;  %v6880_v51 = vadd.f32 %v3454_v24, %v8128_v39 }
 0x248   : > { %3599 = vst.msk [vmem:[#allocation3 + $0x50] sm:$0xf0] %vm661_vm4, %v3574_v44  ;;  %v3524_v41 = vadd.f32 %v6879_v30, %v8141_v23  ;;  %v3543_v54 = vmax.f32 %v3523_v29, 0.0 }
 0x249   : > { %3600 = vst.msk [vmem:[#allocation3 + $0x58] sm:$0xf] %vm663_vm5, %v3574_v44  ;;  %3598 = vst.msk [vmem:[#allocation3 + $0x48] sm:$0xf] %vm663_vm5, %v3573_v32  ;;  %v3522_v4 = vadd.f32 %v6880_v51, %v8141_v23  ;;  %v3541_v31 = vmax.f32 %v3521_v42, 0.0 }
 0x24a   : > { %3597 = vst.msk [vmem:[#allocation3 + $0x40] sm:$0xf0] %vm661_vm4, %v3573_v32  ;;  %v3544_v17 = vmax.f32 %v3524_v41, 0.0 }
 0x24b   : > { %v3542_v38 = vmax.f32 %v3522_v4, 0.0  ;;  %v6701_v40 = vpop.f32.mrb[16].mxu0 }
 0x24c   : > { %v3556_v18 = vpack.c.bf16 %v3544_v17, %v3543_v54  ;;  %v6881_v39 = vadd.f32 %v6701_v40, %v8130_v28  ;;  %v3467_v11 = vpop.f32.mrb[17].mxu0 }
 0x24d   : > { %v3555_v20 = vpack.c.bf16 %v3542_v38, %v3541_v31  ;;  %v6882_v22 = vadd.f32 %v3467_v11, %v8132_v37  ;;  %v6702_v47 = vpop.f32.mrb[18].mxu0 }
 0x24e   : > { %v3576_v45 = vrot.slane %v3556_v18, 4  ;;  %v3527_v16 = vadd.f32 %v6881_v39, %v8141_v23  ;;  %v6883_v56 = vadd.f32 %v6702_v47, %v8134_v3  ;;  %v3470_v14 = vpop.f32.mrb[19].mxu0 }
 0x24f   : > { %v3575_v52 = vrot.slane %v3555_v20, 4  ;;  %v3525_v43 = vadd.f32 %v6882_v22, %v8141_v23  ;;  %v6884_v34 = vadd.f32 %v3470_v14, %v8136_v19 }
 0x250   : > { %3603 = vst.msk [vmem:[#allocation3 + $0x70] sm:$0xf0] %vm661_vm4, %v3576_v45  ;;  %v3528_v28 = vadd.f32 %v6883_v56, %v8141_v23  ;;  %v3547_v46 = vmax.f32 %v3527_v16, 0.0 }
 0x251   : > { %3604 = vst.msk [vmem:[#allocation3 + $0x78] sm:$0xf] %vm663_vm5, %v3576_v45  ;;  %3602 = vst.msk [vmem:[#allocation3 + $0x68] sm:$0xf] %vm663_vm5, %v3575_v52  ;;  %v3526_v37 = vadd.f32 %v6884_v34, %v8141_v23  ;;  %v3545_v33 = vmax.f32 %v3525_v43, 0.0  ;;  %v7263_v23 = vmov (!%p6240_p13), 0  }
 0x252   : > { %3601 = vst.msk [vmem:[#allocation3 + $0x60] sm:$0xf0] %vm661_vm4, %v3575_v52  ;;  %v3548_v3 = vmax.f32 %v3528_v28, 0.0  ;;  %3612 = vst.msk [vmem:[#allocation3] sm:$0xf0] (!%p6240_p13), %vm661_vm4, %v7263_v23 }
 0x253   : > { %v3546_v49 = vmax.f32 %v3526_v37, 0.0  ;;  %3613 = vst.msk [vmem:[#allocation3 + $0x8] sm:$0xf] (!%p6240_p13), %vm663_vm5, %v7263_v23 }
 0x254   : > { %v3558_v50 = vpack.c.bf16 %v3548_v3, %v3547_v46  ;;  %3611 = sbr.rel (%p6240_p13) target bundleno = 603 (0x25b), region = 52 }
 0x255   : > { %v3557_v6 = vpack.c.bf16 %v3546_v49, %v3545_v33 }
 0x256   : > { %v3578_v27 = vrot.slane %v3558_v50, 4 }
 0x257   : > { %v3577_v19 = vrot.slane %v3557_v6, 4 }
 0x258   : > { %3607 = vst.msk [vmem:[#allocation3 + $0x90] sm:$0xf0] %vm661_vm4, %v3578_v27 }
 0x259   : > { %3608 = vst.msk [vmem:[#allocation3 + $0x98] sm:$0xf] %vm663_vm5, %v3578_v27  ;;  %3606 = vst.msk [vmem:[#allocation3 + $0x88] sm:$0xf] %vm663_vm5, %v3577_v19 }
 0x25a   : > { %3605 = vst.msk [vmem:[#allocation3 + $0x80] sm:$0xf0] %vm661_vm4, %v3577_v19 }
 0x25b PF: > { %p6241_p0 = scmp.ne.s32.totalorder %s7245_s24, 1 }
 0x25c   : > { %v7264_v10 = vmov (!%p6241_p0), 0  }
 0x25d   : > { %3616 = sbr.rel (%p6241_p0) target bundleno = 612 (0x264), region = 56  ;;  %3618 = vst.msk [vmem:[#allocation3 + $0x90] sm:$0xf0] (!%p6241_p0), %vm661_vm4, %v7264_v10 }
 0x25e   : > { %3619 = vst.msk [vmem:[#allocation3 + $0x98] sm:$0xf] (!%p6241_p0), %vm663_vm5, %v7264_v10 }
 0x264 PF: > { %v6242_v2 = vld [vmem:[%s8719_s5 + $0x2] sm:$0x3]  ;;  %v3621_v21 = vld [vmem:[#allocation3 + $0x8] sm:$0xf]  ;;  %v8201_v55 = vld [vmem:[#allocation3] sm:$0xf0] }
 0x265   : > { %7162 = vmatprep.subr.msk.bf16.mxu1 %vm1021_vm0, %v6242_v2  ;;  %v3848_v57 = vsel %vm1021_vm0, %v6242_v2, 0  ;;  %v3797_v63 = vrot.slane %v8201_v55, 4  ;;  %v3798_v15 = vrot.slane %v3621_v21, 4  ;;  %v8206_v59 = vld [vmem:[#allocation3 + $0x18] sm:$0xf]  ;;  %v3645_v38 = vshrl.u32 %v3621_v21, 16 }
 0x266   : > { %6704 = vmatpush3.bf16.msra.mxu1 %v3848_v57  ;;  %v8208_v36 = vld [vmem:[#allocation3 + $0x10] sm:$0xf0]  ;;  %v3801_v1 = vrot.slane %v8206_v59, 4  ;;  %v3772_v9 = vld [vmem:[%s8719_s5] sm:$0x3]  ;;  %v3648_v40 = vshll.u32 %v3621_v21, 16 }
 0x267   : > { %v3799_v26 = vsel %vm957_vm13, %v3797_v63, %v3798_v15  ;;  %v3800_v62 = vrot.slane %v8208_v36, 4  ;;  %v3972_v12 = vsel %vm1021_vm0, %v3772_v9, 0  ;;  %7163 = vmatprep.subr.msk.bf16.mxu1 %vm1021_vm0, %v3772_v9  ;;  %v8219_v5 = vld [vmem:[#allocation3 + $0x28] sm:$0xf]  ;;  %v8222_v35 = vld [vmem:[#allocation3 + $0x20] sm:$0xf0] }
 0x268   : > { %6705 = vmatprep.mubr.msk.bf16.mxu1 %vm990_vm8, %v3799_v26  ;;  %v3804_v58 = vrot.slane %v8219_v5, 4  ;;  %v3803_v61 = vrot.slane %v8222_v35, 4  ;;  %v8227_v0 = vld [vmem:[#allocation3 + $0x38] sm:$0xf]  ;;  %v8229_v48 = vld [vmem:[#allocation3 + $0x30] sm:$0xf0] }
 0x269   : > { %v3802_v53 = vsel %vm957_vm13, %v3800_v62, %v3801_v1  ;;  %v3806_v60 = vrot.slane %v8229_v48, 4  ;;  %v3807_v7 = vrot.slane %v8227_v0, 4  ;;  %v8233_v13 = vld [vmem:[#allocation3 + $0x48] sm:$0xf]  ;;  %v8235_v8 = vld [vmem:[#allocation3 + $0x40] sm:$0xf0] }
 0x26a   : > { %6706 = vmatmul.mubr.msk.bf16.vlgmr.msra.gmra.mrb[20].mxu1 %vm990_vm8, %v3802_v53  ;;  %v3805_v25 = vsel %vm957_vm13, %v3803_v61, %v3804_v58  ;;  %v3809_v44 = vrot.slane %v8235_v8, 4  ;;  %v3810_v29 = vrot.slane %v8233_v13, 4  ;;  %v8243_v32 = vld [vmem:[#allocation3 + $0x58] sm:$0xf]  ;;  %v8245_v42 = vld [vmem:[#allocation3 + $0x50] sm:$0xf0] }
 0x26b   : > { %6722 = vmatpush3.bf16.msra.mxu1 %v3972_v12  ;;  %6709 = vmatprep.mubr.msk.bf16.mxu1 %vm990_vm8, %v3805_v25  ;;  %v3808_v30 = vsel %vm957_vm13, %v3806_v60, %v3807_v7  ;;  %v8250_v51 = vld [vmem:[%s8719_s5 + $0x4] sm:$0x3]  ;;  %v8252_v41 = vld [vmem:[#allocation3 + $0x68] sm:$0xf]  ;;  %v3812_v17 = vrot.slane %v8245_v42, 4  ;;  %v3813_v31 = vrot.slane %v8243_v32, 4 }
 0x26c   : > { %v3811_v24 = vsel %vm957_vm13, %v3809_v44, %v3810_v29  ;;  %v8254_v4 = vld [vmem:[#allocation3 + $0x60] sm:$0xf0]  ;;  %7164 = vmatprep.subr.msk.bf16.mxu1 %vm1021_vm0, %v8250_v51  ;;  %v3816_v39 = vrot.slane %v8252_v41, 4  ;;  %v3647_v47 = vrot.slane %v3645_v38, 3  ;;  %v3650_v45 = vrot.slane %v3648_v40, 4 }
 0x26d   : > { %v3620_v54 = vld [vmem:[#allocation3] sm:$0xf8]  ;;  %v3815_v18 = vrot.slane %v8254_v4, 4  ;;  %v3814_v22 = vsel %vm957_vm13, %v3812_v17, %v3813_v31  ;;  %v3622_v16 = vld [vmem:[#allocation3 + $0x10] sm:$0xf8]  ;;  %v3662_v37 = vshrl.u32 %v8206_v59, 16 }
 0x26e   : > { %v3637_v11 = vshrl.u32 %v3620_v54, 16  ;;  %v3640_v20 = vshll.u32 %v3620_v54, 16  ;;  %v8266_v14 = vld [vmem:[#allocation3 + $0x78] sm:$0xf]  ;;  %v8268_v52 = vld [vmem:[#allocation3 + $0x70] sm:$0xf0]  ;;  %v3651_v6 = vor.u32 %v3650_v45, %v3647_v47 }
 0x26f   : > { %v3817_v56 = vsel %vm957_vm13, %v3815_v18, %v3816_v39  ;;  %v3624_v28 = vld [vmem:[#allocation3 + $0x20] sm:$0xf8]  ;;  %v3665_v46 = vshll.u32 %v8206_v59, 16  ;;  %v3654_v3 = vshrl.u32 %v3622_v16, 16  ;;  %v3657_v33 = vshll.u32 %v3622_v16, 16 }
 0x270   : > { %v3639_v43 = vrot.slane %v3637_v11, 3  ;;  %v3642_v34 = vrot.slane %v3640_v20, 4  ;;  %v3818_v49 = vrot.slane %v8268_v52, 4  ;;  %v3819_v50 = vrot.slane %v8266_v14, 4  ;;  %v3626_v59 = vld [vmem:[#allocation3 + $0x30] sm:$0xf8] }
 0x271   : > { %v3679_v27 = vshrl.u32 %v8219_v5, 16  ;;  %v3671_v23 = vshrl.u32 %v3624_v28, 16  ;;  %v3674_v10 = vshll.u32 %v3624_v28, 16  ;;  %v3682_v2 = vshll.u32 %v8219_v5, 16  ;;  %v3628_v58 = vld [vmem:[#allocation3 + $0x40] sm:$0xf8] }
 0x272   : > { %6710 = vmatmul.mubr.msk.bf16.gmra.mrb[24].mxu1 %vm990_vm8, %v3808_v30  ;;  %v3643_v19 = vor.u32 %v3642_v34, %v3639_v43  ;;  %v3664_v21 = vrot.slane %v3662_v37, 3  ;;  %v3667_v57 = vrot.slane %v3665_v46, 4  ;;  %v3656_v63 = vrot.slane %v3654_v3, 3  ;;  %v3630_v45 = vld [vmem:[#allocation3 + $0x50] sm:$0xf8] }
 0x273   : > { %6713 = vmatprep.mubr.msk.bf16.mxu1 %vm990_vm8, %v3811_v24  ;;  %v3659_v15 = vrot.slane %v3657_v33, 4  ;;  %v3820_v1 = vsel %vm957_vm13, %v3818_v49, %v3819_v50  ;;  %v3681_v26 = vrot.slane %v3679_v27, 3  ;;  %v3673_v9 = vrot.slane %v3671_v23, 3  ;;  %v8293_v34 = vld [vmem:[%s8719_s5 + $0x6] sm:$0x3] }
 0x274   : > { %v3652_v62 = vsel %vm498_vm7, %v3643_v19, %v3651_v6  ;;  %v3676_v12 = vrot.slane %v3674_v10, 4  ;;  %v3684_v53 = vrot.slane %v3682_v2, 4  ;;  %v3688_v61 = vshrl.u32 %v3626_v59, 16 }
 0x275   : > { %v3691_v60 = vshll.u32 %v3626_v59, 16  ;;  %v3660_v7 = vor.u32 %v3659_v15, %v3656_v63  ;;  %v3668_v5 = vor.u32 %v3667_v57, %v3664_v21  ;;  %v3696_v25 = vshrl.u32 %v8227_v0, 16  ;;  %v3634_v63 = vld [vmem:[#allocation3 + $0x70] sm:$0xf8] }
 0x276   : > { %v3699_v44 = vshll.u32 %v8227_v0, 16  ;;  %v3705_v29 = vshrl.u32 %v3628_v58, 16  ;;  %v3708_v30 = vshll.u32 %v3628_v58, 16  ;;  %v3713_v24 = vshrl.u32 %v8233_v13, 16 }
 0x277   : > { %v3716_v54 = vshll.u32 %v8233_v13, 16  ;;  %v3677_v17 = vor.u32 %v3676_v12, %v3673_v9  ;;  %v3685_v31 = vor.u32 %v3684_v53, %v3681_v26  ;;  %v3690_v38 = vrot.slane %v3688_v61, 3  ;;  %v3632_v13 = vld [vmem:[#allocation3 + $0x60] sm:$0xf8] }
 0x278   : > { %v3693_v40 = vrot.slane %v3691_v60, 4  ;;  %v3669_v18 = vsel %vm498_vm7, %v3660_v7, %v3668_v5  ;;  %v3698_v39 = vrot.slane %v3696_v25, 3  ;;  %v3701_v11 = vrot.slane %v3699_v44, 4 }
 0x279   : > { %v3707_v20 = vrot.slane %v3705_v29, 3  ;;  %v3715_v47 = vrot.slane %v3713_v24, 3  ;;  %v3718_v0 = vrot.slane %v3716_v54, 4  ;;  %v4242_v16 = vsel %vm1021_vm0, %v8250_v51, 0 }
 0x27a   : > { %6714 = vmatmul.mubr.msk.bf16.gmra.mrb[28].mxu1 %vm990_vm8, %v3814_v22  ;;  %v3710_v22 = vrot.slane %v3708_v30, 4  ;;  %v3694_v43 = vor.u32 %v3693_v40, %v3690_v38  ;;  %v3722_v28 = vshrl.u32 %v3630_v45, 16  ;;  %v3725_v37 = vshll.u32 %v3630_v45, 16 }
 0x27b   : > { %6717 = vmatprep.mubr.msk.bf16.mxu1 %vm990_vm8, %v3817_v56  ;;  %v3686_v56 = vsel %vm498_vm7, %v3677_v17, %v3685_v31  ;;  %v3730_v46 = vshrl.u32 %v8243_v32, 16  ;;  %v3733_v3 = vshll.u32 %v8243_v32, 16  ;;  %v3702_v51 = vor.u32 %v3701_v11, %v3698_v39 }
 0x27c   : > { %v3711_v33 = vor.u32 %v3710_v22, %v3707_v20  ;;  %v3719_v49 = vor.u32 %v3718_v0, %v3715_v47  ;;  %v3739_v50 = vshrl.u32 %v3632_v13, 16  ;;  %v3742_v6 = vshll.u32 %v3632_v13, 16  ;;  %v4073_v20 = vld [vmem:[#allocation3 + $0x28] sm:$0x1f] }
 0x27d   : > { %v3747_v27 = vshrl.u32 %v8252_v41, 16  ;;  %v3750_v19 = vshll.u32 %v8252_v41, 16  ;;  %v3724_v23 = vrot.slane %v3722_v28, 3  ;;  %v3727_v10 = vrot.slane %v3725_v37, 4 }
 0x27e   : > { %v3732_v2 = vrot.slane %v3730_v46, 3  ;;  %v3735_v21 = vrot.slane %v3733_v3, 4  ;;  %v3703_v32 = vsel %vm498_vm7, %v3694_v43, %v3702_v51  ;;  %v3720_v57 = vsel %vm498_vm7, %v3711_v33, %v3719_v49 }
 0x27f   : > { %v3741_v15 = vrot.slane %v3739_v50, 3  ;;  %v3744_v59 = vrot.slane %v3742_v6, 4  ;;  %v3752_v26 = vrot.slane %v3750_v19, 4  ;;  %v3728_v41 = vor.u32 %v3727_v10, %v3724_v23  ;;  %v4074_v10 = vld [vmem:[#allocation3 + $0x38] sm:$0x1f] }
 0x280   : > { %v3736_v9 = vor.u32 %v3735_v21, %v3732_v2  ;;  %v3756_v12 = vshrl.u32 %v3634_v63, 16  ;;  %v3759_v53 = vshll.u32 %v3634_v63, 16  ;;  %v3764_v58 = vshrl.u32 %v8266_v14, 16  ;;  %v4075_v2 = vld [vmem:[#allocation3 + $0x48] sm:$0x1f] }
 0x281   : > { %v3767_v61 = vshll.u32 %v8266_v14, 16  ;;  %v4080_v60 = vshrl.u32 %v8201_v55, 16  ;;  %v4083_v7 = vshll.u32 %v8201_v55, 16  ;;  %v3745_v5 = vor.u32 %v3744_v59, %v3741_v15 }
 0x282   : > { %6718 = vmatmul.mubr.msk.bf16.gmra.mrb[32].mxu1 %vm990_vm8, %v3820_v1  ;;  %v3749_v1 = vrot.slane %v3747_v27, 3  ;;  %v3737_v30 = vsel %vm498_vm7, %v3728_v41, %v3736_v9  ;;  %v3758_v24 = vrot.slane %v3756_v12, 3  ;;  %v3761_v54 = vrot.slane %v3759_v53, 4 }
 0x283   : > { %6723 = vmatprep.mubr.msk.bf16.mxu1 %vm990_vm8, %v3652_v62  ;;  %v4071_v62 = vld [vmem:[#allocation3 + $0x8] sm:$0x1f]  ;;  %v3766_v17 = vrot.slane %v3764_v58, 3  ;;  %v3769_v31 = vrot.slane %v3767_v61, 4  ;;  %v4082_v38 = vrot.slane %v4080_v60, 4  ;;  %v4085_v40 = vrot.slane %v4083_v7, 5 }
 0x284   : > { %v3753_v25 = vor.u32 %v3752_v26, %v3749_v1  ;;  %v4088_v44 = vshrl.u32 %v4071_v62, 16  ;;  %v4091_v29 = vshll.u32 %v4071_v62, 16  ;;  %v4097_v55 = vshrl.u32 %v8208_v36, 16 }
 0x285   : > { %v4100_v22 = vshll.u32 %v8208_v36, 16  ;;  %v3762_v45 = vor.u32 %v3761_v54, %v3758_v24  ;;  %v4114_v43 = vshrl.u32 %v8222_v35, 16  ;;  %v4117_v28 = vshll.u32 %v8222_v35, 16  ;;  %v4077_v54 = vld [vmem:[#allocation3 + $0x68] sm:$0x1f] }
 0x286   : > { %v3754_v39 = vsel %vm498_vm7, %v3745_v5, %v3753_v25  ;;  %v4090_v14 = vrot.slane %v4088_v44, 4  ;;  %v4093_v11 = vrot.slane %v4091_v29, 5  ;;  %v4122_v37 = vshrl.u32 %v4073_v20, 16  ;;  %v4076_v5 = vld [vmem:[#allocation3 + $0x58] sm:$0x1f] }
 0x287   : > { %v4125_v46 = vshll.u32 %v4073_v20, 16  ;;  %v4099_v3 = vrot.slane %v4097_v55, 4  ;;  %v4102_v51 = vrot.slane %v4100_v22, 5  ;;  %v4116_v50 = vrot.slane %v4114_v43, 4  ;;  %v4358_v43 = vld [vmem:[#allocation3 + $0x10] sm:$0xf8] }
 0x288   : > { %v4094_v13 = vor.u32 %v4093_v11, %v4090_v14  ;;  %v4119_v27 = vrot.slane %v4117_v28, 5  ;;  %v4124_v19 = vrot.slane %v4122_v37, 4  ;;  %v4139_v63 = vshrl.u32 %v4074_v10, 16 }
 0x289   : > { %v4127_v23 = vrot.slane %v4125_v46, 5  ;;  %v4103_v21 = vor.u32 %v4102_v51, %v4099_v3  ;;  %v4142_v15 = vshll.u32 %v4074_v10, 16  ;;  %v4148_v59 = vshrl.u32 %v8235_v8, 16 }
 0x28a   : > { %6724 = vmatmul.mubr.msk.bf16.vlgmr.msra.gmra.mrb[20].mxu1 %vm990_vm8, %v3669_v18  ;;  %v4072_v18 = vld [vmem:[#allocation3 + $0x18] sm:$0x1f]  ;;  %v4151_v1 = vshll.u32 %v8235_v8, 16  ;;  %v4120_v26 = vor.u32 %v4119_v27, %v4116_v50  ;;  %v4156_v41 = vshrl.u32 %v4075_v2, 16  ;;  %v4159_v9 = vshll.u32 %v4075_v2, 16 }
 0x28b   : > { %6740 = vmatpush3.bf16.msra.mxu1 %v4242_v16  ;;  %6727 = vmatprep.mubr.msk.bf16.mxu1 %vm990_vm8, %v3686_v56  ;;  %v4105_v47 = vshrl.u32 %v4072_v18, 16  ;;  %v4108_v0 = vshll.u32 %v4072_v18, 16  ;;  %v3770_v16 = vor.u32 %v3769_v31, %v3766_v17  ;;  %v4086_v56 = vor.u32 %v4085_v40, %v4082_v38  ;;  %v8336_v17 = vld [vmem:[%s8719_s5 + $0x8] sm:$0x3] }
 0x28c   : > { %7165 = vmatprep.subr.msk.bf16.mxu1 %vm1021_vm0, %v8293_v34  ;;  %v4128_v62 = vor.u32 %v4127_v23, %v4124_v19  ;;  %v4141_v61 = vrot.slane %v4139_v63, 4  ;;  %v4144_v60 = vrot.slane %v4142_v15, 5  ;;  %v4150_v7 = vrot.slane %v4148_v59, 4  ;;  %v4360_v15 = vld [vmem:[#allocation3 + $0x20] sm:$0xf8] }
 0x28d   : > { %v4107_v33 = vrot.slane %v4105_v47, 4  ;;  %v4110_v36 = vrot.slane %v4108_v0, 5  ;;  %v3771_v49 = vsel %vm498_vm7, %v3762_v45, %v3770_v16  ;;  %v4095_v6 = vsel %vm1294_vm11, %v4086_v56, %v4094_v13  ;;  %v4078_v56 = vld [vmem:[#allocation3 + $0x78] sm:$0x1f] }
 0x28e   : > { %v4537_v25 = vsel %vm1021_vm0, %v8293_v34, 0  ;;  %v4129_v44 = vsel %vm1294_vm11, %v4120_v26, %v4128_v62  ;;  %v4158_v29 = vrot.slane %v4156_v41, 4  ;;  %v4161_v8 = vrot.slane %v4159_v9, 5  ;;  %v8355_v62 = vld [vmem:[#allocation3 + $0x28] sm:$0xf] }
 0x28f   : > { %v4111_v35 = vor.u32 %v4110_v36, %v4107_v33  ;;  %v4168_v24 = vshll.u32 %v8245_v42, 16  ;;  %v4173_v31 = vshrl.u32 %v4076_v5, 16  ;;  %v4176_v38 = vshll.u32 %v4076_v5, 16 }
 0x290   : > { %v4145_v40 = vor.u32 %v4144_v60, %v4141_v61  ;;  %v4162_v14 = vor.u32 %v4161_v8, %v4158_v29  ;;  %v4190_v11 = vshrl.u32 %v4077_v54, 16  ;;  %v4193_v20 = vshll.u32 %v4077_v54, 16 }
 0x291   : > { %v4112_v12 = vsel %vm1294_vm11, %v4103_v21, %v4111_v35  ;;  %v4170_v22 = vrot.slane %v4168_v24, 5  ;;  %v4175_v47 = vrot.slane %v4173_v31, 4  ;;  %v4178_v0 = vrot.slane %v4176_v38, 5 }
 0x292   : > { %6728 = vmatmul.mubr.msk.bf16.gmra.mrb[24].mxu1 %vm990_vm8, %v3703_v32  ;;  %v4131_v32 = vshrl.u32 %v8229_v48, 16  ;;  %v4192_v37 = vrot.slane %v4190_v11, 4  ;;  %v4195_v46 = vrot.slane %v4193_v20, 5  ;;  %v4199_v51 = vshrl.u32 %v8268_v52, 16 }
 0x293   : > { %6731 = vmatprep.mubr.msk.bf16.mxu1 %vm990_vm8, %v3720_v57  ;;  %v4134_v57 = vshll.u32 %v8229_v48, 16  ;;  %v4153_v48 = vrot.slane %v4151_v1, 5  ;;  %v4179_v33 = vor.u32 %v4178_v0, %v4175_v47  ;;  %v4202_v36 = vshll.u32 %v8268_v52, 16 }
 0x294   : > { %v4133_v53 = vrot.slane %v4131_v32, 4  ;;  %v4210_v50 = vshll.u32 %v4078_v56, 16  ;;  %v4378_v27 = vshll.u32 %v4358_v43, 16  ;;  %v4196_v2 = vor.u32 %v4195_v46, %v4192_v37 }
 0x295   : > { %v4136_v58 = vrot.slane %v4134_v57, 5  ;;  %v4154_v18 = vor.u32 %v4153_v48, %v4150_v7  ;;  %v4201_v21 = vrot.slane %v4199_v51, 4  ;;  %v4204_v32 = vrot.slane %v4202_v36, 5 }
 0x296   : > { %v4212_v63 = vrot.slane %v4210_v50, 5  ;;  %v4380_v59 = vrot.slane %v4378_v27, 4  ;;  %v4392_v9 = vshrl.u32 %v4360_v15, 16  ;;  %v4400_v61 = vshrl.u32 %v8355_v62, 16 }
 0x297   : > { %v4137_v34 = vor.u32 %v4136_v58, %v4133_v53  ;;  %v4163_v13 = vsel %vm1294_vm11, %v4154_v18, %v4162_v14  ;;  %v4362_v53 = vld [vmem:[#allocation3 + $0x30] sm:$0xf8]  ;;  %v8358_v58 = vld [vmem:[#allocation3 + $0x38] sm:$0xf]  ;;  %v4403_v60 = vshll.u32 %v8355_v62, 16  ;;  %v4205_v7 = vor.u32 %v4204_v32, %v4201_v21 }
 0x298   : > { %v4412_v29 = vshll.u32 %v4362_v53, 16  ;;  %v4417_v8 = vshrl.u32 %v8358_v58, 16  ;;  %v4394_v24 = vrot.slane %v4392_v9, 3  ;;  %v4402_v31 = vrot.slane %v4400_v61, 3  ;;  %v4366_v14 = vld [vmem:[#allocation3 + $0x50] sm:$0xf8] }
 0x299   : > { %v4146_v45 = vsel %vm1294_vm11, %v4137_v34, %v4145_v40  ;;  %v4405_v38 = vrot.slane %v4403_v60, 4  ;;  %v4364_v34 = vld [vmem:[#allocation3 + $0x40] sm:$0xf8]  ;;  %v4727_v21 = vsel %vm1021_vm0, %v8336_v17, 0  ;;  %v8382_v32 = vld [vmem:[#allocation3 + $0x68] sm:$0xf] }
 0x29a   : > { %6732 = vmatmul.mubr.msk.bf16.gmra.mrb[28].mxu1 %vm990_vm8, %v3737_v30  ;;  %v4165_v30 = vshrl.u32 %v8245_v42, 16  ;;  %v4185_v42 = vshll.u32 %v8254_v4, 16  ;;  %v4414_v11 = vrot.slane %v4412_v29, 4  ;;  %v4419_v20 = vrot.slane %v4417_v8, 3 }
 0x29b   : > { %6735 = vmatprep.mubr.msk.bf16.mxu1 %vm990_vm8, %v3754_v39  ;;  %v4182_v39 = vshrl.u32 %v8254_v4, 16  ;;  %v8346_v4 = vld [vmem:[#allocation3 + $0x18] sm:$0xf]  ;;  %v4426_v0 = vshrl.u32 %v4364_v34, 16  ;;  %v4468_v9 = vshrl.u32 %v8382_v32, 16 }
 0x29c   : > { %v4167_v55 = vrot.slane %v4165_v30, 4  ;;  %v4187_v28 = vrot.slane %v4185_v42, 5  ;;  %v4383_v19 = vshrl.u32 %v8346_v4, 16  ;;  %v4386_v23 = vshll.u32 %v8346_v4, 16 }
 0x29d   : > { %v4184_v16 = vrot.slane %v4182_v39, 4  ;;  %v4420_v30 = vshll.u32 %v8358_v58, 16  ;;  %v8368_v39 = vld [vmem:[#allocation3 + $0x48] sm:$0xf]  ;;  %v4470_v29 = vrot.slane %v4468_v9, 3 }
 0x29e   : > { %v4171_v3 = vor.u32 %v4170_v22, %v4167_v55  ;;  %v4385_v1 = vrot.slane %v4383_v19, 3  ;;  %v4388_v26 = vrot.slane %v4386_v23, 4  ;;  %v8370_v22 = vld [vmem:[#allocation3 + $0x58] sm:$0xf] }
 0x29f   : > { %v4188_v10 = vor.u32 %v4187_v28, %v4184_v16  ;;  %v4422_v55 = vrot.slane %v4420_v30, 4  ;;  %v4429_v16 = vshll.u32 %v4364_v34, 16  ;;  %v4446_v28 = vshll.u32 %v4366_v14, 16  ;;  %v4372_v30 = vld [vmem:[#allocation3 + $0x80] sm:$0xf8] }
 0x2a0   : > { %v4180_v35 = vsel %vm1294_vm11, %v4171_v3, %v4179_v33  ;;  %v4451_v37 = vshrl.u32 %v8370_v22, 16  ;;  %v4454_v46 = vshll.u32 %v8370_v22, 16  ;;  %v4428_v33 = vrot.slane %v4426_v0, 3  ;;  %v8401_v34 = vld [vmem:[#allocation3 + $0x88] sm:$0xf] }
 0x2a1   : > { %v4197_v41 = vsel %vm1294_vm11, %v4188_v10, %v4196_v2  ;;  %v4423_v51 = vor.u32 %v4422_v55, %v4419_v20  ;;  %v4448_v19 = vrot.slane %v4446_v28, 4  ;;  %v4368_v2 = vld [vmem:[#allocation3 + $0x60] sm:$0xf8]  ;;  %v4505_v20 = vshll.u32 %v8401_v34, 16  ;;  %v4652_v28 = vld [vmem:[#allocation3 + $0x10] sm:$0xf0] }
 0x2a2   : > { %6736 = vmatmul.mubr.msk.bf16.gmra.mrb[32].mxu1 %vm990_vm8, %v3771_v49  ;;  %v4207_v49 = vshrl.u32 %v4078_v56, 16  ;;  %v4434_v56 = vshrl.u32 %v8368_v39, 16  ;;  %v4453_v23 = vrot.slane %v4451_v37, 3  ;;  %v4456_v10 = vrot.slane %v4454_v46, 4 }
 0x2a3   : > { %6741 = vmatprep.mubr.msk.bf16.mxu1 %vm990_vm8, %v4095_v6  ;;  %v4375_v6 = vshrl.u32 %v4358_v43, 16  ;;  %v4437_v43 = vshll.u32 %v8368_v39, 16  ;;  %v4851_v9 = vshrl.u32 %v4652_v28, 16 }
 0x2a4   : > { %v4209_v57 = vrot.slane %v4207_v49, 4  ;;  %v4431_v49 = vrot.slane %v4429_v16, 4  ;;  %v4436_v50 = vrot.slane %v4434_v56, 3 }
 0x2a5   : > { %v4377_v52 = vrot.slane %v4375_v6, 3  ;;  %v4439_v6 = vrot.slane %v4437_v43, 4  ;;  %v4507_v43 = vrot.slane %v4505_v20, 4 }
 0x2a6   : > { %v4213_v48 = vor.u32 %v4212_v63, %v4209_v57  ;;  %v4370_v57 = vld [vmem:[#allocation3 + $0x70] sm:$0xf8]  ;;  %v8384_v63 = vld [vmem:[#allocation3 + $0x78] sm:$0xf] }
 0x2a7   : > { %v4381_v5 = vor.u32 %v4380_v59, %v4377_v52  ;;  %v4432_v52 = vor.u32 %v4431_v49, %v4428_v33  ;;  %v4440_v59 = vor.u32 %v4439_v6, %v4436_v50  ;;  %v4480_v61 = vshll.u32 %v4370_v57, 16  ;;  %v4653_v49 = vld [vmem:[#allocation3 + $0x20] sm:$0xf0]  ;;  %v8414_v50 = vld [vmem:[#allocation3 + $0x30] sm:$0xf0] }
 0x2a8   : > { %v4214_v40 = vsel %vm1294_vm11, %v4205_v7, %v4213_v48  ;;  %v4485_v60 = vshrl.u32 %v8384_v63, 16  ;;  %v4488_v7 = vshll.u32 %v8384_v63, 16  ;;  %v4679_v6 = vrot.slane %v4653_v49, 4 }
 0x2a9   : > { %v4888_v20 = vshll.u32 %v8414_v50, 16 }
 0x2aa   : > { %6742 = vmatmul.mubr.msk.bf16.vlgmr.msra.gmra.mrb[20].mxu1 %vm990_vm8, %v4112_v12  ;;  %v4395_v12 = vshll.u32 %v4360_v15, 16  ;;  %v8389_v15 = vld [vmem:[%s8719_s5 + $0xa] sm:$0x3] }
 0x2ab   : > { %6758 = vmatpush3.bf16.msra.mxu1 %v4537_v25  ;;  %6745 = vmatprep.mubr.msk.bf16.mxu1 %vm990_vm8, %v4129_v44  ;;  %v4389_v25 = vor.u32 %v4388_v26, %v4385_v1  ;;  %v4409_v44 = vshrl.u32 %v4362_v53, 16  ;;  %v4460_v1 = vshrl.u32 %v4368_v2, 16  ;;  %v4463_v26 = vshll.u32 %v4368_v2, 16 }
 0x2ac   : > { %7166 = vmatprep.subr.msk.bf16.mxu1 %vm1021_vm0, %v8336_v17  ;;  %v4397_v54 = vrot.slane %v4395_v12, 4  ;;  %v4471_v12 = vshll.u32 %v8382_v32, 16  ;;  %v4477_v53 = vshrl.u32 %v4370_v57, 16  ;;  %v8432_v57 = vld [vmem:[%s8719_s5 + $0xc] sm:$0x3] }
 0x2ad   : > { %v4390_v18 = vsel %vm498_vm7, %v4381_v5, %v4389_v25  ;;  %v4411_v42 = vrot.slane %v4409_v44, 3  ;;  %v4462_v48 = vrot.slane %v4460_v1, 3  ;;  %v4465_v5 = vrot.slane %v4463_v26, 4  ;;  %v8444_v26 = vld [vmem:[#allocation3 + $0x60] sm:$0xf0] }
 0x2ae   : > { %v4398_v47 = vor.u32 %v4397_v54, %v4394_v24  ;;  %v4441_v25 = vsel %vm498_vm7, %v4432_v52, %v4440_v59  ;;  %v4473_v8 = vrot.slane %v4471_v12, 4  ;;  %v4479_v24 = vrot.slane %v4477_v53, 3 }
 0x2af   : > { %v4415_v3 = vor.u32 %v4414_v11, %v4411_v42  ;;  %v4482_v54 = vrot.slane %v4480_v61, 4  ;;  %v4497_v42 = vshll.u32 %v4372_v30, 16  ;;  %v4502_v11 = vshrl.u32 %v8401_v34, 16 }
 0x2b0   : > { %v4689_v52 = vrot.slane %v8370_v22, 4  ;;  %v4692_v22 = vrot.slane %v8382_v32, 4  ;;  %v4854_v12 = vshll.u32 %v4652_v28, 16  ;;  %v4695_v61 = vrot.slane %v8384_v63, 4 }
 0x2b1   : > { %v4483_v55 = vor.u32 %v4482_v54, %v4479_v24  ;;  %v4499_v16 = vrot.slane %v4497_v42, 4  ;;  %v4504_v56 = vrot.slane %v4502_v11, 3  ;;  %v4868_v32 = vshrl.u32 %v4653_v49, 16 }
 0x2b2   : > { %6746 = vmatmul.mubr.msk.bf16.gmra.mrb[24].mxu1 %vm990_vm8, %v4146_v45  ;;  %v4406_v45 = vor.u32 %v4405_v38, %v4402_v31  ;;  %v4487_v31 = vrot.slane %v4485_v60, 3  ;;  %v4490_v38 = vrot.slane %v4488_v7, 4  ;;  %v4871_v54 = vshll.u32 %v4653_v49, 16 }
 0x2b3   : > { %6749 = vmatprep.mubr.msk.bf16.mxu1 %vm990_vm8, %v4163_v13  ;;  %v4443_v13 = vshrl.u32 %v4366_v14, 16  ;;  %v4474_v14 = vor.u32 %v4473_v8, %v4470_v29  ;;  %v4508_v46 = vor.u32 %v4507_v43, %v4504_v56  ;;  %v8456_v8 = vld [vmem:[#allocation3 + $0x80] sm:$0xf0]  ;;  %v4885_v42 = vshrl.u32 %v8414_v50, 16 }
 0x2b4   : > { %v4407_v36 = vsel %vm498_vm7, %v4398_v47, %v4406_v45  ;;  %v4491_v47 = vor.u32 %v4490_v38, %v4487_v31  ;;  %v4697_v63 = vrot.slane %v8456_v8, 4 }
 0x2b5   : > { %v4445_v27 = vrot.slane %v4443_v13, 3 }
 0x2b6   : > { %v4492_v13 = vsel %vm498_vm7, %v4483_v55, %v4491_v47 }
 0x2b7   : > { %v4449_v17 = vor.u32 %v4448_v19, %v4445_v27  ;;  %v4680_v27 = vrot.slane %v8355_v62, 4  ;;  %v4682_v19 = vrot.slane %v8414_v50, 4 }
 0x2ba   : > { %6750 = vmatmul.mubr.msk.bf16.gmra.mrb[28].mxu1 %vm990_vm8, %v4180_v35  ;;  %v4424_v35 = vsel %vm498_vm7, %v4415_v3, %v4423_v51  ;;  %v4676_v3 = vrot.slane %v4652_v28, 4  ;;  %v4677_v51 = vrot.slane %v8346_v4, 4  ;;  %v4681_v4 = vsel %vm957_vm13, %v4679_v6, %v4680_v27  ;;  %v4845_v28 = vld [vmem:[#allocation3 + $0x48] sm:$0x1f] }
 0x2bb   : > { %6753 = vmatprep.mubr.msk.bf16.mxu1 %vm990_vm8, %v4197_v41  ;;  %v4457_v41 = vor.u32 %v4456_v10, %v4453_v23  ;;  %v4683_v23 = vrot.slane %v8358_v58, 4  ;;  %v5013_v10 = vsel %vm1021_vm0, %v8389_v15, 0  ;;  %v4686_v58 = vrot.slane %v8368_v39, 4 }
 0x2bc   : > { %v4691_v39 = vrot.slane %v8444_v26, 4  ;;  %v4910_v6 = vshrl.u32 %v4845_v28, 16  ;;  %v4913_v27 = vshll.u32 %v4845_v28, 16 }
 0x2bd   : > { %v4458_v44 = vsel %vm498_vm7, %v4449_v17, %v4457_v41  ;;  %v4684_v2 = vsel %vm957_vm13, %v4682_v19, %v4683_v23  ;;  %v8446_v17 = vld [vmem:[#allocation3 + $0x70] sm:$0xf0]  ;;  %v4842_v41 = vld [vmem:[#allocation3 + $0x18] sm:$0x1f] }
 0x2be   : > { %v4694_v53 = vrot.slane %v8446_v17, 4  ;;  %v4859_v60 = vshrl.u32 %v4842_v41, 16  ;;  %v4862_v7 = vshll.u32 %v4842_v41, 16  ;;  %v4847_v41 = vld [vmem:[#allocation3 + $0x68] sm:$0x1f] }
 0x2c0   : > { %v4696_v29 = vsel %vm957_vm13, %v4694_v53, %v4695_v61  ;;  %v4864_v24 = vrot.slane %v4862_v7, 5  ;;  %v4848_v53 = vld [vmem:[#allocation3 + $0x78] sm:$0x1f]  ;;  %v4936_v61 = vshrl.u32 %v8444_v26, 16  ;;  %v4944_v7 = vshrl.u32 %v4847_v41, 16 }
 0x2c2   : > { %6754 = vmatmul.mubr.msk.bf16.gmra.mrb[32].mxu1 %vm990_vm8, %v4214_v40  ;;  %v4466_v40 = vor.u32 %v4465_v5, %v4462_v48  ;;  %v4843_v48 = vld [vmem:[#allocation3 + $0x28] sm:$0x1f]  ;;  %v4693_v5 = vsel %vm957_vm13, %v4691_v39, %v4692_v22 }
 0x2c3   : > { %6759 = vmatprep.mubr.msk.bf16.mxu1 %vm990_vm8, %v4390_v18  ;;  %v4494_v18 = vshrl.u32 %v4372_v30, 16  ;;  %v4861_v30 = vrot.slane %v4859_v60, 4  ;;  %v4876_v31 = vshrl.u32 %v4843_v48, 16  ;;  %v4879_v38 = vshll.u32 %v4843_v48, 16 }
 0x2c4   : > { %v4475_v45 = vsel %vm498_vm7, %v4466_v40, %v4474_v14  ;;  %v4844_v40 = vld [vmem:[#allocation3 + $0x38] sm:$0x1f]  ;;  %v4939_v60 = vshll.u32 %v8444_v26, 16  ;;  %v4947_v48 = vshll.u32 %v4847_v41, 16  ;;  %v4956_v26 = vshll.u32 %v8446_v17, 16 }
 0x2c5   : > { %v4496_v0 = vrot.slane %v4494_v18, 3  ;;  %v4698_v18 = vrot.slane %v8401_v34, 4  ;;  %v4865_v11 = vor.u32 %v4864_v24, %v4861_v30  ;;  %v4893_v55 = vshrl.u32 %v4844_v40, 16 }
 0x2c6   : > { %v4896_v47 = vshll.u32 %v4844_v40, 16  ;;  %v4881_v56 = vrot.slane %v4879_v38, 5  ;;  %v4953_v30 = vshrl.u32 %v8446_v17, 16  ;;  %v4961_v24 = vshrl.u32 %v4848_v53, 16  ;;  %v8491_v17 = vld [vmem:[#allocation3 + $0x28] sm:$0xf] }
 0x2c7   : > { %v4500_v37 = vor.u32 %v4499_v16, %v4496_v0  ;;  %v4870_v0 = vrot.slane %v4868_v32, 4  ;;  %v4878_v16 = vrot.slane %v4876_v31, 4  ;;  %v4699_v43 = vsel %vm957_vm13, %v4697_v63, %v4698_v18 }
 0x2c8   : > { %v4895_v34 = vrot.slane %v4893_v55, 4  ;;  %v4964_v32 = vshll.u32 %v4848_v53, 16  ;;  %v4941_v31 = vrot.slane %v4939_v60, 5  ;;  %v4946_v38 = vrot.slane %v4944_v7, 4 }
 0x2c9   : > { %v4509_v33 = vsel %vm498_vm7, %v4500_v37, %v4508_v46  ;;  %v4890_v46 = vrot.slane %v4888_v20, 5  ;;  %v4949_v40 = vrot.slane %v4947_v48, 5  ;;  %v4958_v20 = vrot.slane %v4956_v26, 5 }
 0x2ca   : > { %6760 = vmatmul.mubr.msk.bf16.vlgmr.msra.gmra.mrb[20].mxu1 %vm990_vm8, %v4407_v36  ;;  %v4678_v36 = vsel %vm957_vm13, %v4676_v3, %v4677_v51  ;;  %v4898_v3 = vrot.slane %v4896_v47, 5  ;;  %v4846_v51 = vld [vmem:[#allocation3 + $0x58] sm:$0x1f]  ;;  %v4963_v55 = vrot.slane %v4961_v24, 4  ;;  %v4966_v47 = vrot.slane %v4964_v32, 5 }
 0x2cb   : > { %6776 = vmatpush3.bf16.msra.mxu1 %v4727_v21  ;;  %6763 = vmatprep.mubr.msk.bf16.mxu1 %vm990_vm8, %v4424_v35  ;;  %v8425_v21 = vld [vmem:[#allocation3 + $0x40] sm:$0xf0]  ;;  %v8427_v35 = vld [vmem:[#allocation3 + $0x50] sm:$0xf0] }
 0x2cc   : > { %7167 = vmatprep.subr.msk.bf16.mxu1 %vm1021_vm0, %v8389_v15  ;;  %v4685_v62 = vrot.slane %v8425_v21, 4  ;;  %v4688_v15 = vrot.slane %v8427_v35, 4  ;;  %v4902_v49 = vshrl.u32 %v8425_v21, 16  ;;  %v4905_v50 = vshll.u32 %v8425_v21, 16 }
 0x2cd   : > { %v4919_v19 = vshrl.u32 %v8427_v35, 16  ;;  %v4922_v23 = vshll.u32 %v8427_v35, 16 }
 0x2ce   : > { %v4687_v59 = vsel %vm957_vm13, %v4685_v62, %v4686_v58  ;;  %v4690_v1 = vsel %vm957_vm13, %v4688_v15, %v4689_v52  ;;  %v4899_v62 = vor.u32 %v4898_v3, %v4895_v34  ;;  %v4904_v15 = vrot.slane %v4902_v49, 4 }
 0x2cf   : > { %v4907_v52 = vrot.slane %v4905_v50, 5  ;;  %v4921_v21 = vrot.slane %v4919_v19, 4  ;;  %v4924_v39 = vrot.slane %v4922_v23, 5  ;;  %v5157_v34 = vshll.u32 %v8491_v17, 16 }
 0x2d2   : > { %6764 = vmatmul.mubr.msk.bf16.gmra.mrb[24].mxu1 %vm990_vm8, %v4441_v25  ;;  %v4853_v25 = vrot.slane %v4851_v9, 4 }
 0x2d3   : > { %6767 = vmatprep.mubr.msk.bf16.mxu1 %vm990_vm8, %v4458_v44  ;;  %v4856_v44 = vrot.slane %v4854_v12, 5  ;;  %v5308_v12 = vsel %vm1021_vm0, %v8432_v57, 0 }
 0x2d5   : > { %v4857_v14 = vor.u32 %v4856_v44, %v4853_v25  ;;  %v4908_v25 = vor.u32 %v4907_v52, %v4904_v15  ;;  %v4925_v44 = vor.u32 %v4924_v39, %v4921_v21 }
 0x2d7   : > { %v4866_v37 = vsel %vm1294_vm11, %v4857_v14, %v4865_v11  ;;  %v4849_v14 = vld [vmem:[#allocation3 + $0x88] sm:$0x1f]  ;;  %v4955_v11 = vrot.slane %v4953_v30, 4 }
 0x2d9   : > { %v4959_v3 = vor.u32 %v4958_v20, %v4955_v11 }
 0x2da   : > { %6768 = vmatmul.mubr.msk.bf16.gmra.mrb[28].mxu1 %vm990_vm8, %v4475_v45  ;;  %v4873_v45 = vrot.slane %v4871_v54, 5  ;;  %v4938_v54 = vrot.slane %v4936_v61, 4 }
 0x2db   : > { %6771 = vmatprep.mubr.msk.bf16.mxu1 %vm990_vm8, %v4492_v13  ;;  %v4887_v13 = vrot.slane %v4885_v42, 4  ;;  %v5129_v42 = vld [vmem:[#allocation3 + $0x20] sm:$0xf8] }
 0x2dc   : > { %v5146_v28 = vshrl.u32 %v5129_v42, 16 }
 0x2e2   : > { %6772 = vmatmul.mubr.msk.bf16.gmra.mrb[32].mxu1 %vm990_vm8, %v4509_v33  ;;  %v4874_v33 = vor.u32 %v4873_v45, %v4870_v0  ;;  %v4942_v0 = vor.u32 %v4941_v31, %v4938_v54  ;;  %v4950_v45 = vor.u32 %v4949_v40, %v4946_v38  ;;  %v5137_v54 = vld [vmem:[#allocation3 + $0x60] sm:$0xf8]  ;;  %v8515_v31 = vld [vmem:[#allocation3 + $0x68] sm:$0xf] }
 0x2e3   : > { %6777 = vmatprep.mubr.msk.bf16.mxu1 %vm990_vm8, %v4678_v36  ;;  %v4882_v36 = vor.u32 %v4881_v56, %v4878_v16  ;;  %v4970_v16 = vshrl.u32 %v8456_v8, 16  ;;  %v4973_v56 = vshll.u32 %v8456_v8, 16  ;;  %v5148_v8 = vrot.slane %v5146_v28, 3 }
 0x2e4   : > { %v5214_v11 = vshrl.u32 %v5137_v54, 16  ;;  %v5217_v20 = vshll.u32 %v5137_v54, 16 }
 0x2e5   : > { %v4883_v58 = vsel %vm1294_vm11, %v4874_v33, %v4882_v36  ;;  %v4951_v33 = vsel %vm1294_vm11, %v4942_v0, %v4950_v45  ;;  %v4972_v36 = vrot.slane %v4970_v16, 4  ;;  %v4975_v49 = vrot.slane %v4973_v56, 5 }
 0x2e6   : > { %v5222_v0 = vshrl.u32 %v8515_v31, 16  ;;  %v5225_v45 = vshll.u32 %v8515_v31, 16 }
 0x2e7   : > { %v4976_v41 = vor.u32 %v4975_v49, %v4972_v36 }
 0x2e8   : > { %v5224_v36 = vrot.slane %v5222_v0, 3  ;;  %v5227_v49 = vrot.slane %v5225_v45, 4  ;;  %v5448_v45 = vrot.slane %v8491_v17, 4 }
 0x2ea   : > { %6778 = vmatmul.mubr.msk.bf16.vlgmr.msra.gmra.mrb[20].mxu1 %vm990_vm8, %v4681_v4  ;;  %v4927_v4 = vshrl.u32 %v4846_v51, 16 }
 0x2eb   : > { %6794 = vmatpush3.bf16.msra.mxu1 %v5013_v10  ;;  %6781 = vmatprep.mubr.msk.bf16.mxu1 %vm990_vm8, %v4684_v2  ;;  %v4930_v10 = vshll.u32 %v4846_v51, 16  ;;  %v4891_v2 = vor.u32 %v4890_v46, %v4887_v13  ;;  %v4981_v13 = vshll.u32 %v4849_v14, 16  ;;  %v5154_v46 = vshrl.u32 %v8491_v17, 16 }
 0x2ec   : > { %7168 = vmatprep.subr.msk.bf16.mxu1 %vm1021_vm0, %v8432_v57  ;;  %v4929_v22 = vrot.slane %v4927_v4, 4  ;;  %v4967_v51 = vor.u32 %v4966_v47, %v4963_v55  ;;  %v5159_v4 = vrot.slane %v5157_v34, 4  ;;  %v5219_v34 = vrot.slane %v5217_v20, 4  ;;  %v5423_v20 = vld [vmem:[#allocation3 + $0x20] sm:$0xf0] }
 0x2ed   : > { %v4932_v9 = vrot.slane %v4930_v10, 5  ;;  %v4900_v35 = vsel %vm1294_vm11, %v4891_v2, %v4899_v62  ;;  %v5156_v23 = vrot.slane %v5154_v46, 3  ;;  %v8500_v10 = vld [vmem:[#allocation3 + $0x38] sm:$0xf]  ;;  %v5133_v62 = vld [vmem:[#allocation3 + $0x40] sm:$0xf8] }
 0x2ee   : > { %v4968_v2 = vsel %vm1294_vm11, %v4959_v3, %v4967_v51  ;;  %v5216_v46 = vrot.slane %v5214_v11, 3  ;;  %v8524_v3 = vld [vmem:[#allocation3 + $0x78] sm:$0xf]  ;;  %v5447_v0 = vrot.slane %v5423_v20, 4 }
 0x2f2   : > { %6782 = vmatmul.mubr.msk.bf16.gmra.mrb[24].mxu1 %vm990_vm8, %v4687_v59  ;;  %v4912_v59 = vrot.slane %v4910_v6, 4  ;;  %v4983_v6 = vrot.slane %v4981_v13, 5  ;;  %v5139_v13 = vld [vmem:[#allocation3 + $0x70] sm:$0xf8] }
 0x2f3   : > { %6785 = vmatprep.mubr.msk.bf16.mxu1 %vm990_vm8, %v4690_v1  ;;  %v4915_v1 = vrot.slane %v4913_v27, 5  ;;  %v5131_v27 = vld [vmem:[#allocation3 + $0x30] sm:$0xf8] }
 0x2f4   : > { %v5163_v15 = vshrl.u32 %v5131_v27, 16  ;;  %v5166_v52 = vshll.u32 %v5131_v27, 16  ;;  %v8534_v27 = vld [vmem:[%s8719_s5 + $0x10] sm:$0x3] }
 0x2f5   : > { %v4916_v57 = vor.u32 %v4915_v1, %v4912_v59  ;;  %v5171_v59 = vshrl.u32 %v8500_v10, 16  ;;  %v5174_v1 = vshll.u32 %v8500_v10, 16 }
 0x2f6   : > { %v5165_v61 = vrot.slane %v5163_v15, 3  ;;  %v5168_v60 = vrot.slane %v5166_v52, 4  ;;  %v5228_v52 = vor.u32 %v5227_v49, %v5224_v36  ;;  %v8570_v36 = vld [vmem:[#allocation3 + $0x50] sm:$0xf0]  ;;  %v8572_v49 = vld [vmem:[#allocation3 + $0x60] sm:$0xf0] }
 0x2f7   : > { %v4917_v63 = vsel %vm1294_vm11, %v4908_v25, %v4916_v57  ;;  %v5173_v7 = vrot.slane %v5171_v59, 3  ;;  %v5176_v48 = vrot.slane %v5174_v1, 4 }
 0x2f8   : > { %v5169_v38 = vor.u32 %v5168_v60, %v5165_v61 }
 0x2f9   : > { %v5177_v40 = vor.u32 %v5176_v48, %v5173_v7 }
 0x2fa   : > { %6786 = vmatmul.mubr.msk.bf16.gmra.mrb[28].mxu1 %vm990_vm8, %v4693_v5  ;;  %v8481_v5 = vld [vmem:[%s8719_s5 + $0xe] sm:$0x3] }
 0x2fb   : > { %6789 = vmatprep.mubr.msk.bf16.mxu1 %vm990_vm8, %v4696_v29  ;;  %v4933_v29 = vor.u32 %v4932_v9, %v4929_v22  ;;  %v5160_v22 = vor.u32 %v5159_v4, %v5156_v23  ;;  %v5180_v9 = vshrl.u32 %v5133_v62, 16  ;;  %v5178_v16 = vsel %vm498_vm7, %v5169_v38, %v5177_v40 }
 0x2fc   : > { %v5498_v51 = vsel %vm1021_vm0, %v8481_v5, 0  ;;  %v5239_v23 = vshrl.u32 %v8524_v3, 16 }
 0x2fd   : > { %v4934_v18 = vsel %vm1294_vm11, %v4925_v44, %v4933_v29  ;;  %v5135_v44 = vld [vmem:[#allocation3 + $0x50] sm:$0xf8]  ;;  %v8513_v29 = vld [vmem:[#allocation3 + $0x58] sm:$0xf]  ;;  %v5182_v30 = vrot.slane %v5180_v9, 3 }
 0x302   : > { %6790 = vmatmul.mubr.msk.bf16.gmra.mrb[32].mxu1 %vm990_vm8, %v4699_v43  ;;  %v4978_v43 = vshrl.u32 %v4849_v14, 16  ;;  %v5205_v14 = vshrl.u32 %v8513_v29, 16 }
 0x303   : > { %6795 = vmatprep.mubr.msk.bf16.mxu1 %vm990_vm8, %v4866_v37  ;;  %v5149_v37 = vshll.u32 %v5129_v42, 16  ;;  %v5208_v42 = vshll.u32 %v8513_v29, 16 }
 0x304   : > { %v4980_v50 = vrot.slane %v4978_v43, 4  ;;  %v5207_v28 = vrot.slane %v5205_v14, 3 }
 0x305   : > { %v5151_v19 = vrot.slane %v5149_v37, 4  ;;  %v5210_v37 = vrot.slane %v5208_v42, 4 }
 0x306   : > { %v4984_v21 = vor.u32 %v4983_v6, %v4980_v50  ;;  %v5141_v50 = vld [vmem:[#allocation3 + $0x80] sm:$0xf8]  ;;  %v8529_v6 = vld [vmem:[#allocation3 + $0x88] sm:$0xf] }
 0x307   : > { %v5152_v39 = vor.u32 %v5151_v19, %v5148_v8  ;;  %v5231_v8 = vshrl.u32 %v5139_v13, 16  ;;  %v5234_v19 = vshll.u32 %v5139_v13, 16  ;;  %v5248_v15 = vshrl.u32 %v5141_v50, 16  ;;  %v8559_v13 = vld [vmem:[#allocation3 + $0x40] sm:$0xf0] }
 0x308   : > { %v4985_v25 = vsel %vm1294_vm11, %v4976_v41, %v4984_v21  ;;  %v5251_v59 = vshll.u32 %v5141_v50, 16  ;;  %v5256_v1 = vshrl.u32 %v8529_v6, 16  ;;  %v5259_v41 = vshll.u32 %v8529_v6, 16 }
 0x309   : > { %v5161_v57 = vsel %vm498_vm7, %v5152_v39, %v5160_v22  ;;  %v5233_v21 = vrot.slane %v5231_v8, 3  ;;  %v5236_v39 = vrot.slane %v5234_v19, 4  ;;  %v5241_v22 = vrot.slane %v5239_v23, 3  ;;  %v8582_v23 = vld [vmem:[#allocation3 + $0x70] sm:$0xf0] }
 0x30a   : > { %6796 = vmatmul.mubr.msk.bf16.vlgmr.msra.gmra.mrb[20].mxu1 %vm990_vm8, %v4883_v58  ;;  %v8503_v58 = vld [vmem:[#allocation3 + $0x48] sm:$0xf]  ;;  %v5253_v60 = vrot.slane %v5251_v59, 4  ;;  %v5258_v7 = vrot.slane %v5256_v1, 3  ;;  %v5261_v48 = vrot.slane %v5259_v41, 4  ;;  %v5459_v50 = vrot.slane %v8572_v49, 4 }
 0x30b   : > { %6812 = vmatpush3.bf16.msra.mxu1 %v5308_v12  ;;  %6799 = vmatprep.mubr.msk.bf16.mxu1 %vm990_vm8, %v4900_v35  ;;  %v5183_v12 = vshll.u32 %v5133_v62, 16  ;;  %v5188_v35 = vshrl.u32 %v8503_v58, 16  ;;  %v5191_v53 = vshll.u32 %v8503_v58, 16  ;;  %v5220_v62 = vor.u32 %v5219_v34, %v5216_v46 }
 0x30c   : > { %7169 = vmatprep.subr.msk.bf16.mxu1 %vm1021_vm0, %v8481_v5  ;;  %v5242_v5 = vshll.u32 %v8524_v3, 16  ;;  %v5262_v38 = vor.u32 %v5261_v48, %v5258_v7  ;;  %v5453_v46 = vrot.slane %v8559_v13, 4  ;;  %v5454_v34 = vrot.slane %v8503_v58, 4 }
 0x30d   : > { %v5185_v26 = vrot.slane %v5183_v12, 4  ;;  %v5190_v24 = vrot.slane %v5188_v35, 3  ;;  %v5193_v32 = vrot.slane %v5191_v53, 4  ;;  %v5250_v35 = vrot.slane %v5248_v15, 3  ;;  %v5143_v53 = vld [vmem:[#allocation3 + $0x90] sm:$0xf8] }
 0x30e   : > { %v5244_v9 = vrot.slane %v5242_v5, 4  ;;  %v5229_v61 = vsel %vm498_vm7, %v5220_v62, %v5228_v52  ;;  %v5457_v58 = vrot.slane %v8513_v29, 4  ;;  %v5460_v8 = vrot.slane %v8515_v31, 4  ;;  %v8584_v5 = vld [vmem:[#allocation3 + $0x80] sm:$0xf0] }
 0x30f   : > { %v5186_v55 = vor.u32 %v5185_v26, %v5182_v30  ;;  %v5194_v47 = vor.u32 %v5193_v32, %v5190_v24  ;;  %v5265_v30 = vshrl.u32 %v5143_v53, 16  ;;  %v5268_v26 = vshll.u32 %v5143_v53, 16 }
 0x310   : > { %v5254_v54 = vor.u32 %v5253_v60, %v5250_v35  ;;  %v5461_v19 = vsel %vm957_vm13, %v5459_v50, %v5460_v8  ;;  %v5463_v29 = vrot.slane %v8524_v3, 4  ;;  %v5622_v62 = vshrl.u32 %v5423_v20, 16  ;;  %v5615_v60 = vld [vmem:[#allocation3 + $0x48] sm:$0x1f] }
 0x311   : > { %v5625_v15 = vshll.u32 %v5423_v20, 16  ;;  %v5465_v31 = vrot.slane %v8584_v5, 4  ;;  %v5466_v52 = vrot.slane %v8529_v6, 4 }
 0x312   : > { %6800 = vmatmul.mubr.msk.bf16.gmra.mrb[24].mxu1 %vm990_vm8, %v4917_v63  ;;  %v5197_v63 = vshrl.u32 %v5135_v44, 16  ;;  %v5263_v11 = vsel %vm498_vm7, %v5254_v54, %v5262_v38  ;;  %v5667_v54 = vshll.u32 %v5615_v60, 16 }
 0x313   : > { %6803 = vmatprep.mubr.msk.bf16.mxu1 %vm990_vm8, %v4934_v18  ;;  %v5200_v18 = vshll.u32 %v5135_v44, 16  ;;  %v5245_v44 = vor.u32 %v5244_v9, %v5241_v22  ;;  %v5614_v22 = vld [vmem:[#allocation3 + $0x38] sm:$0x1f]  ;;  %v5467_v9 = vsel %vm957_vm13, %v5465_v31, %v5466_v52  ;;  %v5710_v31 = vshll.u32 %v8582_v23, 16 }
 0x314   : > { %v5199_v56 = vrot.slane %v5197_v63, 3  ;;  %v5267_v63 = vrot.slane %v5265_v30, 3  ;;  %v5647_v7 = vshrl.u32 %v5614_v22, 16  ;;  %v5650_v6 = vshll.u32 %v5614_v22, 16 }
 0x315   : > { %v5202_v43 = vrot.slane %v5200_v18, 4  ;;  %v5270_v18 = vrot.slane %v5268_v26, 4  ;;  %v5656_v30 = vshrl.u32 %v8559_v13, 16  ;;  %v5724_v22 = vshrl.u32 %v8584_v5, 16 }
 0x317   : > { %v5203_v4 = vor.u32 %v5202_v43, %v5199_v56  ;;  %v5449_v56 = vsel %vm957_vm13, %v5447_v0, %v5448_v45  ;;  %v5424_v43 = vld [vmem:[#allocation3 + $0x30] sm:$0xf0]  ;;  %v5617_v0 = vld [vmem:[#allocation3 + $0x68] sm:$0x1f] }
 0x318   : > { %v5639_v3 = vshrl.u32 %v5424_v43, 16 }
 0x31a   : > { %6804 = vmatmul.mubr.msk.bf16.gmra.mrb[28].mxu1 %vm990_vm8, %v4951_v33  ;;  %v5195_v33 = vsel %vm498_vm7, %v5186_v55, %v5194_v47  ;;  %v5271_v55 = vor.u32 %v5270_v18, %v5267_v63  ;;  %v5641_v38 = vrot.slane %v5639_v3, 4  ;;  %v5649_v63 = vrot.slane %v5647_v7, 4 }
 0x31b   : > { %6807 = vmatprep.mubr.msk.bf16.mxu1 %vm990_vm8, %v4968_v2  ;;  %v5211_v2 = vor.u32 %v5210_v37, %v5207_v28  ;;  %v5450_v28 = vrot.slane %v5424_v43, 4  ;;  %v5451_v37 = vrot.slane %v8500_v10, 4  ;;  %v5456_v10 = vrot.slane %v8570_v36, 4 }
 0x31c   : > { %v5652_v18 = vrot.slane %v5650_v6, 5 }
 0x31d   : > { %v5212_v12 = vsel %vm498_vm7, %v5203_v4, %v5211_v2  ;;  %v5452_v17 = vsel %vm957_vm13, %v5450_v28, %v5451_v37  ;;  %v5613_v4 = vld [vmem:[#allocation3 + $0x28] sm:$0x1f]  ;;  %v5462_v2 = vrot.slane %v8582_v23, 4  ;;  %v5690_v37 = vshrl.u32 %v8572_v49, 16 }
 0x31e   : > { %v5630_v59 = vshrl.u32 %v5613_v4, 16  ;;  %v5633_v1 = vshll.u32 %v5613_v4, 16 }
 0x31f   : > { %v5464_v41 = vsel %vm957_vm13, %v5462_v2, %v5463_v29  ;;  %v5618_v29 = vld [vmem:[#allocation3 + $0x78] sm:$0x1f] }
 0x320   : > { %v5632_v35 = vrot.slane %v5630_v59, 4  ;;  %v5635_v53 = vrot.slane %v5633_v1, 5  ;;  %v5715_v52 = vshrl.u32 %v5618_v29, 16  ;;  %v5718_v59 = vshll.u32 %v5618_v29, 16  ;;  %v5926_v29 = vld [vmem:[%s7370_s19 + $0x20] sm:$0xff] }
 0x322   : > { %6808 = vmatmul.mubr.msk.bf16.gmra.mrb[32].mxu1 %vm990_vm8, %v4985_v25  ;;  %v8546_v25 = vld [vmem:[#allocation3 + $0x98] sm:$0xf]  ;;  %v5636_v26 = vor.u32 %v5635_v53, %v5632_v35  ;;  %v5720_v7 = vrot.slane %v5718_v59, 5 }
 0x323   : > { %6813 = vmatprep.mubr.msk.bf16.mxu1 %vm990_vm8, %v5161_v57  ;;  %v5237_v57 = vor.u32 %v5236_v39, %v5233_v21  ;;  %v5273_v24 = vshrl.u32 %v8546_v25, 16  ;;  %v5276_v32 = vshll.u32 %v8546_v25, 16  ;;  %v5624_v21 = vrot.slane %v5622_v62, 4 }
 0x324   : > { %v5627_v39 = vrot.slane %v5625_v15, 5  ;;  %v5619_v15 = vld [vmem:[#allocation3 + $0x88] sm:$0x1f] }
 0x325   : > { %v5246_v40 = vsel %vm498_vm7, %v5237_v57, %v5245_v44  ;;  %v5275_v14 = vrot.slane %v5273_v24, 3  ;;  %v5278_v42 = vrot.slane %v5276_v32, 4  ;;  %v5469_v57 = vrot.slane %v8546_v25, 4 }
 0x326   : > { %v5628_v44 = vor.u32 %v5627_v39, %v5624_v21  ;;  %v5659_v24 = vshll.u32 %v8559_v13, 16  ;;  %v5664_v32 = vshrl.u32 %v5615_v60, 16  ;;  %v5732_v35 = vshrl.u32 %v5619_v15, 16 }
 0x327   : > { %v5279_v47 = vor.u32 %v5278_v42, %v5275_v14  ;;  %v5658_v42 = vrot.slane %v5656_v30, 4  ;;  %v5735_v53 = vshll.u32 %v5619_v15, 16  ;;  %v5717_v60 = vrot.slane %v5715_v52, 4 }
 0x328   : > { %v5637_v20 = vsel %vm1294_vm11, %v5628_v44, %v5636_v26  ;;  %v5666_v25 = vrot.slane %v5664_v32, 4  ;;  %v5734_v44 = vrot.slane %v5732_v35, 4  ;;  %v5620_v26 = vld [vmem:[#allocation3 + $0x98] sm:$0x1f]  ;;  %v5932_v35 = vld [vmem:[%s7370_s19 + $0x50] sm:$0xff] }
 0x329   : > { %v5737_v30 = vrot.slane %v5735_v53, 5  ;;  %v5721_v32 = vor.u32 %v5720_v7, %v5717_v60 }
 0x32a   : > { %6814 = vmatmul.mubr.msk.bf16.vlgmr.msra.gmra.mrb[20].mxu1 %vm990_vm8, %v5178_v16  ;;  %v5280_v16 = vsel %vm498_vm7, %v5271_v55, %v5279_v47  ;;  %v5661_v55 = vrot.slane %v5659_v24, 5  ;;  %v5669_v47 = vrot.slane %v5667_v54, 5 }
 0x32b   : > { %6830 = vmatpush3.bf16.msra.mxu1 %v5498_v51  ;;  %6817 = vmatprep.mubr.msk.bf16.mxu1 %vm990_vm8, %v5195_v33  ;;  %v5784_v51 = vsel %vm1021_vm0, %v8534_v27, 0  ;;  %v5455_v33 = vsel %vm957_vm13, %v5453_v46, %v5454_v34  ;;  %v5693_v46 = vshll.u32 %v8572_v49, 16  ;;  %v5698_v34 = vshrl.u32 %v5617_v0, 16 }
 0x32c   : > { %7170 = vmatprep.subr.msk.bf16.mxu1 %vm1021_vm0, %v8534_v27  ;;  %v5458_v27 = vsel %vm957_vm13, %v5456_v10, %v5457_v58  ;;  %v5707_v49 = vshrl.u32 %v8582_v23, 16 }
 0x32d   : > { %v5700_v4 = vrot.slane %v5698_v34, 4  ;;  %v5925_v34 = vld [vmem:[%s7370_s19 + $0x18] sm:$0xff] }
 0x32e   : > { %v5709_v3 = vrot.slane %v5707_v49, 4  ;;  %v5929_v49 = vld [vmem:[%s7370_s19 + $0x38] sm:$0xff] }
 0x332   : > { %6818 = vmatmul.mubr.msk.bf16.gmra.mrb[24].mxu1 %vm990_vm8, %v5212_v12  ;;  %v8594_v12 = vld [vmem:[#allocation3 + $0x90] sm:$0xf0] }
 0x333   : > { %6821 = vmatprep.mubr.msk.bf16.mxu1 %vm990_vm8, %v5229_v61  ;;  %v5642_v61 = vshll.u32 %v5424_v43, 16  ;;  %v5468_v48 = vrot.slane %v8594_v12, 4  ;;  %v5676_v43 = vshll.u32 %v8570_v36, 16  ;;  %v5744_v54 = vshll.u32 %v8594_v12, 16 }
 0x335   : > { %v5470_v14 = vsel %vm957_vm13, %v5468_v48, %v5469_v57  ;;  %v5678_v50 = vrot.slane %v5676_v43, 5  ;;  %v5726_v48 = vrot.slane %v5724_v22, 4 }
 0x33a   : > { %6822 = vmatmul.mubr.msk.bf16.gmra.mrb[28].mxu1 %vm990_vm8, %v5246_v40  ;;  %v5644_v40 = vrot.slane %v5642_v61, 5  ;;  %v5712_v61 = vrot.slane %v5710_v31, 5 }
 0x33b   : > { %6825 = vmatprep.mubr.msk.bf16.mxu1 %vm990_vm8, %v5263_v11  ;;  %v5616_v11 = vld [vmem:[#allocation3 + $0x58] sm:$0x1f] }
 0x33c   : > { %v5645_v45 = vor.u32 %v5644_v40, %v5641_v38  ;;  %v5681_v13 = vshrl.u32 %v5616_v11, 16  ;;  %v5684_v28 = vshll.u32 %v5616_v11, 16  ;;  %v5713_v24 = vor.u32 %v5712_v61, %v5709_v3  ;;  %v5930_v61 = vld [vmem:[%s7370_s19 + $0x40] sm:$0xff] }
 0x33d   : > { %v5749_v38 = vshrl.u32 %v5620_v26, 16  ;;  %v5752_v40 = vshll.u32 %v5620_v26, 16  ;;  %v5746_v11 = vrot.slane %v5744_v54, 5  ;;  %v5936_v54 = vld [vmem:[%s7370_s19 + $0x70] sm:$0xff] }
 0x33e   : > { %v5683_v8 = vrot.slane %v5681_v13, 4 }
 0x342   : > { %6826 = vmatmul.mubr.msk.bf16.gmra.mrb[32].mxu1 %vm990_vm8, %v5280_v16  ;;  %v5673_v16 = vshrl.u32 %v8570_v36, 16  ;;  %v5695_v36 = vrot.slane %v5693_v46, 5 }
 0x343   : > { %6831 = vmatprep.mubr.msk.bf16.mxu1 %vm990_vm8, %v5449_v56  ;;  %v5653_v56 = vor.u32 %v5652_v18, %v5649_v63  ;;  %v5738_v18 = vor.u32 %v5737_v30, %v5734_v44  ;;  %v5931_v44 = vld [vmem:[%s7370_s19 + $0x48] sm:$0xff] }
 0x344   : > { %v5675_v10 = vrot.slane %v5673_v16, 4 }
 0x345   : > { %v5654_v58 = vsel %vm1294_vm11, %v5645_v45, %v5653_v56  ;;  %v8633_v45 = vld [vmem:[%s8720_s6] ss:$0 sm:$0xff]  ;;  %v5924_v56 = vld [vmem:[%s7370_s19 + $0x10] sm:$0xff] }
 0x346   : > { %v5679_v1 = vor.u32 %v5678_v50, %v5675_v10  ;;  %v5923_v10 = vld [vmem:[%s7370_s19 + $0x8] sm:$0xff] }
 0x34a   : > { %6832 = vmatmul.mubr.msk.bf16.vlgmr.msra.gmra.mrb[20].mxu1 %vm990_vm8, %v5452_v17  ;;  %v5701_v17 = vshll.u32 %v5617_v0, 16 }
 0x34b   : > { %6848 = vmatpush3.bf16.msra.mxu1 %v5784_v51  ;;  %6835 = vmatprep.mubr.msk.bf16.mxu1 %vm990_vm8, %v5455_v33  ;;  %v5662_v51 = vor.u32 %v5661_v55, %v5658_v42  ;;  %v5670_v33 = vor.u32 %v5669_v47, %v5666_v25  ;;  %v5754_v55 = vrot.slane %v5752_v40, 5 }
 0x34c   : > { %v5703_v2 = vrot.slane %v5701_v17, 5 }
 0x34d   : > { %v5671_v62 = vsel %vm1294_vm11, %v5662_v51, %v5670_v33 }
 0x34e   : > { %v5704_v39 = vor.u32 %v5703_v2, %v5700_v4 }
 0x352   : > { %6836 = vmatmul.mubr.msk.bf16.gmra.mrb[24].mxu1 %vm990_vm8, %v5458_v27  ;;  %v5686_v27 = vrot.slane %v5684_v28, 5  ;;  %v5922_v28 = vld [vmem:[%s7370_s19] sm:$0xff] }
 0x353   : > { %6839 = vmatprep.mubr.msk.bf16.mxu1 %vm990_vm8, %v5461_v19  ;;  %v5692_v19 = vrot.slane %v5690_v37, 4 }
 0x355   : > { %v5696_v21 = vor.u32 %v5695_v36, %v5692_v19  ;;  %v5928_v36 = vld [vmem:[%s7370_s19 + $0x30] sm:$0xff] }
 0x357   : > { %v5705_v6 = vsel %vm1294_vm11, %v5696_v21, %v5704_v39 }
 0x35a   : > { %6840 = vmatmul.mubr.msk.bf16.gmra.mrb[28].mxu1 %vm990_vm8, %v5464_v41  ;;  %v5687_v41 = vor.u32 %v5686_v27, %v5683_v8 }
 0x35b   : > { %6843 = vmatprep.mubr.msk.bf16.mxu1 %vm990_vm8, %v5467_v9  ;;  %v5727_v9 = vshll.u32 %v8584_v5, 16  ;;  %v5741_v5 = vshrl.u32 %v8594_v12, 16 }
 0x35c   : > { %v5688_v23 = vsel %vm1294_vm11, %v5679_v1, %v5687_v41  ;;  %v5927_v1 = vld [vmem:[%s7370_s19 + $0x28] sm:$0xff] }
 0x35d   : > { %v5729_v57 = vrot.slane %v5727_v9, 5  ;;  %v5743_v42 = vrot.slane %v5741_v5, 4 }
 0x35f   : > { %v5730_v63 = vor.u32 %v5729_v57, %v5726_v48  ;;  %v5747_v12 = vor.u32 %v5746_v11, %v5743_v42  ;;  %v5937_v42 = vld [vmem:[%s7370_s19 + $0x78] sm:$0xff] }
 0x361   : > { %v5739_v25 = vsel %vm1294_vm11, %v5730_v63, %v5738_v18  ;;  %v5934_v63 = vld [vmem:[%s7370_s19 + $0x60] sm:$0xff] }
 0x362   : > { %6844 = vmatmul.mubr.msk.bf16.gmra.mrb[32].mxu1 %vm990_vm8, %v5470_v14  ;;  %v5722_v14 = vsel %vm1294_vm11, %v5713_v24, %v5721_v32 }
 0x363   : > { %6849 = vmatprep.mubr.msk.bf16.mxu1 %vm990_vm8, %v5637_v20  ;;  %v5751_v20 = vrot.slane %v5749_v38, 4 }
 0x365   : > { %v5755_v47 = vor.u32 %v5754_v55, %v5751_v20 }
 0x367   : > { %v5756_v0 = vsel %vm1294_vm11, %v5747_v12, %v5755_v47 }
 0x36a   : > { %6850 = vmatmul.mubr.msk.bf16.vlgmr.msra.gmra.mrb[20].mxu1 %vm990_vm8, %v5654_v58 }
 0x36b   : > { %6853 = vmatprep.mubr.msk.bf16.mxu1 %vm990_vm8, %v5671_v62 }
 0x372   : > { %6854 = vmatmul.mubr.msk.bf16.gmra.mrb[24].mxu1 %vm990_vm8, %v5688_v23  ;;  %v5933_v23 = vld [vmem:[%s7370_s19 + $0x58] sm:$0xff] }
 0x373   : > { %6857 = vmatprep.mubr.msk.bf16.mxu1 %vm990_vm8, %v5705_v6 }
 0x37a   : > { %6858 = vmatmul.mubr.msk.bf16.gmra.mrb[28].mxu1 %vm990_vm8, %v5722_v14 }
 0x37b   : > { %6861 = vmatprep.mubr.msk.bf16.mxu1 %vm990_vm8, %v5739_v25  ;;  %v5935_v25 = vld [vmem:[%s7370_s19 + $0x68] sm:$0xff] }
 0x382   : > { %6862 = vmatmul.mubr.msk.bf16.gmra.mrb[32].mxu1 %vm990_vm8, %v5756_v0 }
 0x43d   : > { %v6851_v16 = vpop.f32.mrb[20].mxu1 }
 0x43e   : > { %v5908_v43 = vadd.f32 %v6851_v16, %v8633_v45  ;;  %v5820_v13 = vpop.f32.mrb[21].mxu1 }
 0x43f   : > { %v5906_v37 = vadd.f32 %v8633_v45, %v5820_v13  ;;  %v6852_v46 = vpop.f32.mrb[22].mxu1 }
 0x440   : > { %v5940_v17 = vadd.f32 %v5924_v56, %v5908_v43  ;;  %v5909_v51 = vadd.f32 %v6852_v46, %v8633_v45  ;;  %v5823_v33 = vpop.f32.mrb[23].mxu1 }
 0x441   : > { %v5938_v58 = vadd.f32 %v5922_v28, %v5906_v37  ;;  %v5907_v50 = vadd.f32 %v8633_v45, %v5823_v33 }
 0x442   : > { %5956 = vst.msk [vmem:[%s7375_s22 + $0x10] sm:$0xff] %vm990_vm8, %v5940_v17  ;;  %v5941_v8 = vadd.f32 %v5925_v34, %v5909_v51 }
 0x443   : > { %5954 = vst.msk [vmem:[%s7375_s22] sm:$0xff] %vm990_vm8, %v5938_v58  ;;  %v5939_v27 = vadd.f32 %v5923_v10, %v5907_v50 }
 0x444   : > { %5957 = vst.msk [vmem:[%s7375_s22 + $0x18] sm:$0xff] %vm990_vm8, %v5941_v8 }
 0x445   : > { %5955 = vst.msk [vmem:[%s7375_s22 + $0x8] sm:$0xff] %vm990_vm8, %v5939_v27  ;;  %v6855_v19 = vpop.f32.mrb[24].mxu1 }
 0x446   : > { %v5912_v4 = vadd.f32 %v6855_v19, %v8633_v45  ;;  %v5836_v2 = vpop.f32.mrb[25].mxu1 }
 0x447   : > { %v5910_v62 = vadd.f32 %v8633_v45, %v5836_v2  ;;  %v6856_v15 = vpop.f32.mrb[26].mxu1 }
 0x448   : > { %v5944_v31 = vadd.f32 %v5928_v36, %v5912_v4  ;;  %v5913_v52 = vadd.f32 %v6856_v15, %v8633_v45  ;;  %v5839_v59 = vpop.f32.mrb[27].mxu1 }
 0x449   : > { %v5942_v41 = vadd.f32 %v5926_v29, %v5910_v62  ;;  %v5911_v21 = vadd.f32 %v8633_v45, %v5839_v59 }
 0x44a   : > { %5960 = vst.msk [vmem:[%s7375_s22 + $0x30] sm:$0xff] %vm990_vm8, %v5944_v31  ;;  %v5945_v39 = vadd.f32 %v5929_v49, %v5913_v52 }
 0x44b   : > { %5958 = vst.msk [vmem:[%s7375_s22 + $0x20] sm:$0xff] %vm990_vm8, %v5942_v41  ;;  %v5943_v22 = vadd.f32 %v5927_v1, %v5911_v21 }
 0x44c   : > { %5961 = vst.msk [vmem:[%s7375_s22 + $0x38] sm:$0xff] %vm990_vm8, %v5945_v39 }
 0x44d   : > { %5959 = vst.msk [vmem:[%s7375_s22 + $0x28] sm:$0xff] %vm990_vm8, %v5943_v22  ;;  %v6859_v9 = vpop.f32.mrb[28].mxu1 }
 0x44e   : > { %v5916_v53 = vadd.f32 %v6859_v9, %v8633_v45  ;;  %v5852_v3 = vpop.f32.mrb[29].mxu1 }
 0x44f   : > { %v5914_v60 = vadd.f32 %v8633_v45, %v5852_v3  ;;  %v6860_v7 = vpop.f32.mrb[30].mxu1 }
 0x450   : > { %v5948_v6 = vadd.f32 %v5932_v35, %v5916_v53  ;;  %v5917_v48 = vadd.f32 %v6860_v7, %v8633_v45  ;;  %v5855_v57 = vpop.f32.mrb[31].mxu1 }
 0x451   : > { %v5946_v30 = vadd.f32 %v5930_v61, %v5914_v60  ;;  %v5915_v26 = vadd.f32 %v8633_v45, %v5855_v57 }
 0x452   : > { %5964 = vst.msk [vmem:[%s7375_s22 + $0x50] sm:$0xff] %vm990_vm8, %v5948_v6  ;;  %v5949_v24 = vadd.f32 %v5933_v23, %v5917_v48 }
 0x453   : > { %5962 = vst.msk [vmem:[%s7375_s22 + $0x40] sm:$0xff] %vm990_vm8, %v5946_v30  ;;  %v5947_v32 = vadd.f32 %v5931_v44, %v5915_v26 }
 0x454   : > { %5965 = vst.msk [vmem:[%s7375_s22 + $0x58] sm:$0xff] %vm990_vm8, %v5949_v24 }
 0x455   : > { %5963 = vst.msk [vmem:[%s7375_s22 + $0x48] sm:$0xff] %vm990_vm8, %v5947_v32  ;;  %v6863_v5 = vpop.f32.mrb[32].mxu1 }
 0x456   : > { %v5920_v38 = vadd.f32 %v6863_v5, %v8633_v45  ;;  %v5868_v40 = vpop.f32.mrb[33].mxu1 }
 0x457   : > { %v5918_v18 = vadd.f32 %v8633_v45, %v5868_v40  ;;  %v6864_v14 = vpop.f32.mrb[34].mxu1 }
 0x458   : > { %v5952_v11 = vadd.f32 %v5936_v54, %v5920_v38  ;;  %v5921_v20 = vadd.f32 %v6864_v14, %v8633_v45  ;;  %v5871_v55 = vpop.f32.mrb[35].mxu1 }
 0x459   : > { %v5950_v12 = vadd.f32 %v5934_v63, %v5918_v18  ;;  %v5919_v47 = vadd.f32 %v8633_v45, %v5871_v55 }
 0x45a   : > { %5968 = vst.msk [vmem:[%s7375_s22 + $0x70] sm:$0xff] %vm990_vm8, %v5952_v11  ;;  %v5953_v0 = vadd.f32 %v5937_v42, %v5921_v20 }
 0x45b   : > { %5966 = vst.msk [vmem:[%s7375_s22 + $0x60] sm:$0xff] %vm990_vm8, %v5950_v12  ;;  %v5951_v16 = vadd.f32 %v5935_v25, %v5919_v47 }
 0x45c   : > { %5969 = vst.msk [vmem:[%s7375_s22 + $0x78] sm:$0xff] %vm990_vm8, %v5953_v0 }
 0x45d   : > { %5967 = vst.msk [vmem:[%s7375_s22 + $0x68] sm:$0xff] %vm990_vm8, %v5951_v16 }
 0x45e PF: > { %s17_s28 = sadd.s32 1, %s7261_s28   ;;  %s8730_s24 = smov %s7253_s26 }
 0x45f   : > { %p14_p1 = scmp.ge.s32.totalorder %s17_s28, 6   ;;  %s8731_s25 = smov %s7257_s27 }
 0x460   : > { %s8732_s26 = smov %s8735_s29  ;;  %s8733_s27 = smov %s8739_s30 }
 0x461   :  { %16 = sbr.rel (!%p14_p1) target bundleno = 3 (0x3), region = 114 }

</bundles_post_ra>
